<compile_context>
chip_gen: v5e
topology: v5e:2x2
jax: 0.10.0
libtpu: 0.0.40
codegen_flags: <defaults>
</compile_context>

<pallas_src>
import functools
import math

import jax
import jax.numpy as jnp
from jax.experimental import pallas as pl
from jax.experimental.pallas import tpu as pltpu

# ----- small synthetic config consistent with HyperNet(config) -----
D_EMB = 64                  # config.hnet.d_emb
D_MODEL = 32                # config.hnet.d_hnet
N_HEADS = 4                 # config.hnet.n_transformer_heads
N_TRANSFORMER_LAYERS = 2    # config.hnet.n_transformer_layers
N_LAYERS = 2                # config.hnet.n_layers
D_A = 4                     # config.hnet.d_a
D_BIG_A = 8                 # config.hnet.d_A
ADAPTORS_PER_LAYER = 2      # config.model.adaptors_per_layer
TARGET_MODULES = ("q_proj", "v_proj")   # config.model.target_modules
SEQ = 8
BATCH = 2
LN_EPS = 1e-5
A_B = 2
D_OUTPUT = N_LAYERS * (D_A * D_BIG_A) * A_B * ADAPTORS_PER_LAYER
D_OUT_PER_LAYER = D_OUTPUT // N_LAYERS   # 128

# TODO(synk): dropout (config.hnet.dropout) is a no-op in eval mode, so it is
# intentionally not implemented in the kernel.


def _vmem():
    return pl.BlockSpec(memory_space=pltpu.MemorySpace.VMEM)


def _layernorm(x, gamma, beta):
    # x: (M, D), gamma/beta: (1, D); PyTorch LayerNorm (biased var, eps=1e-5)
    mu = jnp.mean(x, axis=-1, keepdims=True)
    xc = x - mu
    var = jnp.mean(xc * xc, axis=-1, keepdims=True)
    return xc * jax.lax.rsqrt(var + LN_EPS) * gamma + beta


# ---------------------------------------------------------------------------
# Single fused kernel: downsize MLP + n_layers x (pos add + transformer stack
# + mlp_encoder).  Everything lives in VMEM; only out_ref goes back to HBM.
# ---------------------------------------------------------------------------
def _hypernet_kernel(x_ref, pos_ref,
                     dw1_ref, db1_ref, dw2_ref, db2_ref,
                     ew1_ref, eb1_ref, ew2_ref, eb2_ref,
                     wqkv_ref, bqkv_ref, wo_ref, bo_ref,
                     g1_ref, b1_ref, wf1_ref, bf1_ref,
                     wf2_ref, bf2_ref, g2_ref, b2_ref,
                     out_ref, attn_sc,
                     *, seq, batch, d_model, n_heads, n_layers, n_xf_layers):
    f32 = jnp.float32
    dh = d_model // n_heads
    scale = 1.0 / math.sqrt(dh)

    # ---- downsize_mlp: Linear -> ReLU -> Linear, (B*S, d_emb) -> (B*S, d_model)
    x = x_ref[...]
    h = jnp.dot(x, dw1_ref[...], preferred_element_type=f32) + db1_ref[...]
    h = jnp.maximum(h, 0.0)
    x_cur = jnp.dot(h, dw2_ref[...], preferred_element_type=f32) + db2_ref[...]

    for i in range(n_layers):                       # static, tiny -> unrolled
        # pos is added exactly once, before the encoder stack of outer layer i.
        x_cur = x_cur + pos_ref[i]

        for t in range(n_xf_layers):
            # --- fused QKV projection (lane-dense (B*S, 128) result) ---
            qkv = (jnp.dot(x_cur, wqkv_ref[t], preferred_element_type=f32)
                   + bqkv_ref[t])
            q = qkv[:, 0:d_model]
            k = qkv[:, d_model:2 * d_model]
            v = qkv[:, 2 * d_model:3 * d_model]

            # --- multi-head self-attention; head outputs written straight into
            #     the (B*S, D) VMEM scratch (no stack/concatenate chain) ---
            for hd in range(n_heads):
                lo = hd * dh
                qh = q[:, lo:lo + dh] * scale
                kh = k[:, lo:lo + dh]
                vh = v[:, lo:lo + dh]
                for b in range(batch):              # batch-major rows: aligned slices
                    r0 = b * seq
                    qs = qh[r0:r0 + seq]
                    ks = kh[r0:r0 + seq]
                    vs = vh[r0:r0 + seq]
                    s = jnp.dot(qs, ks.T, preferred_element_type=f32)  # (S, S)
                    s = s - jnp.max(s, axis=-1, keepdims=True)
                    p = jnp.exp(s)
                    den = jnp.sum(p, axis=-1, keepdims=True)
                    r = pl.reciprocal(den, approx=True)   # EUP slot
                    r = r * (2.0 - den * r)               # one NR step -> full f32
                    p = p * r
                    attn_sc[r0:r0 + seq, lo:lo + dh] = jnp.dot(
                        p, vs, preferred_element_type=f32)

            attn = (jnp.dot(attn_sc[...], wo_ref[t], preferred_element_type=f32)
                    + bo_ref[t])
            y = _layernorm(x_cur + attn, g1_ref[t], b1_ref[t])

            ff = jnp.dot(y, wf1_ref[t], preferred_element_type=f32) + bf1_ref[t]
            ff = jnp.maximum(ff, 0.0)
            ff = jnp.dot(ff, wf2_ref[t], preferred_element_type=f32) + bf2_ref[t]
            x_cur = _layernorm(y + ff, g2_ref[t], b2_ref[t])

        # --- mlp_encoder head: only lane-facing HBM store (128-lane wide) ---
        e = jnp.dot(x_cur, ew1_ref[...], preferred_element_type=f32) + eb1_ref[...]
        e = jnp.maximum(e, 0.0)
        out_ref[i] = jnp.dot(e, ew2_ref[...], preferred_element_type=f32) + eb2_ref[...]


# ---------------------------------------------------------------------------
# Parameters (deterministic, xavier-normal for matrices, as in init_weights())
# ---------------------------------------------------------------------------
def init_params(key):
    keys = iter(jax.random.split(key, 64))

    def xavier(shape):
        std = math.sqrt(2.0 / (shape[0] + shape[1]))
        return std * jax.random.normal(next(keys), shape, dtype=jnp.float32)

    params = {
        "pos": xavier((N_LAYERS, D_MODEL)).reshape(1, N_LAYERS, D_MODEL),
        "downsize": (xavier((D_EMB, D_EMB)), jnp.zeros((1, D_EMB), jnp.float32),
                     xavier((D_EMB, D_MODEL)), jnp.zeros((1, D_MODEL), jnp.float32)),
        "mlp_encoder": (xavier((D_MODEL, 2 * D_MODEL)),
                        jnp.zeros((1, 2 * D_MODEL), jnp.float32),
                        xavier((2 * D_MODEL, D_OUT_PER_LAYER)),
                        jnp.zeros((1, D_OUT_PER_LAYER), jnp.float32)),
    }
    enc = []
    for _ in range(N_TRANSFORMER_LAYERS):
        enc.append(dict(
            wq=xavier((D_MODEL, D_MODEL)), bq=jnp.zeros((1, D_MODEL), jnp.float32),
            wk=xavier((D_MODEL, D_MODEL)), bk=jnp.zeros((1, D_MODEL), jnp.float32),
            wv=xavier((D_MODEL, D_MODEL)), bv=jnp.zeros((1, D_MODEL), jnp.float32),
            wo=xavier((D_MODEL, D_MODEL)), bo=jnp.zeros((1, D_MODEL), jnp.float32),
            g1=jnp.ones((1, D_MODEL), jnp.float32), b1=jnp.zeros((1, D_MODEL), jnp.float32),
            wf1=xavier((D_MODEL, 4 * D_MODEL)), bf1=jnp.zeros((1, 4 * D_MODEL), jnp.float32),
            wf2=xavier((4 * D_MODEL, D_MODEL)), bf2=jnp.zeros((1, D_MODEL), jnp.float32),
            g2=jnp.ones((1, D_MODEL), jnp.float32), b2=jnp.zeros((1, D_MODEL), jnp.float32),
        ))
    params["enc"] = enc
    return params


def prepare_kernel_params(params):
    """Build the fused / per-layer-stacked weights the kernel consumes."""
    pos = params["pos"].reshape(N_LAYERS, 1, D_MODEL)
    enc = params["enc"]
    zpad_w = jnp.zeros((D_MODEL, D_MODEL), jnp.float32)
    zpad_b = jnp.zeros((1, D_MODEL), jnp.float32)
    # QKV fused and padded to a 128-lane-dense weight: [Wq | Wk | Wv | 0].
    wqkv = jnp.stack([jnp.concatenate([p["wq"], p["wk"], p["wv"], zpad_w], axis=1)
                      for p in enc])
    bqkv = jnp.stack([jnp.concatenate([p["bq"], p["bk"], p["bv"], zpad_b], axis=1)
                      for p in enc])

    def stk(name):
        return jnp.stack([p[name] for p in enc])

    enc_stacked = (wqkv, bqkv, stk("wo"), stk("bo"), stk("g1"), stk("b1"),
                   stk("wf1"), stk("bf1"), stk("wf2"), stk("bf2"),
                   stk("g2"), stk("b2"))
    return {"pos": pos, "downsize": params["downsize"],
            "mlp_encoder": params["mlp_encoder"], "enc": enc_stacked}


# ---------------------------------------------------------------------------
# HyperNet.forward — one pallas_call, reshape/transpose glue stays in JAX
# ---------------------------------------------------------------------------
def hypernet_forward(task_embedding, params):
    seq, batch, _ = task_embedding.shape
    kp = prepare_kernel_params(params)

    # batch-major 2D activations: row index = b * seq + s
    x2 = jnp.transpose(task_embedding, (1, 0, 2)).reshape(batch * seq, D_EMB)

    kernel = functools.partial(
        _hypernet_kernel, seq=seq, batch=batch, d_model=D_MODEL, n_heads=N_HEADS,
        n_layers=N_LAYERS, n_xf_layers=N_TRANSFORMER_LAYERS)

    args = (x2, kp["pos"], *kp["downsize"], *kp["mlp_encoder"], *kp["enc"])

    out = pl.pallas_call(
        kernel,
        out_shape=jax.ShapeDtypeStruct((N_LAYERS, batch * seq, D_OUT_PER_LAYER),
                                       jnp.float32),
        in_specs=[_vmem() for _ in args],
        out_specs=_vmem(),
        scratch_shapes=[pltpu.VMEM((batch * seq, D_MODEL), jnp.float32)],
    )(*args)

    # (L, B*S, P) -> (L, B, S, P) -> (L, S, B, P) -> (L*S, B, P)  == torch.concat(layers)
    out = out.reshape(N_LAYERS, batch, seq, D_OUT_PER_LAYER)
    out = jnp.transpose(out, (0, 2, 1, 3)).reshape(N_LAYERS * seq, batch, D_OUT_PER_LAYER)
    return out.reshape(-1, N_LAYERS * len(TARGET_MODULES), D_BIG_A, D_A * 2)


# ---------------------------------------------------------------------------
# Pure-JAX reference (same math) for a correctness check
# ---------------------------------------------------------------------------
def _ref_encoder_layer(x, p):
    seq, batch, d = x.shape
    dh = d // N_HEADS
    x2 = x.reshape(seq * batch, d)
    q = (x2 @ p["wq"] + p["bq"]).reshape(seq, batch, N_HEADS, dh)
    k = (x2 @ p["wk"] + p["bk"]).reshape(seq, batch, N_HEADS, dh)
    v = (x2 @ p["wv"] + p["bv"]).reshape(seq, batch, N_HEADS, dh)
    s = jnp.einsum("sbhd,tbhd->bhst", q, k) / math.sqrt(dh)
    pa = jax.nn.softmax(s, axis=-1)
    o = jnp.einsum("bhst,tbhd->sbhd", pa, v).reshape(seq * batch, d)
    o = o @ p["wo"] + p["bo"]
    y = _layernorm(x2 + o, p["g1"], p["b1"])
    ffn = jnp.maximum(y @ p["wf1"] + p["bf1"], 0.0) @ p["wf2"] + p["bf2"]
    z = _layernorm(y + ffn, p["g2"], p["b2"])
    return z.reshape(seq, batch, d)


def hypernet_ref(task_embedding, params):
    seq, batch, _ = task_embedding.shape
    w1, b1, w2, b2 = params["downsize"]
    x = jnp.maximum(task_embedding.reshape(seq * batch, D_EMB) @ w1 + b1, 0.0) @ w2 + b2
    x = x.reshape(seq, batch, D_MODEL)
    we1, be1, we2, be2 = params["mlp_encoder"]
    outs = []
    for i in range(N_LAYERS):
        x = x + params["pos"][:, i, :].reshape(1, 1, D_MODEL)
        for t in range(N_TRANSFORMER_LAYERS):
            x = _ref_encoder_layer(x, params["enc"][t])
        lw = jnp.maximum(x.reshape(seq * batch, D_MODEL) @ we1 + be1, 0.0) @ we2 + be2
        outs.append(lw.reshape(seq, batch, D_OUT_PER_LAYER))
    cat = jnp.concatenate(outs, axis=0)
    return cat.reshape(-1, N_LAYERS * len(TARGET_MODULES), D_BIG_A, D_A * 2)


if __name__ == "__main__":
    key = jax.random.PRNGKey(0)
    pkey, xkey = jax.random.split(key)
    params = init_params(pkey)
    task_embedding = jax.random.normal(xkey, (SEQ, BATCH, D_EMB), dtype=jnp.float32)

    fwd = jax.jit(hypernet_forward)
    out = jax.block_until_ready(fwd(task_embedding, params))
    ref = jax.block_until_ready(hypernet_ref(task_embedding, params))

    rows = (N_LAYERS * SEQ * BATCH * D_OUT_PER_LAYER) // (
        N_LAYERS * len(TARGET_MODULES) * D_BIG_A * D_A * 2)
    expected_shape = (rows, N_LAYERS * len(TARGET_MODULES), D_BIG_A, D_A * 2)
    assert out.shape == expected_shape, (out.shape, expected_shape)

    err = float(jnp.max(jnp.abs(out - ref)))
    # Tightened vs. the previous 3e-2.  The kernel itself has no low-precision
    # approximations (the softmax reciprocal is Newton-refined to full f32); the
    # remaining slack only covers possible XLA-vs-Mosaic differences in how f32
    # matmuls are emulated on the bf16 MXU (pass-count policy).
    assert jnp.allclose(out, ref, atol=1e-2, rtol=1e-2), err
    print("KERNEL_OK")
</pallas_src>

<mosaic_0001>
module attributes {stable_mosaic.version = 11 : i64} {
  func.func @_hypernet_kernel(%arg0: memref<16x64xf32, #tpu.memory_space<vmem>>, %arg1: memref<2x1x32xf32, #tpu.memory_space<vmem>>, %arg2: memref<64x64xf32, #tpu.memory_space<vmem>>, %arg3: memref<1x64xf32, #tpu.memory_space<vmem>>, %arg4: memref<64x32xf32, #tpu.memory_space<vmem>>, %arg5: memref<1x32xf32, #tpu.memory_space<vmem>>, %arg6: memref<32x64xf32, #tpu.memory_space<vmem>>, %arg7: memref<1x64xf32, #tpu.memory_space<vmem>>, %arg8: memref<64x128xf32, #tpu.memory_space<vmem>>, %arg9: memref<1x128xf32, #tpu.memory_space<vmem>>, %arg10: memref<2x32x128xf32, #tpu.memory_space<vmem>>, %arg11: memref<2x1x128xf32, #tpu.memory_space<vmem>>, %arg12: memref<2x32x32xf32, #tpu.memory_space<vmem>>, %arg13: memref<2x1x32xf32, #tpu.memory_space<vmem>>, %arg14: memref<2x1x32xf32, #tpu.memory_space<vmem>>, %arg15: memref<2x1x32xf32, #tpu.memory_space<vmem>>, %arg16: memref<2x32x128xf32, #tpu.memory_space<vmem>>, %arg17: memref<2x1x128xf32, #tpu.memory_space<vmem>>, %arg18: memref<2x128x32xf32, #tpu.memory_space<vmem>>, %arg19: memref<2x1x32xf32, #tpu.memory_space<vmem>>, %arg20: memref<2x1x32xf32, #tpu.memory_space<vmem>>, %arg21: memref<2x1x32xf32, #tpu.memory_space<vmem>>, %arg22: memref<2x16x128xf32, #tpu.memory_space<vmem>>, %arg23: memref<16x32xf32, #tpu.memory_space<vmem>>) attributes {dimension_semantics = [], scalar_prefetch = 0 : i64, scratch_operands = 1 : i64, tpu.core_type = #tpu.core_type<tc>} {
    %c0 = arith.constant 0 : index
    %c0_0 = arith.constant 0 : index
    %0 = vector.load %arg0[%c0, %c0_0] : memref<16x64xf32, #tpu.memory_space<vmem>>, vector<16x64xf32>
    %c0_1 = arith.constant 0 : index
    %c0_2 = arith.constant 0 : index
    %1 = vector.load %arg2[%c0_1, %c0_2] : memref<64x64xf32, #tpu.memory_space<vmem>>, vector<64x64xf32>
    %cst = arith.constant dense<0.000000e+00> : vector<16x64xf32>
    %2 = tpu.matmul %0, %1, %cst {dimension_numbers = #tpu.dot_dimension_numbers<[1], [0], [0], [1], [0, 0, 1, 1], [], []>} : vector<16x64xf32>, vector<64x64xf32>, vector<16x64xf32> -> vector<16x64xf32>
    %c0_3 = arith.constant 0 : index
    %c0_4 = arith.constant 0 : index
    %3 = vector.load %arg3[%c0_3, %c0_4] : memref<1x64xf32, #tpu.memory_space<vmem>>, vector<1x64xf32>
    %4 = vector.broadcast %3 : vector<1x64xf32> to vector<16x64xf32>
    %5 = arith.addf %2, %4 : vector<16x64xf32>
    %cst_5 = arith.constant 0.000000e+00 : f32
    %6 = vector.broadcast %cst_5 : f32 to vector<16x64xf32>
    %7 = arith.maximumf %5, %6 : vector<16x64xf32>
    %c0_6 = arith.constant 0 : index
    %c0_7 = arith.constant 0 : index
    %8 = vector.load %arg4[%c0_6, %c0_7] : memref<64x32xf32, #tpu.memory_space<vmem>>, vector<64x32xf32>
    %cst_8 = arith.constant dense<0.000000e+00> : vector<16x32xf32>
    %9 = tpu.matmul %7, %8, %cst_8 {dimension_numbers = #tpu.dot_dimension_numbers<[1], [0], [0], [1], [0, 0, 1, 1], [], []>} : vector<16x64xf32>, vector<64x32xf32>, vector<16x32xf32> -> vector<16x32xf32>
    %c0_9 = arith.constant 0 : index
    %c0_10 = arith.constant 0 : index
    %10 = vector.load %arg5[%c0_9, %c0_10] : memref<1x32xf32, #tpu.memory_space<vmem>>, vector<1x32xf32>
    %11 = vector.broadcast %10 : vector<1x32xf32> to vector<16x32xf32>
    %12 = arith.addf %9, %11 : vector<16x32xf32>
    %c0_11 = arith.constant 0 : index
    %c0_12 = arith.constant 0 : index
    %c0_13 = arith.constant 0 : index
    %13 = vector.load %arg1[%c0_11, %c0_12, %c0_13] : memref<2x1x32xf32, #tpu.memory_space<vmem>>, vector<1x1x32xf32>
    %14 = vector.shape_cast %13 : vector<1x1x32xf32> to vector<1x32xf32>
    %15 = vector.broadcast %14 : vector<1x32xf32> to vector<16x32xf32>
    %16 = arith.addf %12, %15 : vector<16x32xf32>
    %c0_14 = arith.constant 0 : index
    %c0_15 = arith.constant 0 : index
    %c0_16 = arith.constant 0 : index
    %17 = vector.load %arg10[%c0_14, %c0_15, %c0_16] : memref<2x32x128xf32, #tpu.memory_space<vmem>>, vector<1x32x128xf32>
    %18 = vector.shape_cast %17 : vector<1x32x128xf32> to vector<32x128xf32>
    %cst_17 = arith.constant dense<0.000000e+00> : vector<16x128xf32>
    %19 = tpu.matmul %16, %18, %cst_17 {dimension_numbers = #tpu.dot_dimension_numbers<[1], [0], [0], [1], [0, 0, 1, 1], [], []>} : vector<16x32xf32>, vector<32x128xf32>, vector<16x128xf32> -> vector<16x128xf32>
    %c0_18 = arith.constant 0 : index
    %c0_19 = arith.constant 0 : index
    %c0_20 = arith.constant 0 : index
    %20 = vector.load %arg11[%c0_18, %c0_19, %c0_20] : memref<2x1x128xf32, #tpu.memory_space<vmem>>, vector<1x1x128xf32>
    %21 = vector.shape_cast %20 : vector<1x1x128xf32> to vector<1x128xf32>
    %22 = vector.broadcast %21 : vector<1x128xf32> to vector<16x128xf32>
    %23 = arith.addf %19, %22 : vector<16x128xf32>
    %24 = vector.extract_strided_slice %23 {offsets = [0, 0], sizes = [16, 32], strides = [1, 1]} : vector<16x128xf32> to vector<16x32xf32>
    %25 = vector.extract_strided_slice %23 {offsets = [0, 32], sizes = [16, 32], strides = [1, 1]} : vector<16x128xf32> to vector<16x32xf32>
    %26 = vector.extract_strided_slice %23 {offsets = [0, 64], sizes = [16, 32], strides = [1, 1]} : vector<16x128xf32> to vector<16x32xf32>
    %27 = vector.extract_strided_slice %24 {offsets = [0, 0], sizes = [16, 8], strides = [1, 1]} : vector<16x32xf32> to vector<16x8xf32>
    %cst_21 = arith.constant 0.353553385 : f32
    %28 = vector.broadcast %cst_21 : f32 to vector<16x8xf32>
    %29 = arith.mulf %27, %28 : vector<16x8xf32>
    %30 = vector.extract_strided_slice %25 {offsets = [0, 0], sizes = [16, 8], strides = [1, 1]} : vector<16x32xf32> to vector<16x8xf32>
    %31 = vector.extract_strided_slice %26 {offsets = [0, 0], sizes = [16, 8], strides = [1, 1]} : vector<16x32xf32> to vector<16x8xf32>
    %32 = vector.extract_strided_slice %29 {offsets = [0, 0], sizes = [8, 8], strides = [1, 1]} : vector<16x8xf32> to vector<8x8xf32>
    %33 = vector.extract_strided_slice %30 {offsets = [0, 0], sizes = [8, 8], strides = [1, 1]} : vector<16x8xf32> to vector<8x8xf32>
    %34 = vector.extract_strided_slice %31 {offsets = [0, 0], sizes = [8, 8], strides = [1, 1]} : vector<16x8xf32> to vector<8x8xf32>
    %35 = tpu.transpose %33, [1, 0] : vector<8x8xf32> -> vector<8x8xf32>
    %cst_22 = arith.constant dense<0.000000e+00> : vector<8x8xf32>
    %36 = tpu.matmul %32, %35, %cst_22 {dimension_numbers = #tpu.dot_dimension_numbers<[1], [0], [0], [1], [0, 0, 1, 1], [], []>} : vector<8x8xf32>, vector<8x8xf32>, vector<8x8xf32> -> vector<8x8xf32>
    %cst_23 = arith.constant dense<0xFF800000> : vector<8xf32>
    %37 = vector.multi_reduction <maximumf>, %36, %cst_23 [1] : vector<8x8xf32> to vector<8xf32>
    %38 = vector.shape_cast %37 : vector<8xf32> to vector<8x1xf32>
    %39 = vector.broadcast %38 : vector<8x1xf32> to vector<8x8xf32>
    %40 = arith.subf %36, %39 : vector<8x8xf32>
    %41 = math.exp %40 : vector<8x8xf32>
    %cst_24 = arith.constant dense<0.000000e+00> : vector<8xf32>
    %42 = vector.multi_reduction <add>, %41, %cst_24 [1] : vector<8x8xf32> to vector<8xf32>
    %43 = vector.shape_cast %42 : vector<8xf32> to vector<8x1xf32>
    %44 = tpu.reciprocal %43 {approx = true} : vector<8x1xf32> -> vector<8x1xf32>
    %45 = arith.mulf %43, %44 : vector<8x1xf32>
    %cst_25 = arith.constant 2.000000e+00 : f32
    %46 = vector.broadcast %cst_25 : f32 to vector<8x1xf32>
    %47 = arith.subf %46, %45 : vector<8x1xf32>
    %48 = arith.mulf %44, %47 : vector<8x1xf32>
    %49 = vector.broadcast %48 : vector<8x1xf32> to vector<8x8xf32>
    %50 = arith.mulf %41, %49 : vector<8x8xf32>
    %cst_26 = arith.constant dense<0.000000e+00> : vector<8x8xf32>
    %51 = tpu.matmul %50, %34, %cst_26 {dimension_numbers = #tpu.dot_dimension_numbers<[1], [0], [0], [1], [0, 0, 1, 1], [], []>} : vector<8x8xf32>, vector<8x8xf32>, vector<8x8xf32> -> vector<8x8xf32>
    %c0_27 = arith.constant 0 : index
    %c0_28 = arith.constant 0 : index
    %52 = vector.load %arg23[%c0_27, %c0_28] : memref<16x32xf32, #tpu.memory_space<vmem>>, vector<8x8xf32>
    tpu.vector_store %arg23[%c0_27, %c0_28], %51 {strides = array<i32>} : memref<16x32xf32, #tpu.memory_space<vmem>>, vector<8x8xf32>,
    %53 = vector.extract_strided_slice %29 {offsets = [8, 0], sizes = [8, 8], strides = [1, 1]} : vector<16x8xf32> to vector<8x8xf32>
    %54 = vector.extract_strided_slice %30 {offsets = [8, 0], sizes = [8, 8], strides = [1, 1]} : vector<16x8xf32> to vector<8x8xf32>
    %55 = vector.extract_strided_slice %31 {offsets = [8, 0], sizes = [8, 8], strides = [1, 1]} : vector<16x8xf32> to vector<8x8xf32>
    %56 = tpu.transpose %54, [1, 0] : vector<8x8xf32> -> vector<8x8xf32>
    %cst_29 = arith.constant dense<0.000000e+00> : vector<8x8xf32>
    %57 = tpu.matmul %53, %56, %cst_29 {dimension_numbers = #tpu.dot_dimension_numbers<[1], [0], [0], [1], [0, 0, 1, 1], [], []>} : vector<8x8xf32>, vector<8x8xf32>, vector<8x8xf32> -> vector<8x8xf32>
    %cst_30 = arith.constant dense<0xFF800000> : vector<8xf32>
    %58 = vector.multi_reduction <maximumf>, %57, %cst_30 [1] : vector<8x8xf32> to vector<8xf32>
    %59 = vector.shape_cast %58 : vector<8xf32> to vector<8x1xf32>
    %60 = vector.broadcast %59 : vector<8x1xf32> to vector<8x8xf32>
    %61 = arith.subf %57, %60 : vector<8x8xf32>
    %62 = math.exp %61 : vector<8x8xf32>
    %cst_31 = arith.constant dense<0.000000e+00> : vector<8xf32>
    %63 = vector.multi_reduction <add>, %62, %cst_31 [1] : vector<8x8xf32> to vector<8xf32>
    %64 = vector.shape_cast %63 : vector<8xf32> to vector<8x1xf32>
    %65 = tpu.reciprocal %64 {approx = true} : vector<8x1xf32> -> vector<8x1xf32>
    %66 = arith.mulf %64, %65 : vector<8x1xf32>
    %cst_32 = arith.constant 2.000000e+00 : f32
    %67 = vector.broadcast %cst_32 : f32 to vector<8x1xf32>
    %68 = arith.subf %67, %66 : vector<8x1xf32>
    %69 = arith.mulf %65, %68 : vector<8x1xf32>
    %70 = vector.broadcast %69 : vector<8x1xf32> to vector<8x8xf32>
    %71 = arith.mulf %62, %70 : vector<8x8xf32>
    %cst_33 = arith.constant dense<0.000000e+00> : vector<8x8xf32>
    %72 = tpu.matmul %71, %55, %cst_33 {dimension_numbers = #tpu.dot_dimension_numbers<[1], [0], [0], [1], [0, 0, 1, 1], [], []>} : vector<8x8xf32>, vector<8x8xf32>, vector<8x8xf32> -> vector<8x8xf32>
    %c8 = arith.constant 8 : index
    %c0_34 = arith.constant 0 : index
    %73 = vector.load %arg23[%c8, %c0_34] : memref<16x32xf32, #tpu.memory_space<vmem>>, vector<8x8xf32>
    tpu.vector_store %arg23[%c8, %c0_34], %72 {strides = array<i32>} : memref<16x32xf32, #tpu.memory_space<vmem>>, vector<8x8xf32>,
    %74 = vector.extract_strided_slice %24 {offsets = [0, 8], sizes = [16, 8], strides = [1, 1]} : vector<16x32xf32> to vector<16x8xf32>
    %cst_35 = arith.constant 0.353553385 : f32
    %75 = vector.broadcast %cst_35 : f32 to vector<16x8xf32>
    %76 = arith.mulf %74, %75 : vector<16x8xf32>
    %77 = vector.extract_strided_slice %25 {offsets = [0, 8], sizes = [16, 8], strides = [1, 1]} : vector<16x32xf32> to vector<16x8xf32>
    %78 = vector.extract_strided_slice %26 {offsets = [0, 8], sizes = [16, 8], strides = [1, 1]} : vector<16x32xf32> to vector<16x8xf32>
    %79 = vector.extract_strided_slice %76 {offsets = [0, 0], sizes = [8, 8], strides = [1, 1]} : vector<16x8xf32> to vector<8x8xf32>
    %80 = vector.extract_strided_slice %77 {offsets = [0, 0], sizes = [8, 8], strides = [1, 1]} : vector<16x8xf32> to vector<8x8xf32>
    %81 = vector.extract_strided_slice %78 {offsets = [0, 0], sizes = [8, 8], strides = [1, 1]} : vector<16x8xf32> to vector<8x8xf32>
    %82 = tpu.transpose %80, [1, 0] : vector<8x8xf32> -> vector<8x8xf32>
    %cst_36 = arith.constant dense<0.000000e+00> : vector<8x8xf32>
    %83 = tpu.matmul %79, %82, %cst_36 {dimension_numbers = #tpu.dot_dimension_numbers<[1], [0], [0], [1], [0, 0, 1, 1], [], []>} : vector<8x8xf32>, vector<8x8xf32>, vector<8x8xf32> -> vector<8x8xf32>
    %cst_37 = arith.constant dense<0xFF800000> : vector<8xf32>
    %84 = vector.multi_reduction <maximumf>, %83, %cst_37 [1] : vector<8x8xf32> to vector<8xf32>
    %85 = vector.shape_cast %84 : vector<8xf32> to vector<8x1xf32>
    %86 = vector.broadcast %85 : vector<8x1xf32> to vector<8x8xf32>
    %87 = arith.subf %83, %86 : vector<8x8xf32>
    %88 = math.exp %87 : vector<8x8xf32>
    %cst_38 = arith.constant dense<0.000000e+00> : vector<8xf32>
    %89 = vector.multi_reduction <add>, %88, %cst_38 [1] : vector<8x8xf32> to vector<8xf32>
    %90 = vector.shape_cast %89 : vector<8xf32> to vector<8x1xf32>
    %91 = tpu.reciprocal %90 {approx = true} : vector<8x1xf32> -> vector<8x1xf32>
    %92 = arith.mulf %90, %91 : vector<8x1xf32>
    %cst_39 = arith.constant 2.000000e+00 : f32
    %93 = vector.broadcast %cst_39 : f32 to vector<8x1xf32>
    %94 = arith.subf %93, %92 : vector<8x1xf32>
    %95 = arith.mulf %91, %94 : vector<8x1xf32>
    %96 = vector.broadcast %95 : vector<8x1xf32> to vector<8x8xf32>
    %97 = arith.mulf %88, %96 : vector<8x8xf32>
    %cst_40 = arith.constant dense<0.000000e+00> : vector<8x8xf32>
    %98 = tpu.matmul %97, %81, %cst_40 {dimension_numbers = #tpu.dot_dimension_numbers<[1], [0], [0], [1], [0, 0, 1, 1], [], []>} : vector<8x8xf32>, vector<8x8xf32>, vector<8x8xf32> -> vector<8x8xf32>
    %c0_41 = arith.constant 0 : index
    %c8_42 = arith.constant 8 : index
    %99 = vector.load %arg23[%c0_41, %c8_42] : memref<16x32xf32, #tpu.memory_space<vmem>>, vector<8x8xf32>
    tpu.vector_store %arg23[%c0_41, %c8_42], %98 {strides = array<i32>} : memref<16x32xf32, #tpu.memory_space<vmem>>, vector<8x8xf32>,
    %100 = vector.extract_strided_slice %76 {offsets = [8, 0], sizes = [8, 8], strides = [1, 1]} : vector<16x8xf32> to vector<8x8xf32>
    %101 = vector.extract_strided_slice %77 {offsets = [8, 0], sizes = [8, 8], strides = [1, 1]} : vector<16x8xf32> to vector<8x8xf32>
    %102 = vector.extract_strided_slice %78 {offsets = [8, 0], sizes = [8, 8], strides = [1, 1]} : vector<16x8xf32> to vector<8x8xf32>
    %103 = tpu.transpose %101, [1, 0] : vector<8x8xf32> -> vector<8x8xf32>
    %cst_43 = arith.constant dense<0.000000e+00> : vector<8x8xf32>
    %104 = tpu.matmul %100, %103, %cst_43 {dimension_numbers = #tpu.dot_dimension_numbers<[1], [0], [0], [1], [0, 0, 1, 1], [], []>} : vector<8x8xf32>, vector<8x8xf32>, vector<8x8xf32> -> vector<8x8xf32>
    %cst_44 = arith.constant dense<0xFF800000> : vector<8xf32>
    %105 = vector.multi_reduction <maximumf>, %104, %cst_44 [1] : vector<8x8xf32> to vector<8xf32>
    %106 = vector.shape_cast %105 : vector<8xf32> to vector<8x1xf32>
    %107 = vector.broadcast %106 : vector<8x1xf32> to vector<8x8xf32>
    %108 = arith.subf %104, %107 : vector<8x8xf32>
    %109 = math.exp %108 : vector<8x8xf32>
    %cst_45 = arith.constant dense<0.000000e+00> : vector<8xf32>
    %110 = vector.multi_reduction <add>, %109, %cst_45 [1] : vector<8x8xf32> to vector<8xf32>
    %111 = vector.shape_cast %110 : vector<8xf32> to vector<8x1xf32>
    %112 = tpu.reciprocal %111 {approx = true} : vector<8x1xf32> -> vector<8x1xf32>
    %113 = arith.mulf %111, %112 : vector<8x1xf32>
    %cst_46 = arith.constant 2.000000e+00 : f32
    %114 = vector.broadcast %cst_46 : f32 to vector<8x1xf32>
    %115 = arith.subf %114, %113 : vector<8x1xf32>
    %116 = arith.mulf %112, %115 : vector<8x1xf32>
    %117 = vector.broadcast %116 : vector<8x1xf32> to vector<8x8xf32>
    %118 = arith.mulf %109, %117 : vector<8x8xf32>
    %cst_47 = arith.constant dense<0.000000e+00> : vector<8x8xf32>
    %119 = tpu.matmul %118, %102, %cst_47 {dimension_numbers = #tpu.dot_dimension_numbers<[1], [0], [0], [1], [0, 0, 1, 1], [], []>} : vector<8x8xf32>, vector<8x8xf32>, vector<8x8xf32> -> vector<8x8xf32>
    %c8_48 = arith.constant 8 : index
    %c8_49 = arith.constant 8 : index
    %120 = vector.load %arg23[%c8_48, %c8_49] : memref<16x32xf32, #tpu.memory_space<vmem>>, vector<8x8xf32>
    tpu.vector_store %arg23[%c8_48, %c8_49], %119 {strides = array<i32>} : memref<16x32xf32, #tpu.memory_space<vmem>>, vector<8x8xf32>,
    %121 = vector.extract_strided_slice %24 {offsets = [0, 16], sizes = [16, 8], strides = [1, 1]} : vector<16x32xf32> to vector<16x8xf32>
    %cst_50 = arith.constant 0.353553385 : f32
    %122 = vector.broadcast %cst_50 : f32 to vector<16x8xf32>
    %123 = arith.mulf %121, %122 : vector<16x8xf32>
    %124 = vector.extract_strided_slice %25 {offsets = [0, 16], sizes = [16, 8], strides = [1, 1]} : vector<16x32xf32> to vector<16x8xf32>
    %125 = vector.extract_strided_slice %26 {offsets = [0, 16], sizes = [16, 8], strides = [1, 1]} : vector<16x32xf32> to vector<16x8xf32>
    %126 = vector.extract_strided_slice %123 {offsets = [0, 0], sizes = [8, 8], strides = [1, 1]} : vector<16x8xf32> to vector<8x8xf32>
    %127 = vector.extract_strided_slice %124 {offsets = [0, 0], sizes = [8, 8], strides = [1, 1]} : vector<16x8xf32> to vector<8x8xf32>
    %128 = vector.extract_strided_slice %125 {offsets = [0, 0], sizes = [8, 8], strides = [1, 1]} : vector<16x8xf32> to vector<8x8xf32>
    %129 = tpu.transpose %127, [1, 0] : vector<8x8xf32> -> vector<8x8xf32>
    %cst_51 = arith.constant dense<0.000000e+00> : vector<8x8xf32>
    %130 = tpu.matmul %126, %129, %cst_51 {dimension_numbers = #tpu.dot_dimension_numbers<[1], [0], [0], [1], [0, 0, 1, 1], [], []>} : vector<8x8xf32>, vector<8x8xf32>, vector<8x8xf32> -> vector<8x8xf32>
    %cst_52 = arith.constant dense<0xFF800000> : vector<8xf32>
    %131 = vector.multi_reduction <maximumf>, %130, %cst_52 [1] : vector<8x8xf32> to vector<8xf32>
    %132 = vector.shape_cast %131 : vector<8xf32> to vector<8x1xf32>
    %133 = vector.broadcast %132 : vector<8x1xf32> to vector<8x8xf32>
    %134 = arith.subf %130, %133 : vector<8x8xf32>
    %135 = math.exp %134 : vector<8x8xf32>
    %cst_53 = arith.constant dense<0.000000e+00> : vector<8xf32>
    %136 = vector.multi_reduction <add>, %135, %cst_53 [1] : vector<8x8xf32> to vector<8xf32>
    %137 = vector.shape_cast %136 : vector<8xf32> to vector<8x1xf32>
    %138 = tpu.reciprocal %137 {approx = true} : vector<8x1xf32> -> vector<8x1xf32>
    %139 = arith.mulf %137, %138 : vector<8x1xf32>
    %cst_54 = arith.constant 2.000000e+00 : f32
    %140 = vector.broadcast %cst_54 : f32 to vector<8x1xf32>
    %141 = arith.subf %140, %139 : vector<8x1xf32>
    %142 = arith.mulf %138, %141 : vector<8x1xf32>
    %143 = vector.broadcast %142 : vector<8x1xf32> to vector<8x8xf32>
    %144 = arith.mulf %135, %143 : vector<8x8xf32>
    %cst_55 = arith.constant dense<0.000000e+00> : vector<8x8xf32>
    %145 = tpu.matmul %144, %128, %cst_55 {dimension_numbers = #tpu.dot_dimension_numbers<[1], [0], [0], [1], [0, 0, 1, 1], [], []>} : vector<8x8xf32>, vector<8x8xf32>, vector<8x8xf32> -> vector<8x8xf32>
    %c0_56 = arith.constant 0 : index
    %c16 = arith.constant 16 : index
    %146 = vector.load %arg23[%c0_56, %c16] : memref<16x32xf32, #tpu.memory_space<vmem>>, vector<8x8xf32>
    tpu.vector_store %arg23[%c0_56, %c16], %145 {strides = array<i32>} : memref<16x32xf32, #tpu.memory_space<vmem>>, vector<8x8xf32>,
    %147 = vector.extract_strided_slice %123 {offsets = [8, 0], sizes = [8, 8], strides = [1, 1]} : vector<16x8xf32> to vector<8x8xf32>
    %148 = vector.extract_strided_slice %124 {offsets = [8, 0], sizes = [8, 8], strides = [1, 1]} : vector<16x8xf32> to vector<8x8xf32>
    %149 = vector.extract_strided_slice %125 {offsets = [8, 0], sizes = [8, 8], strides = [1, 1]} : vector<16x8xf32> to vector<8x8xf32>
    %150 = tpu.transpose %148, [1, 0] : vector<8x8xf32> -> vector<8x8xf32>
    %cst_57 = arith.constant dense<0.000000e+00> : vector<8x8xf32>
    %151 = tpu.matmul %147, %150, %cst_57 {dimension_numbers = #tpu.dot_dimension_numbers<[1], [0], [0], [1], [0, 0, 1, 1], [], []>} : vector<8x8xf32>, vector<8x8xf32>, vector<8x8xf32> -> vector<8x8xf32>
    %cst_58 = arith.constant dense<0xFF800000> : vector<8xf32>
    %152 = vector.multi_reduction <maximumf>, %151, %cst_58 [1] : vector<8x8xf32> to vector<8xf32>
    %153 = vector.shape_cast %152 : vector<8xf32> to vector<8x1xf32>
    %154 = vector.broadcast %153 : vector<8x1xf32> to vector<8x8xf32>
    %155 = arith.subf %151, %154 : vector<8x8xf32>
    %156 = math.exp %155 : vector<8x8xf32>
    %cst_59 = arith.constant dense<0.000000e+00> : vector<8xf32>
    %157 = vector.multi_reduction <add>, %156, %cst_59 [1] : vector<8x8xf32> to vector<8xf32>
    %158 = vector.shape_cast %157 : vector<8xf32> to vector<8x1xf32>
    %159 = tpu.reciprocal %158 {approx = true} : vector<8x1xf32> -> vector<8x1xf32>
    %160 = arith.mulf %158, %159 : vector<8x1xf32>
    %cst_60 = arith.constant 2.000000e+00 : f32
    %161 = vector.broadcast %cst_60 : f32 to vector<8x1xf32>
    %162 = arith.subf %161, %160 : vector<8x1xf32>
    %163 = arith.mulf %159, %162 : vector<8x1xf32>
    %164 = vector.broadcast %163 : vector<8x1xf32> to vector<8x8xf32>
    %165 = arith.mulf %156, %164 : vector<8x8xf32>
    %cst_61 = arith.constant dense<0.000000e+00> : vector<8x8xf32>
    %166 = tpu.matmul %165, %149, %cst_61 {dimension_numbers = #tpu.dot_dimension_numbers<[1], [0], [0], [1], [0, 0, 1, 1], [], []>} : vector<8x8xf32>, vector<8x8xf32>, vector<8x8xf32> -> vector<8x8xf32>
    %c8_62 = arith.constant 8 : index
    %c16_63 = arith.constant 16 : index
    %167 = vector.load %arg23[%c8_62, %c16_63] : memref<16x32xf32, #tpu.memory_space<vmem>>, vector<8x8xf32>
    tpu.vector_store %arg23[%c8_62, %c16_63], %166 {strides = array<i32>} : memref<16x32xf32, #tpu.memory_space<vmem>>, vector<8x8xf32>,
    %168 = vector.extract_strided_slice %24 {offsets = [0, 24], sizes = [16, 8], strides = [1, 1]} : vector<16x32xf32> to vector<16x8xf32>
    %cst_64 = arith.constant 0.353553385 : f32
    %169 = vector.broadcast %cst_64 : f32 to vector<16x8xf32>
    %170 = arith.mulf %168, %169 : vector<16x8xf32>
    %171 = vector.extract_strided_slice %25 {offsets = [0, 24], sizes = [16, 8], strides = [1, 1]} : vector<16x32xf32> to vector<16x8xf32>
    %172 = vector.extract_strided_slice %26 {offsets = [0, 24], sizes = [16, 8], strides = [1, 1]} : vector<16x32xf32> to vector<16x8xf32>
    %173 = vector.extract_strided_slice %170 {offsets = [0, 0], sizes = [8, 8], strides = [1, 1]} : vector<16x8xf32> to vector<8x8xf32>
    %174 = vector.extract_strided_slice %171 {offsets = [0, 0], sizes = [8, 8], strides = [1, 1]} : vector<16x8xf32> to vector<8x8xf32>
    %175 = vector.extract_strided_slice %172 {offsets = [0, 0], sizes = [8, 8], strides = [1, 1]} : vector<16x8xf32> to vector<8x8xf32>
    %176 = tpu.transpose %174, [1, 0] : vector<8x8xf32> -> vector<8x8xf32>
    %cst_65 = arith.constant dense<0.000000e+00> : vector<8x8xf32>
    %177 = tpu.matmul %173, %176, %cst_65 {dimension_numbers = #tpu.dot_dimension_numbers<[1], [0], [0], [1], [0, 0, 1, 1], [], []>} : vector<8x8xf32>, vector<8x8xf32>, vector<8x8xf32> -> vector<8x8xf32>
    %cst_66 = arith.constant dense<0xFF800000> : vector<8xf32>
    %178 = vector.multi_reduction <maximumf>, %177, %cst_66 [1] : vector<8x8xf32> to vector<8xf32>
    %179 = vector.shape_cast %178 : vector<8xf32> to vector<8x1xf32>
    %180 = vector.broadcast %179 : vector<8x1xf32> to vector<8x8xf32>
    %181 = arith.subf %177, %180 : vector<8x8xf32>
    %182 = math.exp %181 : vector<8x8xf32>
    %cst_67 = arith.constant dense<0.000000e+00> : vector<8xf32>
    %183 = vector.multi_reduction <add>, %182, %cst_67 [1] : vector<8x8xf32> to vector<8xf32>
    %184 = vector.shape_cast %183 : vector<8xf32> to vector<8x1xf32>
    %185 = tpu.reciprocal %184 {approx = true} : vector<8x1xf32> -> vector<8x1xf32>
    %186 = arith.mulf %184, %185 : vector<8x1xf32>
    %cst_68 = arith.constant 2.000000e+00 : f32
    %187 = vector.broadcast %cst_68 : f32 to vector<8x1xf32>
    %188 = arith.subf %187, %186 : vector<8x1xf32>
    %189 = arith.mulf %185, %188 : vector<8x1xf32>
    %190 = vector.broadcast %189 : vector<8x1xf32> to vector<8x8xf32>
    %191 = arith.mulf %182, %190 : vector<8x8xf32>
    %cst_69 = arith.constant dense<0.000000e+00> : vector<8x8xf32>
    %192 = tpu.matmul %191, %175, %cst_69 {dimension_numbers = #tpu.dot_dimension_numbers<[1], [0], [0], [1], [0, 0, 1, 1], [], []>} : vector<8x8xf32>, vector<8x8xf32>, vector<8x8xf32> -> vector<8x8xf32>
    %c0_70 = arith.constant 0 : index
    %c24 = arith.constant 24 : index
    %193 = vector.load %arg23[%c0_70, %c24] : memref<16x32xf32, #tpu.memory_space<vmem>>, vector<8x8xf32>
    tpu.vector_store %arg23[%c0_70, %c24], %192 {strides = array<i32>} : memref<16x32xf32, #tpu.memory_space<vmem>>, vector<8x8xf32>,
    %194 = vector.extract_strided_slice %170 {offsets = [8, 0], sizes = [8, 8], strides = [1, 1]} : vector<16x8xf32> to vector<8x8xf32>
    %195 = vector.extract_strided_slice %171 {offsets = [8, 0], sizes = [8, 8], strides = [1, 1]} : vector<16x8xf32> to vector<8x8xf32>
    %196 = vector.extract_strided_slice %172 {offsets = [8, 0], sizes = [8, 8], strides = [1, 1]} : vector<16x8xf32> to vector<8x8xf32>
    %197 = tpu.transpose %195, [1, 0] : vector<8x8xf32> -> vector<8x8xf32>
    %cst_71 = arith.constant dense<0.000000e+00> : vector<8x8xf32>
    %198 = tpu.matmul %194, %197, %cst_71 {dimension_numbers = #tpu.dot_dimension_numbers<[1], [0], [0], [1], [0, 0, 1, 1], [], []>} : vector<8x8xf32>, vector<8x8xf32>, vector<8x8xf32> -> vector<8x8xf32>
    %cst_72 = arith.constant dense<0xFF800000> : vector<8xf32>
    %199 = vector.multi_reduction <maximumf>, %198, %cst_72 [1] : vector<8x8xf32> to vector<8xf32>
    %200 = vector.shape_cast %199 : vector<8xf32> to vector<8x1xf32>
    %201 = vector.broadcast %200 : vector<8x1xf32> to vector<8x8xf32>
    %202 = arith.subf %198, %201 : vector<8x8xf32>
    %203 = math.exp %202 : vector<8x8xf32>
    %cst_73 = arith.constant dense<0.000000e+00> : vector<8xf32>
    %204 = vector.multi_reduction <add>, %203, %cst_73 [1] : vector<8x8xf32> to vector<8xf32>
    %205 = vector.shape_cast %204 : vector<8xf32> to vector<8x1xf32>
    %206 = tpu.reciprocal %205 {approx = true} : vector<8x1xf32> -> vector<8x1xf32>
    %207 = arith.mulf %205, %206 : vector<8x1xf32>
    %cst_74 = arith.constant 2.000000e+00 : f32
    %208 = vector.broadcast %cst_74 : f32 to vector<8x1xf32>
    %209 = arith.subf %208, %207 : vector<8x1xf32>
    %210 = arith.mulf %206, %209 : vector<8x1xf32>
    %211 = vector.broadcast %210 : vector<8x1xf32> to vector<8x8xf32>
    %212 = arith.mulf %203, %211 : vector<8x8xf32>
    %cst_75 = arith.constant dense<0.000000e+00> : vector<8x8xf32>
    %213 = tpu.matmul %212, %196, %cst_75 {dimension_numbers = #tpu.dot_dimension_numbers<[1], [0], [0], [1], [0, 0, 1, 1], [], []>} : vector<8x8xf32>, vector<8x8xf32>, vector<8x8xf32> -> vector<8x8xf32>
    %c8_76 = arith.constant 8 : index
    %c24_77 = arith.constant 24 : index
    %214 = vector.load %arg23[%c8_76, %c24_77] : memref<16x32xf32, #tpu.memory_space<vmem>>, vector<8x8xf32>
    tpu.vector_store %arg23[%c8_76, %c24_77], %213 {strides = array<i32>} : memref<16x32xf32, #tpu.memory_space<vmem>>, vector<8x8xf32>,
    %c0_78 = arith.constant 0 : index
    %c0_79 = arith.constant 0 : index
    %215 = vector.load %arg23[%c0_78, %c0_79] : memref<16x32xf32, #tpu.memory_space<vmem>>, vector<16x32xf32>
    %c0_80 = arith.constant 0 : index
    %c0_81 = arith.constant 0 : index
    %c0_82 = arith.constant 0 : index
    %216 = vector.load %arg12[%c0_80, %c0_81, %c0_82] : memref<2x32x32xf32, #tpu.memory_space<vmem>>, vector<1x32x32xf32>
    %217 = vector.shape_cast %216 : vector<1x32x32xf32> to vector<32x32xf32>
    %cst_83 = arith.constant dense<0.000000e+00> : vector<16x32xf32>
    %218 = tpu.matmul %215, %217, %cst_83 {dimension_numbers = #tpu.dot_dimension_numbers<[1], [0], [0], [1], [0, 0, 1, 1], [], []>} : vector<16x32xf32>, vector<32x32xf32>, vector<16x32xf32> -> vector<16x32xf32>
    %c0_84 = arith.constant 0 : index
    %c0_85 = arith.constant 0 : index
    %c0_86 = arith.constant 0 : index
    %219 = vector.load %arg13[%c0_84, %c0_85, %c0_86] : memref<2x1x32xf32, #tpu.memory_space<vmem>>, vector<1x1x32xf32>
    %220 = vector.shape_cast %219 : vector<1x1x32xf32> to vector<1x32xf32>
    %221 = vector.broadcast %220 : vector<1x32xf32> to vector<16x32xf32>
    %222 = arith.addf %218, %221 : vector<16x32xf32>
    %223 = arith.addf %16, %222 : vector<16x32xf32>
    %c0_87 = arith.constant 0 : index
    %c0_88 = arith.constant 0 : index
    %c0_89 = arith.constant 0 : index
    %224 = vector.load %arg14[%c0_87, %c0_88, %c0_89] : memref<2x1x32xf32, #tpu.memory_space<vmem>>, vector<1x1x32xf32>
    %225 = vector.shape_cast %224 : vector<1x1x32xf32> to vector<1x32xf32>
    %c0_90 = arith.constant 0 : index
    %c0_91 = arith.constant 0 : index
    %c0_92 = arith.constant 0 : index
    %226 = vector.load %arg15[%c0_90, %c0_91, %c0_92] : memref<2x1x32xf32, #tpu.memory_space<vmem>>, vector<1x1x32xf32>
    %227 = vector.shape_cast %226 : vector<1x1x32xf32> to vector<1x32xf32>
    %cst_93 = arith.constant dense<0.000000e+00> : vector<16xf32>
    %228 = vector.multi_reduction <add>, %223, %cst_93 [1] : vector<16x32xf32> to vector<16xf32>
    %229 = vector.shape_cast %228 : vector<16xf32> to vector<16x1xf32>
    %cst_94 = arith.constant 3.200000e+01 : f32
    %230 = vector.broadcast %cst_94 : f32 to vector<16x1xf32>
    %231 = arith.divf %229, %230 : vector<16x1xf32>
    %232 = vector.broadcast %231 : vector<16x1xf32> to vector<16x32xf32>
    %233 = arith.subf %223, %232 : vector<16x32xf32>
    %234 = arith.mulf %233, %233 : vector<16x32xf32>
    %cst_95 = arith.constant dense<0.000000e+00> : vector<16xf32>
    %235 = vector.multi_reduction <add>, %234, %cst_95 [1] : vector<16x32xf32> to vector<16xf32>
    %236 = vector.shape_cast %235 : vector<16xf32> to vector<16x1xf32>
    %cst_96 = arith.constant 3.200000e+01 : f32
    %237 = vector.broadcast %cst_96 : f32 to vector<16x1xf32>
    %238 = arith.divf %236, %237 : vector<16x1xf32>
    %cst_97 = arith.constant 9.99999974E-6 : f32
    %239 = vector.broadcast %cst_97 : f32 to vector<16x1xf32>
    %240 = arith.addf %238, %239 : vector<16x1xf32>
    %241 = math.rsqrt %240 : vector<16x1xf32>
    %242 = vector.broadcast %241 : vector<16x1xf32> to vector<16x32xf32>
    %243 = arith.mulf %233, %242 : vector<16x32xf32>
    %244 = vector.broadcast %225 : vector<1x32xf32> to vector<16x32xf32>
    %245 = arith.mulf %243, %244 : vector<16x32xf32>
    %246 = vector.broadcast %227 : vector<1x32xf32> to vector<16x32xf32>
    %247 = arith.addf %245, %246 : vector<16x32xf32>
    %c0_98 = arith.constant 0 : index
    %c0_99 = arith.constant 0 : index
    %c0_100 = arith.constant 0 : index
    %248 = vector.load %arg16[%c0_98, %c0_99, %c0_100] : memref<2x32x128xf32, #tpu.memory_space<vmem>>, vector<1x32x128xf32>
    %249 = vector.shape_cast %248 : vector<1x32x128xf32> to vector<32x128xf32>
    %cst_101 = arith.constant dense<0.000000e+00> : vector<16x128xf32>
    %250 = tpu.matmul %247, %249, %cst_101 {dimension_numbers = #tpu.dot_dimension_numbers<[1], [0], [0], [1], [0, 0, 1, 1], [], []>} : vector<16x32xf32>, vector<32x128xf32>, vector<16x128xf32> -> vector<16x128xf32>
    %c0_102 = arith.constant 0 : index
    %c0_103 = arith.constant 0 : index
    %c0_104 = arith.constant 0 : index
    %251 = vector.load %arg17[%c0_102, %c0_103, %c0_104] : memref<2x1x128xf32, #tpu.memory_space<vmem>>, vector<1x1x128xf32>
    %252 = vector.shape_cast %251 : vector<1x1x128xf32> to vector<1x128xf32>
    %253 = vector.broadcast %252 : vector<1x128xf32> to vector<16x128xf32>
    %254 = arith.addf %250, %253 : vector<16x128xf32>
    %cst_105 = arith.constant 0.000000e+00 : f32
    %255 = vector.broadcast %cst_105 : f32 to vector<16x128xf32>
    %256 = arith.maximumf %254, %255 : vector<16x128xf32>
    %c0_106 = arith.constant 0 : index
    %c0_107 = arith.constant 0 : index
    %c0_108 = arith.constant 0 : index
    %257 = vector.load %arg18[%c0_106, %c0_107, %c0_108] : memref<2x128x32xf32, #tpu.memory_space<vmem>>, vector<1x128x32xf32>
    %258 = vector.shape_cast %257 : vector<1x128x32xf32> to vector<128x32xf32>
    %cst_109 = arith.constant dense<0.000000e+00> : vector<16x32xf32>
    %259 = tpu.matmul %256, %258, %cst_109 {dimension_numbers = #tpu.dot_dimension_numbers<[1], [0], [0], [1], [0, 0, 1, 1], [], []>} : vector<16x128xf32>, vector<128x32xf32>, vector<16x32xf32> -> vector<16x32xf32>
    %c0_110 = arith.constant 0 : index
    %c0_111 = arith.constant 0 : index
    %c0_112 = arith.constant 0 : index
    %260 = vector.load %arg19[%c0_110, %c0_111, %c0_112] : memref<2x1x32xf32, #tpu.memory_space<vmem>>, vector<1x1x32xf32>
    %261 = vector.shape_cast %260 : vector<1x1x32xf32> to vector<1x32xf32>
    %262 = vector.broadcast %261 : vector<1x32xf32> to vector<16x32xf32>
    %263 = arith.addf %259, %262 : vector<16x32xf32>
    %264 = arith.addf %247, %263 : vector<16x32xf32>
    %c0_113 = arith.constant 0 : index
    %c0_114 = arith.constant 0 : index
    %c0_115 = arith.constant 0 : index
    %265 = vector.load %arg20[%c0_113, %c0_114, %c0_115] : memref<2x1x32xf32, #tpu.memory_space<vmem>>, vector<1x1x32xf32>
    %266 = vector.shape_cast %265 : vector<1x1x32xf32> to vector<1x32xf32>
    %c0_116 = arith.constant 0 : index
    %c0_117 = arith.constant 0 : index
    %c0_118 = arith.constant 0 : index
    %267 = vector.load %arg21[%c0_116, %c0_117, %c0_118] : memref<2x1x32xf32, #tpu.memory_space<vmem>>, vector<1x1x32xf32>
    %268 = vector.shape_cast %267 : vector<1x1x32xf32> to vector<1x32xf32>
    %cst_119 = arith.constant dense<0.000000e+00> : vector<16xf32>
    %269 = vector.multi_reduction <add>, %264, %cst_119 [1] : vector<16x32xf32> to vector<16xf32>
    %270 = vector.shape_cast %269 : vector<16xf32> to vector<16x1xf32>
    %cst_120 = arith.constant 3.200000e+01 : f32
    %271 = vector.broadcast %cst_120 : f32 to vector<16x1xf32>
    %272 = arith.divf %270, %271 : vector<16x1xf32>
    %273 = vector.broadcast %272 : vector<16x1xf32> to vector<16x32xf32>
    %274 = arith.subf %264, %273 : vector<16x32xf32>
    %275 = arith.mulf %274, %274 : vector<16x32xf32>
    %cst_121 = arith.constant dense<0.000000e+00> : vector<16xf32>
    %276 = vector.multi_reduction <add>, %275, %cst_121 [1] : vector<16x32xf32> to vector<16xf32>
    %277 = vector.shape_cast %276 : vector<16xf32> to vector<16x1xf32>
    %cst_122 = arith.constant 3.200000e+01 : f32
    %278 = vector.broadcast %cst_122 : f32 to vector<16x1xf32>
    %279 = arith.divf %277, %278 : vector<16x1xf32>
    %cst_123 = arith.constant 9.99999974E-6 : f32
    %280 = vector.broadcast %cst_123 : f32 to vector<16x1xf32>
    %281 = arith.addf %279, %280 : vector<16x1xf32>
    %282 = math.rsqrt %281 : vector<16x1xf32>
    %283 = vector.broadcast %282 : vector<16x1xf32> to vector<16x32xf32>
    %284 = arith.mulf %274, %283 : vector<16x32xf32>
    %285 = vector.broadcast %266 : vector<1x32xf32> to vector<16x32xf32>
    %286 = arith.mulf %284, %285 : vector<16x32xf32>
    %287 = vector.broadcast %268 : vector<1x32xf32> to vector<16x32xf32>
    %288 = arith.addf %286, %287 : vector<16x32xf32>
    %c1 = arith.constant 1 : index
    %c0_124 = arith.constant 0 : index
    %c0_125 = arith.constant 0 : index
    %289 = vector.load %arg10[%c1, %c0_124, %c0_125] : memref<2x32x128xf32, #tpu.memory_space<vmem>>, vector<1x32x128xf32>
    %290 = vector.shape_cast %289 : vector<1x32x128xf32> to vector<32x128xf32>
    %cst_126 = arith.constant dense<0.000000e+00> : vector<16x128xf32>
    %291 = tpu.matmul %288, %290, %cst_126 {dimension_numbers = #tpu.dot_dimension_numbers<[1], [0], [0], [1], [0, 0, 1, 1], [], []>} : vector<16x32xf32>, vector<32x128xf32>, vector<16x128xf32> -> vector<16x128xf32>
    %c1_127 = arith.constant 1 : index
    %c0_128 = arith.constant 0 : index
    %c0_129 = arith.constant 0 : index
    %292 = vector.load %arg11[%c1_127, %c0_128, %c0_129] : memref<2x1x128xf32, #tpu.memory_space<vmem>>, vector<1x1x128xf32>
    %293 = vector.shape_cast %292 : vector<1x1x128xf32> to vector<1x128xf32>
    %294 = vector.broadcast %293 : vector<1x128xf32> to vector<16x128xf32>
    %295 = arith.addf %291, %294 : vector<16x128xf32>
    %296 = vector.extract_strided_slice %295 {offsets = [0, 0], sizes = [16, 32], strides = [1, 1]} : vector<16x128xf32> to vector<16x32xf32>
    %297 = vector.extract_strided_slice %295 {offsets = [0, 32], sizes = [16, 32], strides = [1, 1]} : vector<16x128xf32> to vector<16x32xf32>
    %298 = vector.extract_strided_slice %295 {offsets = [0, 64], sizes = [16, 32], strides = [1, 1]} : vector<16x128xf32> to vector<16x32xf32>
    %299 = vector.extract_strided_slice %296 {offsets = [0, 0], sizes = [16, 8], strides = [1, 1]} : vector<16x32xf32> to vector<16x8xf32>
    %cst_130 = arith.constant 0.353553385 : f32
    %300 = vector.broadcast %cst_130 : f32 to vector<16x8xf32>
    %301 = arith.mulf %299, %300 : vector<16x8xf32>
    %302 = vector.extract_strided_slice %297 {offsets = [0, 0], sizes = [16, 8], strides = [1, 1]} : vector<16x32xf32> to vector<16x8xf32>
    %303 = vector.extract_strided_slice %298 {offsets = [0, 0], sizes = [16, 8], strides = [1, 1]} : vector<16x32xf32> to vector<16x8xf32>
    %304 = vector.extract_strided_slice %301 {offsets = [0, 0], sizes = [8, 8], strides = [1, 1]} : vector<16x8xf32> to vector<8x8xf32>
    %305 = vector.extract_strided_slice %302 {offsets = [0, 0], sizes = [8, 8], strides = [1, 1]} : vector<16x8xf32> to vector<8x8xf32>
    %306 = vector.extract_strided_slice %303 {offsets = [0, 0], sizes = [8, 8], strides = [1, 1]} : vector<16x8xf32> to vector<8x8xf32>
    %307 = tpu.transpose %305, [1, 0] : vector<8x8xf32> -> vector<8x8xf32>
    %cst_131 = arith.constant dense<0.000000e+00> : vector<8x8xf32>
    %308 = tpu.matmul %304, %307, %cst_131 {dimension_numbers = #tpu.dot_dimension_numbers<[1], [0], [0], [1], [0, 0, 1, 1], [], []>} : vector<8x8xf32>, vector<8x8xf32>, vector<8x8xf32> -> vector<8x8xf32>
    %cst_132 = arith.constant dense<0xFF800000> : vector<8xf32>
    %309 = vector.multi_reduction <maximumf>, %308, %cst_132 [1] : vector<8x8xf32> to vector<8xf32>
    %310 = vector.shape_cast %309 : vector<8xf32> to vector<8x1xf32>
    %311 = vector.broadcast %310 : vector<8x1xf32> to vector<8x8xf32>
    %312 = arith.subf %308, %311 : vector<8x8xf32>
    %313 = math.exp %312 : vector<8x8xf32>
    %cst_133 = arith.constant dense<0.000000e+00> : vector<8xf32>
    %314 = vector.multi_reduction <add>, %313, %cst_133 [1] : vector<8x8xf32> to vector<8xf32>
    %315 = vector.shape_cast %314 : vector<8xf32> to vector<8x1xf32>
    %316 = tpu.reciprocal %315 {approx = true} : vector<8x1xf32> -> vector<8x1xf32>
    %317 = arith.mulf %315, %316 : vector<8x1xf32>
    %cst_134 = arith.constant 2.000000e+00 : f32
    %318 = vector.broadcast %cst_134 : f32 to vector<8x1xf32>
    %319 = arith.subf %318, %317 : vector<8x1xf32>
    %320 = arith.mulf %316, %319 : vector<8x1xf32>
    %321 = vector.broadcast %320 : vector<8x1xf32> to vector<8x8xf32>
    %322 = arith.mulf %313, %321 : vector<8x8xf32>
    %cst_135 = arith.constant dense<0.000000e+00> : vector<8x8xf32>
    %323 = tpu.matmul %322, %306, %cst_135 {dimension_numbers = #tpu.dot_dimension_numbers<[1], [0], [0], [1], [0, 0, 1, 1], [], []>} : vector<8x8xf32>, vector<8x8xf32>, vector<8x8xf32> -> vector<8x8xf32>
    %c0_136 = arith.constant 0 : index
    %c0_137 = arith.constant 0 : index
    %324 = vector.load %arg23[%c0_136, %c0_137] : memref<16x32xf32, #tpu.memory_space<vmem>>, vector<8x8xf32>
    tpu.vector_store %arg23[%c0_136, %c0_137], %323 {strides = array<i32>} : memref<16x32xf32, #tpu.memory_space<vmem>>, vector<8x8xf32>,
    %325 = vector.extract_strided_slice %301 {offsets = [8, 0], sizes = [8, 8], strides = [1, 1]} : vector<16x8xf32> to vector<8x8xf32>
    %326 = vector.extract_strided_slice %302 {offsets = [8, 0], sizes = [8, 8], strides = [1, 1]} : vector<16x8xf32> to vector<8x8xf32>
    %327 = vector.extract_strided_slice %303 {offsets = [8, 0], sizes = [8, 8], strides = [1, 1]} : vector<16x8xf32> to vector<8x8xf32>
    %328 = tpu.transpose %326, [1, 0] : vector<8x8xf32> -> vector<8x8xf32>
    %cst_138 = arith.constant dense<0.000000e+00> : vector<8x8xf32>
    %329 = tpu.matmul %325, %328, %cst_138 {dimension_numbers = #tpu.dot_dimension_numbers<[1], [0], [0], [1], [0, 0, 1, 1], [], []>} : vector<8x8xf32>, vector<8x8xf32>, vector<8x8xf32> -> vector<8x8xf32>
    %cst_139 = arith.constant dense<0xFF800000> : vector<8xf32>
    %330 = vector.multi_reduction <maximumf>, %329, %cst_139 [1] : vector<8x8xf32> to vector<8xf32>
    %331 = vector.shape_cast %330 : vector<8xf32> to vector<8x1xf32>
    %332 = vector.broadcast %331 : vector<8x1xf32> to vector<8x8xf32>
    %333 = arith.subf %329, %332 : vector<8x8xf32>
    %334 = math.exp %333 : vector<8x8xf32>
    %cst_140 = arith.constant dense<0.000000e+00> : vector<8xf32>
    %335 = vector.multi_reduction <add>, %334, %cst_140 [1] : vector<8x8xf32> to vector<8xf32>
    %336 = vector.shape_cast %335 : vector<8xf32> to vector<8x1xf32>
    %337 = tpu.reciprocal %336 {approx = true} : vector<8x1xf32> -> vector<8x1xf32>
    %338 = arith.mulf %336, %337 : vector<8x1xf32>
    %cst_141 = arith.constant 2.000000e+00 : f32
    %339 = vector.broadcast %cst_141 : f32 to vector<8x1xf32>
    %340 = arith.subf %339, %338 : vector<8x1xf32>
    %341 = arith.mulf %337, %340 : vector<8x1xf32>
    %342 = vector.broadcast %341 : vector<8x1xf32> to vector<8x8xf32>
    %343 = arith.mulf %334, %342 : vector<8x8xf32>
    %cst_142 = arith.constant dense<0.000000e+00> : vector<8x8xf32>
    %344 = tpu.matmul %343, %327, %cst_142 {dimension_numbers = #tpu.dot_dimension_numbers<[1], [0], [0], [1], [0, 0, 1, 1], [], []>} : vector<8x8xf32>, vector<8x8xf32>, vector<8x8xf32> -> vector<8x8xf32>
    %c8_143 = arith.constant 8 : index
    %c0_144 = arith.constant 0 : index
    %345 = vector.load %arg23[%c8_143, %c0_144] : memref<16x32xf32, #tpu.memory_space<vmem>>, vector<8x8xf32>
    tpu.vector_store %arg23[%c8_143, %c0_144], %344 {strides = array<i32>} : memref<16x32xf32, #tpu.memory_space<vmem>>, vector<8x8xf32>,
    %346 = vector.extract_strided_slice %296 {offsets = [0, 8], sizes = [16, 8], strides = [1, 1]} : vector<16x32xf32> to vector<16x8xf32>
    %cst_145 = arith.constant 0.353553385 : f32
    %347 = vector.broadcast %cst_145 : f32 to vector<16x8xf32>
    %348 = arith.mulf %346, %347 : vector<16x8xf32>
    %349 = vector.extract_strided_slice %297 {offsets = [0, 8], sizes = [16, 8], strides = [1, 1]} : vector<16x32xf32> to vector<16x8xf32>
    %350 = vector.extract_strided_slice %298 {offsets = [0, 8], sizes = [16, 8], strides = [1, 1]} : vector<16x32xf32> to vector<16x8xf32>
    %351 = vector.extract_strided_slice %348 {offsets = [0, 0], sizes = [8, 8], strides = [1, 1]} : vector<16x8xf32> to vector<8x8xf32>
    %352 = vector.extract_strided_slice %349 {offsets = [0, 0], sizes = [8, 8], strides = [1, 1]} : vector<16x8xf32> to vector<8x8xf32>
    %353 = vector.extract_strided_slice %350 {offsets = [0, 0], sizes = [8, 8], strides = [1, 1]} : vector<16x8xf32> to vector<8x8xf32>
    %354 = tpu.transpose %352, [1, 0] : vector<8x8xf32> -> vector<8x8xf32>
    %cst_146 = arith.constant dense<0.000000e+00> : vector<8x8xf32>
    %355 = tpu.matmul %351, %354, %cst_146 {dimension_numbers = #tpu.dot_dimension_numbers<[1], [0], [0], [1], [0, 0, 1, 1], [], []>} : vector<8x8xf32>, vector<8x8xf32>, vector<8x8xf32> -> vector<8x8xf32>
    %cst_147 = arith.constant dense<0xFF800000> : vector<8xf32>
    %356 = vector.multi_reduction <maximumf>, %355, %cst_147 [1] : vector<8x8xf32> to vector<8xf32>
    %357 = vector.shape_cast %356 : vector<8xf32> to vector<8x1xf32>
    %358 = vector.broadcast %357 : vector<8x1xf32> to vector<8x8xf32>
    %359 = arith.subf %355, %358 : vector<8x8xf32>
    %360 = math.exp %359 : vector<8x8xf32>
    %cst_148 = arith.constant dense<0.000000e+00> : vector<8xf32>
    %361 = vector.multi_reduction <add>, %360, %cst_148 [1] : vector<8x8xf32> to vector<8xf32>
    %362 = vector.shape_cast %361 : vector<8xf32> to vector<8x1xf32>
    %363 = tpu.reciprocal %362 {approx = true} : vector<8x1xf32> -> vector<8x1xf32>
    %364 = arith.mulf %362, %363 : vector<8x1xf32>
    %cst_149 = arith.constant 2.000000e+00 : f32
    %365 = vector.broadcast %cst_149 : f32 to vector<8x1xf32>
    %366 = arith.subf %365, %364 : vector<8x1xf32>
    %367 = arith.mulf %363, %366 : vector<8x1xf32>
    %368 = vector.broadcast %367 : vector<8x1xf32> to vector<8x8xf32>
    %369 = arith.mulf %360, %368 : vector<8x8xf32>
    %cst_150 = arith.constant dense<0.000000e+00> : vector<8x8xf32>
    %370 = tpu.matmul %369, %353, %cst_150 {dimension_numbers = #tpu.dot_dimension_numbers<[1], [0], [0], [1], [0, 0, 1, 1], [], []>} : vector<8x8xf32>, vector<8x8xf32>, vector<8x8xf32> -> vector<8x8xf32>
    %c0_151 = arith.constant 0 : index
    %c8_152 = arith.constant 8 : index
    %371 = vector.load %arg23[%c0_151, %c8_152] : memref<16x32xf32, #tpu.memory_space<vmem>>, vector<8x8xf32>
    tpu.vector_store %arg23[%c0_151, %c8_152], %370 {strides = array<i32>} : memref<16x32xf32, #tpu.memory_space<vmem>>, vector<8x8xf32>,
    %372 = vector.extract_strided_slice %348 {offsets = [8, 0], sizes = [8, 8], strides = [1, 1]} : vector<16x8xf32> to vector<8x8xf32>
    %373 = vector.extract_strided_slice %349 {offsets = [8, 0], sizes = [8, 8], strides = [1, 1]} : vector<16x8xf32> to vector<8x8xf32>
    %374 = vector.extract_strided_slice %350 {offsets = [8, 0], sizes = [8, 8], strides = [1, 1]} : vector<16x8xf32> to vector<8x8xf32>
    %375 = tpu.transpose %373, [1, 0] : vector<8x8xf32> -> vector<8x8xf32>
    %cst_153 = arith.constant dense<0.000000e+00> : vector<8x8xf32>
    %376 = tpu.matmul %372, %375, %cst_153 {dimension_numbers = #tpu.dot_dimension_numbers<[1], [0], [0], [1], [0, 0, 1, 1], [], []>} : vector<8x8xf32>, vector<8x8xf32>, vector<8x8xf32> -> vector<8x8xf32>
    %cst_154 = arith.constant dense<0xFF800000> : vector<8xf32>
    %377 = vector.multi_reduction <maximumf>, %376, %cst_154 [1] : vector<8x8xf32> to vector<8xf32>
    %378 = vector.shape_cast %377 : vector<8xf32> to vector<8x1xf32>
    %379 = vector.broadcast %378 : vector<8x1xf32> to vector<8x8xf32>
    %380 = arith.subf %376, %379 : vector<8x8xf32>
    %381 = math.exp %380 : vector<8x8xf32>
    %cst_155 = arith.constant dense<0.000000e+00> : vector<8xf32>
    %382 = vector.multi_reduction <add>, %381, %cst_155 [1] : vector<8x8xf32> to vector<8xf32>
    %383 = vector.shape_cast %382 : vector<8xf32> to vector<8x1xf32>
    %384 = tpu.reciprocal %383 {approx = true} : vector<8x1xf32> -> vector<8x1xf32>
    %385 = arith.mulf %383, %384 : vector<8x1xf32>
    %cst_156 = arith.constant 2.000000e+00 : f32
    %386 = vector.broadcast %cst_156 : f32 to vector<8x1xf32>
    %387 = arith.subf %386, %385 : vector<8x1xf32>
    %388 = arith.mulf %384, %387 : vector<8x1xf32>
    %389 = vector.broadcast %388 : vector<8x1xf32> to vector<8x8xf32>
    %390 = arith.mulf %381, %389 : vector<8x8xf32>
    %cst_157 = arith.constant dense<0.000000e+00> : vector<8x8xf32>
    %391 = tpu.matmul %390, %374, %cst_157 {dimension_numbers = #tpu.dot_dimension_numbers<[1], [0], [0], [1], [0, 0, 1, 1], [], []>} : vector<8x8xf32>, vector<8x8xf32>, vector<8x8xf32> -> vector<8x8xf32>
    %c8_158 = arith.constant 8 : index
    %c8_159 = arith.constant 8 : index
    %392 = vector.load %arg23[%c8_158, %c8_159] : memref<16x32xf32, #tpu.memory_space<vmem>>, vector<8x8xf32>
    tpu.vector_store %arg23[%c8_158, %c8_159], %391 {strides = array<i32>} : memref<16x32xf32, #tpu.memory_space<vmem>>, vector<8x8xf32>,
    %393 = vector.extract_strided_slice %296 {offsets = [0, 16], sizes = [16, 8], strides = [1, 1]} : vector<16x32xf32> to vector<16x8xf32>
    %cst_160 = arith.constant 0.353553385 : f32
    %394 = vector.broadcast %cst_160 : f32 to vector<16x8xf32>
    %395 = arith.mulf %393, %394 : vector<16x8xf32>
    %396 = vector.extract_strided_slice %297 {offsets = [0, 16], sizes = [16, 8], strides = [1, 1]} : vector<16x32xf32> to vector<16x8xf32>
    %397 = vector.extract_strided_slice %298 {offsets = [0, 16], sizes = [16, 8], strides = [1, 1]} : vector<16x32xf32> to vector<16x8xf32>
    %398 = vector.extract_strided_slice %395 {offsets = [0, 0], sizes = [8, 8], strides = [1, 1]} : vector<16x8xf32> to vector<8x8xf32>
    %399 = vector.extract_strided_slice %396 {offsets = [0, 0], sizes = [8, 8], strides = [1, 1]} : vector<16x8xf32> to vector<8x8xf32>
    %400 = vector.extract_strided_slice %397 {offsets = [0, 0], sizes = [8, 8], strides = [1, 1]} : vector<16x8xf32> to vector<8x8xf32>
    %401 = tpu.transpose %399, [1, 0] : vector<8x8xf32> -> vector<8x8xf32>
    %cst_161 = arith.constant dense<0.000000e+00> : vector<8x8xf32>
    %402 = tpu.matmul %398, %401, %cst_161 {dimension_numbers = #tpu.dot_dimension_numbers<[1], [0], [0], [1], [0, 0, 1, 1], [], []>} : vector<8x8xf32>, vector<8x8xf32>, vector<8x8xf32> -> vector<8x8xf32>
    %cst_162 = arith.constant dense<0xFF800000> : vector<8xf32>
    %403 = vector.multi_reduction <maximumf>, %402, %cst_162 [1] : vector<8x8xf32> to vector<8xf32>
    %404 = vector.shape_cast %403 : vector<8xf32> to vector<8x1xf32>
    %405 = vector.broadcast %404 : vector<8x1xf32> to vector<8x8xf32>
    %406 = arith.subf %402, %405 : vector<8x8xf32>
    %407 = math.exp %406 : vector<8x8xf32>
    %cst_163 = arith.constant dense<0.000000e+00> : vector<8xf32>
    %408 = vector.multi_reduction <add>, %407, %cst_163 [1] : vector<8x8xf32> to vector<8xf32>
    %409 = vector.shape_cast %408 : vector<8xf32> to vector<8x1xf32>
    %410 = tpu.reciprocal %409 {approx = true} : vector<8x1xf32> -> vector<8x1xf32>
    %411 = arith.mulf %409, %410 : vector<8x1xf32>
    %cst_164 = arith.constant 2.000000e+00 : f32
    %412 = vector.broadcast %cst_164 : f32 to vector<8x1xf32>
    %413 = arith.subf %412, %411 : vector<8x1xf32>
    %414 = arith.mulf %410, %413 : vector<8x1xf32>
    %415 = vector.broadcast %414 : vector<8x1xf32> to vector<8x8xf32>
    %416 = arith.mulf %407, %415 : vector<8x8xf32>
    %cst_165 = arith.constant dense<0.000000e+00> : vector<8x8xf32>
    %417 = tpu.matmul %416, %400, %cst_165 {dimension_numbers = #tpu.dot_dimension_numbers<[1], [0], [0], [1], [0, 0, 1, 1], [], []>} : vector<8x8xf32>, vector<8x8xf32>, vector<8x8xf32> -> vector<8x8xf32>
    %c0_166 = arith.constant 0 : index
    %c16_167 = arith.constant 16 : index
    %418 = vector.load %arg23[%c0_166, %c16_167] : memref<16x32xf32, #tpu.memory_space<vmem>>, vector<8x8xf32>
    tpu.vector_store %arg23[%c0_166, %c16_167], %417 {strides = array<i32>} : memref<16x32xf32, #tpu.memory_space<vmem>>, vector<8x8xf32>,
    %419 = vector.extract_strided_slice %395 {offsets = [8, 0], sizes = [8, 8], strides = [1, 1]} : vector<16x8xf32> to vector<8x8xf32>
    %420 = vector.extract_strided_slice %396 {offsets = [8, 0], sizes = [8, 8], strides = [1, 1]} : vector<16x8xf32> to vector<8x8xf32>
    %421 = vector.extract_strided_slice %397 {offsets = [8, 0], sizes = [8, 8], strides = [1, 1]} : vector<16x8xf32> to vector<8x8xf32>
    %422 = tpu.transpose %420, [1, 0] : vector<8x8xf32> -> vector<8x8xf32>
    %cst_168 = arith.constant dense<0.000000e+00> : vector<8x8xf32>
    %423 = tpu.matmul %419, %422, %cst_168 {dimension_numbers = #tpu.dot_dimension_numbers<[1], [0], [0], [1], [0, 0, 1, 1], [], []>} : vector<8x8xf32>, vector<8x8xf32>, vector<8x8xf32> -> vector<8x8xf32>
    %cst_169 = arith.constant dense<0xFF800000> : vector<8xf32>
    %424 = vector.multi_reduction <maximumf>, %423, %cst_169 [1] : vector<8x8xf32> to vector<8xf32>
    %425 = vector.shape_cast %424 : vector<8xf32> to vector<8x1xf32>
    %426 = vector.broadcast %425 : vector<8x1xf32> to vector<8x8xf32>
    %427 = arith.subf %423, %426 : vector<8x8xf32>
    %428 = math.exp %427 : vector<8x8xf32>
    %cst_170 = arith.constant dense<0.000000e+00> : vector<8xf32>
    %429 = vector.multi_reduction <add>, %428, %cst_170 [1] : vector<8x8xf32> to vector<8xf32>
    %430 = vector.shape_cast %429 : vector<8xf32> to vector<8x1xf32>
    %431 = tpu.reciprocal %430 {approx = true} : vector<8x1xf32> -> vector<8x1xf32>
    %432 = arith.mulf %430, %431 : vector<8x1xf32>
    %cst_171 = arith.constant 2.000000e+00 : f32
    %433 = vector.broadcast %cst_171 : f32 to vector<8x1xf32>
    %434 = arith.subf %433, %432 : vector<8x1xf32>
    %435 = arith.mulf %431, %434 : vector<8x1xf32>
    %436 = vector.broadcast %435 : vector<8x1xf32> to vector<8x8xf32>
    %437 = arith.mulf %428, %436 : vector<8x8xf32>
    %cst_172 = arith.constant dense<0.000000e+00> : vector<8x8xf32>
    %438 = tpu.matmul %437, %421, %cst_172 {dimension_numbers = #tpu.dot_dimension_numbers<[1], [0], [0], [1], [0, 0, 1, 1], [], []>} : vector<8x8xf32>, vector<8x8xf32>, vector<8x8xf32> -> vector<8x8xf32>
    %c8_173 = arith.constant 8 : index
    %c16_174 = arith.constant 16 : index
    %439 = vector.load %arg23[%c8_173, %c16_174] : memref<16x32xf32, #tpu.memory_space<vmem>>, vector<8x8xf32>
    tpu.vector_store %arg23[%c8_173, %c16_174], %438 {strides = array<i32>} : memref<16x32xf32, #tpu.memory_space<vmem>>, vector<8x8xf32>,
    %440 = vector.extract_strided_slice %296 {offsets = [0, 24], sizes = [16, 8], strides = [1, 1]} : vector<16x32xf32> to vector<16x8xf32>
    %cst_175 = arith.constant 0.353553385 : f32
    %441 = vector.broadcast %cst_175 : f32 to vector<16x8xf32>
    %442 = arith.mulf %440, %441 : vector<16x8xf32>
    %443 = vector.extract_strided_slice %297 {offsets = [0, 24], sizes = [16, 8], strides = [1, 1]} : vector<16x32xf32> to vector<16x8xf32>
    %444 = vector.extract_strided_slice %298 {offsets = [0, 24], sizes = [16, 8], strides = [1, 1]} : vector<16x32xf32> to vector<16x8xf32>
    %445 = vector.extract_strided_slice %442 {offsets = [0, 0], sizes = [8, 8], strides = [1, 1]} : vector<16x8xf32> to vector<8x8xf32>
    %446 = vector.extract_strided_slice %443 {offsets = [0, 0], sizes = [8, 8], strides = [1, 1]} : vector<16x8xf32> to vector<8x8xf32>
    %447 = vector.extract_strided_slice %444 {offsets = [0, 0], sizes = [8, 8], strides = [1, 1]} : vector<16x8xf32> to vector<8x8xf32>
    %448 = tpu.transpose %446, [1, 0] : vector<8x8xf32> -> vector<8x8xf32>
    %cst_176 = arith.constant dense<0.000000e+00> : vector<8x8xf32>
    %449 = tpu.matmul %445, %448, %cst_176 {dimension_numbers = #tpu.dot_dimension_numbers<[1], [0], [0], [1], [0, 0, 1, 1], [], []>} : vector<8x8xf32>, vector<8x8xf32>, vector<8x8xf32> -> vector<8x8xf32>
    %cst_177 = arith.constant dense<0xFF800000> : vector<8xf32>
    %450 = vector.multi_reduction <maximumf>, %449, %cst_177 [1] : vector<8x8xf32> to vector<8xf32>
    %451 = vector.shape_cast %450 : vector<8xf32> to vector<8x1xf32>
    %452 = vector.broadcast %451 : vector<8x1xf32> to vector<8x8xf32>
    %453 = arith.subf %449, %452 : vector<8x8xf32>
    %454 = math.exp %453 : vector<8x8xf32>
    %cst_178 = arith.constant dense<0.000000e+00> : vector<8xf32>
    %455 = vector.multi_reduction <add>, %454, %cst_178 [1] : vector<8x8xf32> to vector<8xf32>
    %456 = vector.shape_cast %455 : vector<8xf32> to vector<8x1xf32>
    %457 = tpu.reciprocal %456 {approx = true} : vector<8x1xf32> -> vector<8x1xf32>
    %458 = arith.mulf %456, %457 : vector<8x1xf32>
    %cst_179 = arith.constant 2.000000e+00 : f32
    %459 = vector.broadcast %cst_179 : f32 to vector<8x1xf32>
    %460 = arith.subf %459, %458 : vector<8x1xf32>
    %461 = arith.mulf %457, %460 : vector<8x1xf32>
    %462 = vector.broadcast %461 : vector<8x1xf32> to vector<8x8xf32>
    %463 = arith.mulf %454, %462 : vector<8x8xf32>
    %cst_180 = arith.constant dense<0.000000e+00> : vector<8x8xf32>
    %464 = tpu.matmul %463, %447, %cst_180 {dimension_numbers = #tpu.dot_dimension_numbers<[1], [0], [0], [1], [0, 0, 1, 1], [], []>} : vector<8x8xf32>, vector<8x8xf32>, vector<8x8xf32> -> vector<8x8xf32>
    %c0_181 = arith.constant 0 : index
    %c24_182 = arith.constant 24 : index
    %465 = vector.load %arg23[%c0_181, %c24_182] : memref<16x32xf32, #tpu.memory_space<vmem>>, vector<8x8xf32>
    tpu.vector_store %arg23[%c0_181, %c24_182], %464 {strides = array<i32>} : memref<16x32xf32, #tpu.memory_space<vmem>>, vector<8x8xf32>,
    %466 = vector.extract_strided_slice %442 {offsets = [8, 0], sizes = [8, 8], strides = [1, 1]} : vector<16x8xf32> to vector<8x8xf32>
    %467 = vector.extract_strided_slice %443 {offsets = [8, 0], sizes = [8, 8], strides = [1, 1]} : vector<16x8xf32> to vector<8x8xf32>
    %468 = vector.extract_strided_slice %444 {offsets = [8, 0], sizes = [8, 8], strides = [1, 1]} : vector<16x8xf32> to vector<8x8xf32>
    %469 = tpu.transpose %467, [1, 0] : vector<8x8xf32> -> vector<8x8xf32>
    %cst_183 = arith.constant dense<0.000000e+00> : vector<8x8xf32>
    %470 = tpu.matmul %466, %469, %cst_183 {dimension_numbers = #tpu.dot_dimension_numbers<[1], [0], [0], [1], [0, 0, 1, 1], [], []>} : vector<8x8xf32>, vector<8x8xf32>, vector<8x8xf32> -> vector<8x8xf32>
    %cst_184 = arith.constant dense<0xFF800000> : vector<8xf32>
    %471 = vector.multi_reduction <maximumf>, %470, %cst_184 [1] : vector<8x8xf32> to vector<8xf32>
    %472 = vector.shape_cast %471 : vector<8xf32> to vector<8x1xf32>
    %473 = vector.broadcast %472 : vector<8x1xf32> to vector<8x8xf32>
    %474 = arith.subf %470, %473 : vector<8x8xf32>
    %475 = math.exp %474 : vector<8x8xf32>
    %cst_185 = arith.constant dense<0.000000e+00> : vector<8xf32>
    %476 = vector.multi_reduction <add>, %475, %cst_185 [1] : vector<8x8xf32> to vector<8xf32>
    %477 = vector.shape_cast %476 : vector<8xf32> to vector<8x1xf32>
    %478 = tpu.reciprocal %477 {approx = true} : vector<8x1xf32> -> vector<8x1xf32>
    %479 = arith.mulf %477, %478 : vector<8x1xf32>
    %cst_186 = arith.constant 2.000000e+00 : f32
    %480 = vector.broadcast %cst_186 : f32 to vector<8x1xf32>
    %481 = arith.subf %480, %479 : vector<8x1xf32>
    %482 = arith.mulf %478, %481 : vector<8x1xf32>
    %483 = vector.broadcast %482 : vector<8x1xf32> to vector<8x8xf32>
    %484 = arith.mulf %475, %483 : vector<8x8xf32>
    %cst_187 = arith.constant dense<0.000000e+00> : vector<8x8xf32>
    %485 = tpu.matmul %484, %468, %cst_187 {dimension_numbers = #tpu.dot_dimension_numbers<[1], [0], [0], [1], [0, 0, 1, 1], [], []>} : vector<8x8xf32>, vector<8x8xf32>, vector<8x8xf32> -> vector<8x8xf32>
    %c8_188 = arith.constant 8 : index
    %c24_189 = arith.constant 24 : index
    %486 = vector.load %arg23[%c8_188, %c24_189] : memref<16x32xf32, #tpu.memory_space<vmem>>, vector<8x8xf32>
    tpu.vector_store %arg23[%c8_188, %c24_189], %485 {strides = array<i32>} : memref<16x32xf32, #tpu.memory_space<vmem>>, vector<8x8xf32>,
    %c0_190 = arith.constant 0 : index
    %c0_191 = arith.constant 0 : index
    %487 = vector.load %arg23[%c0_190, %c0_191] : memref<16x32xf32, #tpu.memory_space<vmem>>, vector<16x32xf32>
    %c1_192 = arith.constant 1 : index
    %c0_193 = arith.constant 0 : index
    %c0_194 = arith.constant 0 : index
    %488 = vector.load %arg12[%c1_192, %c0_193, %c0_194] : memref<2x32x32xf32, #tpu.memory_space<vmem>>, vector<1x32x32xf32>
    %489 = vector.shape_cast %488 : vector<1x32x32xf32> to vector<32x32xf32>
    %cst_195 = arith.constant dense<0.000000e+00> : vector<16x32xf32>
    %490 = tpu.matmul %487, %489, %cst_195 {dimension_numbers = #tpu.dot_dimension_numbers<[1], [0], [0], [1], [0, 0, 1, 1], [], []>} : vector<16x32xf32>, vector<32x32xf32>, vector<16x32xf32> -> vector<16x32xf32>
    %c1_196 = arith.constant 1 : index
    %c0_197 = arith.constant 0 : index
    %c0_198 = arith.constant 0 : index
    %491 = vector.load %arg13[%c1_196, %c0_197, %c0_198] : memref<2x1x32xf32, #tpu.memory_space<vmem>>, vector<1x1x32xf32>
    %492 = vector.shape_cast %491 : vector<1x1x32xf32> to vector<1x32xf32>
    %493 = vector.broadcast %492 : vector<1x32xf32> to vector<16x32xf32>
    %494 = arith.addf %490, %493 : vector<16x32xf32>
    %495 = arith.addf %288, %494 : vector<16x32xf32>
    %c1_199 = arith.constant 1 : index
    %c0_200 = arith.constant 0 : index
    %c0_201 = arith.constant 0 : index
    %496 = vector.load %arg14[%c1_199, %c0_200, %c0_201] : memref<2x1x32xf32, #tpu.memory_space<vmem>>, vector<1x1x32xf32>
    %497 = vector.shape_cast %496 : vector<1x1x32xf32> to vector<1x32xf32>
    %c1_202 = arith.constant 1 : index
    %c0_203 = arith.constant 0 : index
    %c0_204 = arith.constant 0 : index
    %498 = vector.load %arg15[%c1_202, %c0_203, %c0_204] : memref<2x1x32xf32, #tpu.memory_space<vmem>>, vector<1x1x32xf32>
    %499 = vector.shape_cast %498 : vector<1x1x32xf32> to vector<1x32xf32>
    %cst_205 = arith.constant dense<0.000000e+00> : vector<16xf32>
    %500 = vector.multi_reduction <add>, %495, %cst_205 [1] : vector<16x32xf32> to vector<16xf32>
    %501 = vector.shape_cast %500 : vector<16xf32> to vector<16x1xf32>
    %cst_206 = arith.constant 3.200000e+01 : f32
    %502 = vector.broadcast %cst_206 : f32 to vector<16x1xf32>
    %503 = arith.divf %501, %502 : vector<16x1xf32>
    %504 = vector.broadcast %503 : vector<16x1xf32> to vector<16x32xf32>
    %505 = arith.subf %495, %504 : vector<16x32xf32>
    %506 = arith.mulf %505, %505 : vector<16x32xf32>
    %cst_207 = arith.constant dense<0.000000e+00> : vector<16xf32>
    %507 = vector.multi_reduction <add>, %506, %cst_207 [1] : vector<16x32xf32> to vector<16xf32>
    %508 = vector.shape_cast %507 : vector<16xf32> to vector<16x1xf32>
    %cst_208 = arith.constant 3.200000e+01 : f32
    %509 = vector.broadcast %cst_208 : f32 to vector<16x1xf32>
    %510 = arith.divf %508, %509 : vector<16x1xf32>
    %cst_209 = arith.constant 9.99999974E-6 : f32
    %511 = vector.broadcast %cst_209 : f32 to vector<16x1xf32>
    %512 = arith.addf %510, %511 : vector<16x1xf32>
    %513 = math.rsqrt %512 : vector<16x1xf32>
    %514 = vector.broadcast %513 : vector<16x1xf32> to vector<16x32xf32>
    %515 = arith.mulf %505, %514 : vector<16x32xf32>
    %516 = vector.broadcast %497 : vector<1x32xf32> to vector<16x32xf32>
    %517 = arith.mulf %515, %516 : vector<16x32xf32>
    %518 = vector.broadcast %499 : vector<1x32xf32> to vector<16x32xf32>
    %519 = arith.addf %517, %518 : vector<16x32xf32>
    %c1_210 = arith.constant 1 : index
    %c0_211 = arith.constant 0 : index
    %c0_212 = arith.constant 0 : index
    %520 = vector.load %arg16[%c1_210, %c0_211, %c0_212] : memref<2x32x128xf32, #tpu.memory_space<vmem>>, vector<1x32x128xf32>
    %521 = vector.shape_cast %520 : vector<1x32x128xf32> to vector<32x128xf32>
    %cst_213 = arith.constant dense<0.000000e+00> : vector<16x128xf32>
    %522 = tpu.matmul %519, %521, %cst_213 {dimension_numbers = #tpu.dot_dimension_numbers<[1], [0], [0], [1], [0, 0, 1, 1], [], []>} : vector<16x32xf32>, vector<32x128xf32>, vector<16x128xf32> -> vector<16x128xf32>
    %c1_214 = arith.constant 1 : index
    %c0_215 = arith.constant 0 : index
    %c0_216 = arith.constant 0 : index
    %523 = vector.load %arg17[%c1_214, %c0_215, %c0_216] : memref<2x1x128xf32, #tpu.memory_space<vmem>>, vector<1x1x128xf32>
    %524 = vector.shape_cast %523 : vector<1x1x128xf32> to vector<1x128xf32>
    %525 = vector.broadcast %524 : vector<1x128xf32> to vector<16x128xf32>
    %526 = arith.addf %522, %525 : vector<16x128xf32>
    %cst_217 = arith.constant 0.000000e+00 : f32
    %527 = vector.broadcast %cst_217 : f32 to vector<16x128xf32>
    %528 = arith.maximumf %526, %527 : vector<16x128xf32>
    %c1_218 = arith.constant 1 : index
    %c0_219 = arith.constant 0 : index
    %c0_220 = arith.constant 0 : index
    %529 = vector.load %arg18[%c1_218, %c0_219, %c0_220] : memref<2x128x32xf32, #tpu.memory_space<vmem>>, vector<1x128x32xf32>
    %530 = vector.shape_cast %529 : vector<1x128x32xf32> to vector<128x32xf32>
    %cst_221 = arith.constant dense<0.000000e+00> : vector<16x32xf32>
    %531 = tpu.matmul %528, %530, %cst_221 {dimension_numbers = #tpu.dot_dimension_numbers<[1], [0], [0], [1], [0, 0, 1, 1], [], []>} : vector<16x128xf32>, vector<128x32xf32>, vector<16x32xf32> -> vector<16x32xf32>
    %c1_222 = arith.constant 1 : index
    %c0_223 = arith.constant 0 : index
    %c0_224 = arith.constant 0 : index
    %532 = vector.load %arg19[%c1_222, %c0_223, %c0_224] : memref<2x1x32xf32, #tpu.memory_space<vmem>>, vector<1x1x32xf32>
    %533 = vector.shape_cast %532 : vector<1x1x32xf32> to vector<1x32xf32>
    %534 = vector.broadcast %533 : vector<1x32xf32> to vector<16x32xf32>
    %535 = arith.addf %531, %534 : vector<16x32xf32>
    %536 = arith.addf %519, %535 : vector<16x32xf32>
    %c1_225 = arith.constant 1 : index
    %c0_226 = arith.constant 0 : index
    %c0_227 = arith.constant 0 : index
    %537 = vector.load %arg20[%c1_225, %c0_226, %c0_227] : memref<2x1x32xf32, #tpu.memory_space<vmem>>, vector<1x1x32xf32>
    %538 = vector.shape_cast %537 : vector<1x1x32xf32> to vector<1x32xf32>
    %c1_228 = arith.constant 1 : index
    %c0_229 = arith.constant 0 : index
    %c0_230 = arith.constant 0 : index
    %539 = vector.load %arg21[%c1_228, %c0_229, %c0_230] : memref<2x1x32xf32, #tpu.memory_space<vmem>>, vector<1x1x32xf32>
    %540 = vector.shape_cast %539 : vector<1x1x32xf32> to vector<1x32xf32>
    %cst_231 = arith.constant dense<0.000000e+00> : vector<16xf32>
    %541 = vector.multi_reduction <add>, %536, %cst_231 [1] : vector<16x32xf32> to vector<16xf32>
    %542 = vector.shape_cast %541 : vector<16xf32> to vector<16x1xf32>
    %cst_232 = arith.constant 3.200000e+01 : f32
    %543 = vector.broadcast %cst_232 : f32 to vector<16x1xf32>
    %544 = arith.divf %542, %543 : vector<16x1xf32>
    %545 = vector.broadcast %544 : vector<16x1xf32> to vector<16x32xf32>
    %546 = arith.subf %536, %545 : vector<16x32xf32>
    %547 = arith.mulf %546, %546 : vector<16x32xf32>
    %cst_233 = arith.constant dense<0.000000e+00> : vector<16xf32>
    %548 = vector.multi_reduction <add>, %547, %cst_233 [1] : vector<16x32xf32> to vector<16xf32>
    %549 = vector.shape_cast %548 : vector<16xf32> to vector<16x1xf32>
    %cst_234 = arith.constant 3.200000e+01 : f32
    %550 = vector.broadcast %cst_234 : f32 to vector<16x1xf32>
    %551 = arith.divf %549, %550 : vector<16x1xf32>
    %cst_235 = arith.constant 9.99999974E-6 : f32
    %552 = vector.broadcast %cst_235 : f32 to vector<16x1xf32>
    %553 = arith.addf %551, %552 : vector<16x1xf32>
    %554 = math.rsqrt %553 : vector<16x1xf32>
    %555 = vector.broadcast %554 : vector<16x1xf32> to vector<16x32xf32>
    %556 = arith.mulf %546, %555 : vector<16x32xf32>
    %557 = vector.broadcast %538 : vector<1x32xf32> to vector<16x32xf32>
    %558 = arith.mulf %556, %557 : vector<16x32xf32>
    %559 = vector.broadcast %540 : vector<1x32xf32> to vector<16x32xf32>
    %560 = arith.addf %558, %559 : vector<16x32xf32>
    %c0_236 = arith.constant 0 : index
    %c0_237 = arith.constant 0 : index
    %561 = vector.load %arg6[%c0_236, %c0_237] : memref<32x64xf32, #tpu.memory_space<vmem>>, vector<32x64xf32>
    %cst_238 = arith.constant dense<0.000000e+00> : vector<16x64xf32>
    %562 = tpu.matmul %560, %561, %cst_238 {dimension_numbers = #tpu.dot_dimension_numbers<[1], [0], [0], [1], [0, 0, 1, 1], [], []>} : vector<16x32xf32>, vector<32x64xf32>, vector<16x64xf32> -> vector<16x64xf32>
    %c0_239 = arith.constant 0 : index
    %c0_240 = arith.constant 0 : index
    %563 = vector.load %arg7[%c0_239, %c0_240] : memref<1x64xf32, #tpu.memory_space<vmem>>, vector<1x64xf32>
    %564 = vector.broadcast %563 : vector<1x64xf32> to vector<16x64xf32>
    %565 = arith.addf %562, %564 : vector<16x64xf32>
    %cst_241 = arith.constant 0.000000e+00 : f32
    %566 = vector.broadcast %cst_241 : f32 to vector<16x64xf32>
    %567 = arith.maximumf %565, %566 : vector<16x64xf32>
    %c0_242 = arith.constant 0 : index
    %c0_243 = arith.constant 0 : index
    %568 = vector.load %arg8[%c0_242, %c0_243] : memref<64x128xf32, #tpu.memory_space<vmem>>, vector<64x128xf32>
    %cst_244 = arith.constant dense<0.000000e+00> : vector<16x128xf32>
    %569 = tpu.matmul %567, %568, %cst_244 {dimension_numbers = #tpu.dot_dimension_numbers<[1], [0], [0], [1], [0, 0, 1, 1], [], []>} : vector<16x64xf32>, vector<64x128xf32>, vector<16x128xf32> -> vector<16x128xf32>
    %c0_245 = arith.constant 0 : index
    %c0_246 = arith.constant 0 : index
    %570 = vector.load %arg9[%c0_245, %c0_246] : memref<1x128xf32, #tpu.memory_space<vmem>>, vector<1x128xf32>
    %571 = vector.broadcast %570 : vector<1x128xf32> to vector<16x128xf32>
    %572 = arith.addf %569, %571 : vector<16x128xf32>
    %c0_247 = arith.constant 0 : index
    %c0_248 = arith.constant 0 : index
    %c0_249 = arith.constant 0 : index
    %573 = vector.load %arg22[%c0_247, %c0_248, %c0_249] : memref<2x16x128xf32, #tpu.memory_space<vmem>>, vector<1x16x128xf32>
    %574 = vector.shape_cast %573 : vector<1x16x128xf32> to vector<16x128xf32>
    %575 = vector.shape_cast %572 : vector<16x128xf32> to vector<1x16x128xf32>
    tpu.vector_store %arg22[%c0_247, %c0_248, %c0_249], %575 {strides = array<i32>} : memref<2x16x128xf32, #tpu.memory_space<vmem>>, vector<1x16x128xf32>,
    %c1_250 = arith.constant 1 : index
    %c0_251 = arith.constant 0 : index
    %c0_252 = arith.constant 0 : index
    %576 = vector.load %arg1[%c1_250, %c0_251, %c0_252] : memref<2x1x32xf32, #tpu.memory_space<vmem>>, vector<1x1x32xf32>
    %577 = vector.shape_cast %576 : vector<1x1x32xf32> to vector<1x32xf32>
    %578 = vector.broadcast %577 : vector<1x32xf32> to vector<16x32xf32>
    %579 = arith.addf %560, %578 : vector<16x32xf32>
    %c0_253 = arith.constant 0 : index
    %c0_254 = arith.constant 0 : index
    %c0_255 = arith.constant 0 : index
    %580 = vector.load %arg10[%c0_253, %c0_254, %c0_255] : memref<2x32x128xf32, #tpu.memory_space<vmem>>, vector<1x32x128xf32>
    %581 = vector.shape_cast %580 : vector<1x32x128xf32> to vector<32x128xf32>
    %cst_256 = arith.constant dense<0.000000e+00> : vector<16x128xf32>
    %582 = tpu.matmul %579, %581, %cst_256 {dimension_numbers = #tpu.dot_dimension_numbers<[1], [0], [0], [1], [0, 0, 1, 1], [], []>} : vector<16x32xf32>, vector<32x128xf32>, vector<16x128xf32> -> vector<16x128xf32>
    %c0_257 = arith.constant 0 : index
    %c0_258 = arith.constant 0 : index
    %c0_259 = arith.constant 0 : index
    %583 = vector.load %arg11[%c0_257, %c0_258, %c0_259] : memref<2x1x128xf32, #tpu.memory_space<vmem>>, vector<1x1x128xf32>
    %584 = vector.shape_cast %583 : vector<1x1x128xf32> to vector<1x128xf32>
    %585 = vector.broadcast %584 : vector<1x128xf32> to vector<16x128xf32>
    %586 = arith.addf %582, %585 : vector<16x128xf32>
    %587 = vector.extract_strided_slice %586 {offsets = [0, 0], sizes = [16, 32], strides = [1, 1]} : vector<16x128xf32> to vector<16x32xf32>
    %588 = vector.extract_strided_slice %586 {offsets = [0, 32], sizes = [16, 32], strides = [1, 1]} : vector<16x128xf32> to vector<16x32xf32>
    %589 = vector.extract_strided_slice %586 {offsets = [0, 64], sizes = [16, 32], strides = [1, 1]} : vector<16x128xf32> to vector<16x32xf32>
    %590 = vector.extract_strided_slice %587 {offsets = [0, 0], sizes = [16, 8], strides = [1, 1]} : vector<16x32xf32> to vector<16x8xf32>
    %cst_260 = arith.constant 0.353553385 : f32
    %591 = vector.broadcast %cst_260 : f32 to vector<16x8xf32>
    %592 = arith.mulf %590, %591 : vector<16x8xf32>
    %593 = vector.extract_strided_slice %588 {offsets = [0, 0], sizes = [16, 8], strides = [1, 1]} : vector<16x32xf32> to vector<16x8xf32>
    %594 = vector.extract_strided_slice %589 {offsets = [0, 0], sizes = [16, 8], strides = [1, 1]} : vector<16x32xf32> to vector<16x8xf32>
    %595 = vector.extract_strided_slice %592 {offsets = [0, 0], sizes = [8, 8], strides = [1, 1]} : vector<16x8xf32> to vector<8x8xf32>
    %596 = vector.extract_strided_slice %593 {offsets = [0, 0], sizes = [8, 8], strides = [1, 1]} : vector<16x8xf32> to vector<8x8xf32>
    %597 = vector.extract_strided_slice %594 {offsets = [0, 0], sizes = [8, 8], strides = [1, 1]} : vector<16x8xf32> to vector<8x8xf32>
    %598 = tpu.transpose %596, [1, 0] : vector<8x8xf32> -> vector<8x8xf32>
    %cst_261 = arith.constant dense<0.000000e+00> : vector<8x8xf32>
    %599 = tpu.matmul %595, %598, %cst_261 {dimension_numbers = #tpu.dot_dimension_numbers<[1], [0], [0], [1], [0, 0, 1, 1], [], []>} : vector<8x8xf32>, vector<8x8xf32>, vector<8x8xf32> -> vector<8x8xf32>
    %cst_262 = arith.constant dense<0xFF800000> : vector<8xf32>
    %600 = vector.multi_reduction <maximumf>, %599, %cst_262 [1] : vector<8x8xf32> to vector<8xf32>
    %601 = vector.shape_cast %600 : vector<8xf32> to vector<8x1xf32>
    %602 = vector.broadcast %601 : vector<8x1xf32> to vector<8x8xf32>
    %603 = arith.subf %599, %602 : vector<8x8xf32>
    %604 = math.exp %603 : vector<8x8xf32>
    %cst_263 = arith.constant dense<0.000000e+00> : vector<8xf32>
    %605 = vector.multi_reduction <add>, %604, %cst_263 [1] : vector<8x8xf32> to vector<8xf32>
    %606 = vector.shape_cast %605 : vector<8xf32> to vector<8x1xf32>
    %607 = tpu.reciprocal %606 {approx = true} : vector<8x1xf32> -> vector<8x1xf32>
    %608 = arith.mulf %606, %607 : vector<8x1xf32>
    %cst_264 = arith.constant 2.000000e+00 : f32
    %609 = vector.broadcast %cst_264 : f32 to vector<8x1xf32>
    %610 = arith.subf %609, %608 : vector<8x1xf32>
    %611 = arith.mulf %607, %610 : vector<8x1xf32>
    %612 = vector.broadcast %611 : vector<8x1xf32> to vector<8x8xf32>
    %613 = arith.mulf %604, %612 : vector<8x8xf32>
    %cst_265 = arith.constant dense<0.000000e+00> : vector<8x8xf32>
    %614 = tpu.matmul %613, %597, %cst_265 {dimension_numbers = #tpu.dot_dimension_numbers<[1], [0], [0], [1], [0, 0, 1, 1], [], []>} : vector<8x8xf32>, vector<8x8xf32>, vector<8x8xf32> -> vector<8x8xf32>
    %c0_266 = arith.constant 0 : index
    %c0_267 = arith.constant 0 : index
    %615 = vector.load %arg23[%c0_266, %c0_267] : memref<16x32xf32, #tpu.memory_space<vmem>>, vector<8x8xf32>
    tpu.vector_store %arg23[%c0_266, %c0_267], %614 {strides = array<i32>} : memref<16x32xf32, #tpu.memory_space<vmem>>, vector<8x8xf32>,
    %616 = vector.extract_strided_slice %592 {offsets = [8, 0], sizes = [8, 8], strides = [1, 1]} : vector<16x8xf32> to vector<8x8xf32>
    %617 = vector.extract_strided_slice %593 {offsets = [8, 0], sizes = [8, 8], strides = [1, 1]} : vector<16x8xf32> to vector<8x8xf32>
    %618 = vector.extract_strided_slice %594 {offsets = [8, 0], sizes = [8, 8], strides = [1, 1]} : vector<16x8xf32> to vector<8x8xf32>
    %619 = tpu.transpose %617, [1, 0] : vector<8x8xf32> -> vector<8x8xf32>
    %cst_268 = arith.constant dense<0.000000e+00> : vector<8x8xf32>
    %620 = tpu.matmul %616, %619, %cst_268 {dimension_numbers = #tpu.dot_dimension_numbers<[1], [0], [0], [1], [0, 0, 1, 1], [], []>} : vector<8x8xf32>, vector<8x8xf32>, vector<8x8xf32> -> vector<8x8xf32>
    %cst_269 = arith.constant dense<0xFF800000> : vector<8xf32>
    %621 = vector.multi_reduction <maximumf>, %620, %cst_269 [1] : vector<8x8xf32> to vector<8xf32>
    %622 = vector.shape_cast %621 : vector<8xf32> to vector<8x1xf32>
    %623 = vector.broadcast %622 : vector<8x1xf32> to vector<8x8xf32>
    %624 = arith.subf %620, %623 : vector<8x8xf32>
    %625 = math.exp %624 : vector<8x8xf32>
    %cst_270 = arith.constant dense<0.000000e+00> : vector<8xf32>
    %626 = vector.multi_reduction <add>, %625, %cst_270 [1] : vector<8x8xf32> to vector<8xf32>
    %627 = vector.shape_cast %626 : vector<8xf32> to vector<8x1xf32>
    %628 = tpu.reciprocal %627 {approx = true} : vector<8x1xf32> -> vector<8x1xf32>
    %629 = arith.mulf %627, %628 : vector<8x1xf32>
    %cst_271 = arith.constant 2.000000e+00 : f32
    %630 = vector.broadcast %cst_271 : f32 to vector<8x1xf32>
    %631 = arith.subf %630, %629 : vector<8x1xf32>
    %632 = arith.mulf %628, %631 : vector<8x1xf32>
    %633 = vector.broadcast %632 : vector<8x1xf32> to vector<8x8xf32>
    %634 = arith.mulf %625, %633 : vector<8x8xf32>
    %cst_272 = arith.constant dense<0.000000e+00> : vector<8x8xf32>
    %635 = tpu.matmul %634, %618, %cst_272 {dimension_numbers = #tpu.dot_dimension_numbers<[1], [0], [0], [1], [0, 0, 1, 1], [], []>} : vector<8x8xf32>, vector<8x8xf32>, vector<8x8xf32> -> vector<8x8xf32>
    %c8_273 = arith.constant 8 : index
    %c0_274 = arith.constant 0 : index
    %636 = vector.load %arg23[%c8_273, %c0_274] : memref<16x32xf32, #tpu.memory_space<vmem>>, vector<8x8xf32>
    tpu.vector_store %arg23[%c8_273, %c0_274], %635 {strides = array<i32>} : memref<16x32xf32, #tpu.memory_space<vmem>>, vector<8x8xf32>,
    %637 = vector.extract_strided_slice %587 {offsets = [0, 8], sizes = [16, 8], strides = [1, 1]} : vector<16x32xf32> to vector<16x8xf32>
    %cst_275 = arith.constant 0.353553385 : f32
    %638 = vector.broadcast %cst_275 : f32 to vector<16x8xf32>
    %639 = arith.mulf %637, %638 : vector<16x8xf32>
    %640 = vector.extract_strided_slice %588 {offsets = [0, 8], sizes = [16, 8], strides = [1, 1]} : vector<16x32xf32> to vector<16x8xf32>
    %641 = vector.extract_strided_slice %589 {offsets = [0, 8], sizes = [16, 8], strides = [1, 1]} : vector<16x32xf32> to vector<16x8xf32>
    %642 = vector.extract_strided_slice %639 {offsets = [0, 0], sizes = [8, 8], strides = [1, 1]} : vector<16x8xf32> to vector<8x8xf32>
    %643 = vector.extract_strided_slice %640 {offsets = [0, 0], sizes = [8, 8], strides = [1, 1]} : vector<16x8xf32> to vector<8x8xf32>
    %644 = vector.extract_strided_slice %641 {offsets = [0, 0], sizes = [8, 8], strides = [1, 1]} : vector<16x8xf32> to vector<8x8xf32>
    %645 = tpu.transpose %643, [1, 0] : vector<8x8xf32> -> vector<8x8xf32>
    %cst_276 = arith.constant dense<0.000000e+00> : vector<8x8xf32>
    %646 = tpu.matmul %642, %645, %cst_276 {dimension_numbers = #tpu.dot_dimension_numbers<[1], [0], [0], [1], [0, 0, 1, 1], [], []>} : vector<8x8xf32>, vector<8x8xf32>, vector<8x8xf32> -> vector<8x8xf32>
    %cst_277 = arith.constant dense<0xFF800000> : vector<8xf32>
    %647 = vector.multi_reduction <maximumf>, %646, %cst_277 [1] : vector<8x8xf32> to vector<8xf32>
    %648 = vector.shape_cast %647 : vector<8xf32> to vector<8x1xf32>
    %649 = vector.broadcast %648 : vector<8x1xf32> to vector<8x8xf32>
    %650 = arith.subf %646, %649 : vector<8x8xf32>
    %651 = math.exp %650 : vector<8x8xf32>
    %cst_278 = arith.constant dense<0.000000e+00> : vector<8xf32>
    %652 = vector.multi_reduction <add>, %651, %cst_278 [1] : vector<8x8xf32> to vector<8xf32>
    %653 = vector.shape_cast %652 : vector<8xf32> to vector<8x1xf32>
    %654 = tpu.reciprocal %653 {approx = true} : vector<8x1xf32> -> vector<8x1xf32>
    %655 = arith.mulf %653, %654 : vector<8x1xf32>
    %cst_279 = arith.constant 2.000000e+00 : f32
    %656 = vector.broadcast %cst_279 : f32 to vector<8x1xf32>
    %657 = arith.subf %656, %655 : vector<8x1xf32>
    %658 = arith.mulf %654, %657 : vector<8x1xf32>
    %659 = vector.broadcast %658 : vector<8x1xf32> to vector<8x8xf32>
    %660 = arith.mulf %651, %659 : vector<8x8xf32>
    %cst_280 = arith.constant dense<0.000000e+00> : vector<8x8xf32>
    %661 = tpu.matmul %660, %644, %cst_280 {dimension_numbers = #tpu.dot_dimension_numbers<[1], [0], [0], [1], [0, 0, 1, 1], [], []>} : vector<8x8xf32>, vector<8x8xf32>, vector<8x8xf32> -> vector<8x8xf32>
    %c0_281 = arith.constant 0 : index
    %c8_282 = arith.constant 8 : index
    %662 = vector.load %arg23[%c0_281, %c8_282] : memref<16x32xf32, #tpu.memory_space<vmem>>, vector<8x8xf32>
    tpu.vector_store %arg23[%c0_281, %c8_282], %661 {strides = array<i32>} : memref<16x32xf32, #tpu.memory_space<vmem>>, vector<8x8xf32>,
    %663 = vector.extract_strided_slice %639 {offsets = [8, 0], sizes = [8, 8], strides = [1, 1]} : vector<16x8xf32> to vector<8x8xf32>
    %664 = vector.extract_strided_slice %640 {offsets = [8, 0], sizes = [8, 8], strides = [1, 1]} : vector<16x8xf32> to vector<8x8xf32>
    %665 = vector.extract_strided_slice %641 {offsets = [8, 0], sizes = [8, 8], strides = [1, 1]} : vector<16x8xf32> to vector<8x8xf32>
    %666 = tpu.transpose %664, [1, 0] : vector<8x8xf32> -> vector<8x8xf32>
    %cst_283 = arith.constant dense<0.000000e+00> : vector<8x8xf32>
    %667 = tpu.matmul %663, %666, %cst_283 {dimension_numbers = #tpu.dot_dimension_numbers<[1], [0], [0], [1], [0, 0, 1, 1], [], []>} : vector<8x8xf32>, vector<8x8xf32>, vector<8x8xf32> -> vector<8x8xf32>
    %cst_284 = arith.constant dense<0xFF800000> : vector<8xf32>
    %668 = vector.multi_reduction <maximumf>, %667, %cst_284 [1] : vector<8x8xf32> to vector<8xf32>
    %669 = vector.shape_cast %668 : vector<8xf32> to vector<8x1xf32>
    %670 = vector.broadcast %669 : vector<8x1xf32> to vector<8x8xf32>
    %671 = arith.subf %667, %670 : vector<8x8xf32>
    %672 = math.exp %671 : vector<8x8xf32>
    %cst_285 = arith.constant dense<0.000000e+00> : vector<8xf32>
    %673 = vector.multi_reduction <add>, %672, %cst_285 [1] : vector<8x8xf32> to vector<8xf32>
    %674 = vector.shape_cast %673 : vector<8xf32> to vector<8x1xf32>
    %675 = tpu.reciprocal %674 {approx = true} : vector<8x1xf32> -> vector<8x1xf32>
    %676 = arith.mulf %674, %675 : vector<8x1xf32>
    %cst_286 = arith.constant 2.000000e+00 : f32
    %677 = vector.broadcast %cst_286 : f32 to vector<8x1xf32>
    %678 = arith.subf %677, %676 : vector<8x1xf32>
    %679 = arith.mulf %675, %678 : vector<8x1xf32>
    %680 = vector.broadcast %679 : vector<8x1xf32> to vector<8x8xf32>
    %681 = arith.mulf %672, %680 : vector<8x8xf32>
    %cst_287 = arith.constant dense<0.000000e+00> : vector<8x8xf32>
    %682 = tpu.matmul %681, %665, %cst_287 {dimension_numbers = #tpu.dot_dimension_numbers<[1], [0], [0], [1], [0, 0, 1, 1], [], []>} : vector<8x8xf32>, vector<8x8xf32>, vector<8x8xf32> -> vector<8x8xf32>
    %c8_288 = arith.constant 8 : index
    %c8_289 = arith.constant 8 : index
    %683 = vector.load %arg23[%c8_288, %c8_289] : memref<16x32xf32, #tpu.memory_space<vmem>>, vector<8x8xf32>
    tpu.vector_store %arg23[%c8_288, %c8_289], %682 {strides = array<i32>} : memref<16x32xf32, #tpu.memory_space<vmem>>, vector<8x8xf32>,
    %684 = vector.extract_strided_slice %587 {offsets = [0, 16], sizes = [16, 8], strides = [1, 1]} : vector<16x32xf32> to vector<16x8xf32>
    %cst_290 = arith.constant 0.353553385 : f32
    %685 = vector.broadcast %cst_290 : f32 to vector<16x8xf32>
    %686 = arith.mulf %684, %685 : vector<16x8xf32>
    %687 = vector.extract_strided_slice %588 {offsets = [0, 16], sizes = [16, 8], strides = [1, 1]} : vector<16x32xf32> to vector<16x8xf32>
    %688 = vector.extract_strided_slice %589 {offsets = [0, 16], sizes = [16, 8], strides = [1, 1]} : vector<16x32xf32> to vector<16x8xf32>
    %689 = vector.extract_strided_slice %686 {offsets = [0, 0], sizes = [8, 8], strides = [1, 1]} : vector<16x8xf32> to vector<8x8xf32>
    %690 = vector.extract_strided_slice %687 {offsets = [0, 0], sizes = [8, 8], strides = [1, 1]} : vector<16x8xf32> to vector<8x8xf32>
    %691 = vector.extract_strided_slice %688 {offsets = [0, 0], sizes = [8, 8], strides = [1, 1]} : vector<16x8xf32> to vector<8x8xf32>
    %692 = tpu.transpose %690, [1, 0] : vector<8x8xf32> -> vector<8x8xf32>
    %cst_291 = arith.constant dense<0.000000e+00> : vector<8x8xf32>
    %693 = tpu.matmul %689, %692, %cst_291 {dimension_numbers = #tpu.dot_dimension_numbers<[1], [0], [0], [1], [0, 0, 1, 1], [], []>} : vector<8x8xf32>, vector<8x8xf32>, vector<8x8xf32> -> vector<8x8xf32>
    %cst_292 = arith.constant dense<0xFF800000> : vector<8xf32>
    %694 = vector.multi_reduction <maximumf>, %693, %cst_292 [1] : vector<8x8xf32> to vector<8xf32>
    %695 = vector.shape_cast %694 : vector<8xf32> to vector<8x1xf32>
    %696 = vector.broadcast %695 : vector<8x1xf32> to vector<8x8xf32>
    %697 = arith.subf %693, %696 : vector<8x8xf32>
    %698 = math.exp %697 : vector<8x8xf32>
    %cst_293 = arith.constant dense<0.000000e+00> : vector<8xf32>
    %699 = vector.multi_reduction <add>, %698, %cst_293 [1] : vector<8x8xf32> to vector<8xf32>
    %700 = vector.shape_cast %699 : vector<8xf32> to vector<8x1xf32>
    %701 = tpu.reciprocal %700 {approx = true} : vector<8x1xf32> -> vector<8x1xf32>
    %702 = arith.mulf %700, %701 : vector<8x1xf32>
    %cst_294 = arith.constant 2.000000e+00 : f32
    %703 = vector.broadcast %cst_294 : f32 to vector<8x1xf32>
    %704 = arith.subf %703, %702 : vector<8x1xf32>
    %705 = arith.mulf %701, %704 : vector<8x1xf32>
    %706 = vector.broadcast %705 : vector<8x1xf32> to vector<8x8xf32>
    %707 = arith.mulf %698, %706 : vector<8x8xf32>
    %cst_295 = arith.constant dense<0.000000e+00> : vector<8x8xf32>
    %708 = tpu.matmul %707, %691, %cst_295 {dimension_numbers = #tpu.dot_dimension_numbers<[1], [0], [0], [1], [0, 0, 1, 1], [], []>} : vector<8x8xf32>, vector<8x8xf32>, vector<8x8xf32> -> vector<8x8xf32>
    %c0_296 = arith.constant 0 : index
    %c16_297 = arith.constant 16 : index
    %709 = vector.load %arg23[%c0_296, %c16_297] : memref<16x32xf32, #tpu.memory_space<vmem>>, vector<8x8xf32>
    tpu.vector_store %arg23[%c0_296, %c16_297], %708 {strides = array<i32>} : memref<16x32xf32, #tpu.memory_space<vmem>>, vector<8x8xf32>,
    %710 = vector.extract_strided_slice %686 {offsets = [8, 0], sizes = [8, 8], strides = [1, 1]} : vector<16x8xf32> to vector<8x8xf32>
    %711 = vector.extract_strided_slice %687 {offsets = [8, 0], sizes = [8, 8], strides = [1, 1]} : vector<16x8xf32> to vector<8x8xf32>
    %712 = vector.extract_strided_slice %688 {offsets = [8, 0], sizes = [8, 8], strides = [1, 1]} : vector<16x8xf32> to vector<8x8xf32>
    %713 = tpu.transpose %711, [1, 0] : vector<8x8xf32> -> vector<8x8xf32>
    %cst_298 = arith.constant dense<0.000000e+00> : vector<8x8xf32>
    %714 = tpu.matmul %710, %713, %cst_298 {dimension_numbers = #tpu.dot_dimension_numbers<[1], [0], [0], [1], [0, 0, 1, 1], [], []>} : vector<8x8xf32>, vector<8x8xf32>, vector<8x8xf32> -> vector<8x8xf32>
    %cst_299 = arith.constant dense<0xFF800000> : vector<8xf32>
    %715 = vector.multi_reduction <maximumf>, %714, %cst_299 [1] : vector<8x8xf32> to vector<8xf32>
    %716 = vector.shape_cast %715 : vector<8xf32> to vector<8x1xf32>
    %717 = vector.broadcast %716 : vector<8x1xf32> to vector<8x8xf32>
    %718 = arith.subf %714, %717 : vector<8x8xf32>
    %719 = math.exp %718 : vector<8x8xf32>
    %cst_300 = arith.constant dense<0.000000e+00> : vector<8xf32>
    %720 = vector.multi_reduction <add>, %719, %cst_300 [1] : vector<8x8xf32> to vector<8xf32>
    %721 = vector.shape_cast %720 : vector<8xf32> to vector<8x1xf32>
    %722 = tpu.reciprocal %721 {approx = true} : vector<8x1xf32> -> vector<8x1xf32>
    %723 = arith.mulf %721, %722 : vector<8x1xf32>
    %cst_301 = arith.constant 2.000000e+00 : f32
    %724 = vector.broadcast %cst_301 : f32 to vector<8x1xf32>
    %725 = arith.subf %724, %723 : vector<8x1xf32>
    %726 = arith.mulf %722, %725 : vector<8x1xf32>
    %727 = vector.broadcast %726 : vector<8x1xf32> to vector<8x8xf32>
    %728 = arith.mulf %719, %727 : vector<8x8xf32>
    %cst_302 = arith.constant dense<0.000000e+00> : vector<8x8xf32>
    %729 = tpu.matmul %728, %712, %cst_302 {dimension_numbers = #tpu.dot_dimension_numbers<[1], [0], [0], [1], [0, 0, 1, 1], [], []>} : vector<8x8xf32>, vector<8x8xf32>, vector<8x8xf32> -> vector<8x8xf32>
    %c8_303 = arith.constant 8 : index
    %c16_304 = arith.constant 16 : index
    %730 = vector.load %arg23[%c8_303, %c16_304] : memref<16x32xf32, #tpu.memory_space<vmem>>, vector<8x8xf32>
    tpu.vector_store %arg23[%c8_303, %c16_304], %729 {strides = array<i32>} : memref<16x32xf32, #tpu.memory_space<vmem>>, vector<8x8xf32>,
    %731 = vector.extract_strided_slice %587 {offsets = [0, 24], sizes = [16, 8], strides = [1, 1]} : vector<16x32xf32> to vector<16x8xf32>
    %cst_305 = arith.constant 0.353553385 : f32
    %732 = vector.broadcast %cst_305 : f32 to vector<16x8xf32>
    %733 = arith.mulf %731, %732 : vector<16x8xf32>
    %734 = vector.extract_strided_slice %588 {offsets = [0, 24], sizes = [16, 8], strides = [1, 1]} : vector<16x32xf32> to vector<16x8xf32>
    %735 = vector.extract_strided_slice %589 {offsets = [0, 24], sizes = [16, 8], strides = [1, 1]} : vector<16x32xf32> to vector<16x8xf32>
    %736 = vector.extract_strided_slice %733 {offsets = [0, 0], sizes = [8, 8], strides = [1, 1]} : vector<16x8xf32> to vector<8x8xf32>
    %737 = vector.extract_strided_slice %734 {offsets = [0, 0], sizes = [8, 8], strides = [1, 1]} : vector<16x8xf32> to vector<8x8xf32>
    %738 = vector.extract_strided_slice %735 {offsets = [0, 0], sizes = [8, 8], strides = [1, 1]} : vector<16x8xf32> to vector<8x8xf32>
    %739 = tpu.transpose %737, [1, 0] : vector<8x8xf32> -> vector<8x8xf32>
    %cst_306 = arith.constant dense<0.000000e+00> : vector<8x8xf32>
    %740 = tpu.matmul %736, %739, %cst_306 {dimension_numbers = #tpu.dot_dimension_numbers<[1], [0], [0], [1], [0, 0, 1, 1], [], []>} : vector<8x8xf32>, vector<8x8xf32>, vector<8x8xf32> -> vector<8x8xf32>
    %cst_307 = arith.constant dense<0xFF800000> : vector<8xf32>
    %741 = vector.multi_reduction <maximumf>, %740, %cst_307 [1] : vector<8x8xf32> to vector<8xf32>
    %742 = vector.shape_cast %741 : vector<8xf32> to vector<8x1xf32>
    %743 = vector.broadcast %742 : vector<8x1xf32> to vector<8x8xf32>
    %744 = arith.subf %740, %743 : vector<8x8xf32>
    %745 = math.exp %744 : vector<8x8xf32>
    %cst_308 = arith.constant dense<0.000000e+00> : vector<8xf32>
    %746 = vector.multi_reduction <add>, %745, %cst_308 [1] : vector<8x8xf32> to vector<8xf32>
    %747 = vector.shape_cast %746 : vector<8xf32> to vector<8x1xf32>
    %748 = tpu.reciprocal %747 {approx = true} : vector<8x1xf32> -> vector<8x1xf32>
    %749 = arith.mulf %747, %748 : vector<8x1xf32>
    %cst_309 = arith.constant 2.000000e+00 : f32
    %750 = vector.broadcast %cst_309 : f32 to vector<8x1xf32>
    %751 = arith.subf %750, %749 : vector<8x1xf32>
    %752 = arith.mulf %748, %751 : vector<8x1xf32>
    %753 = vector.broadcast %752 : vector<8x1xf32> to vector<8x8xf32>
    %754 = arith.mulf %745, %753 : vector<8x8xf32>
    %cst_310 = arith.constant dense<0.000000e+00> : vector<8x8xf32>
    %755 = tpu.matmul %754, %738, %cst_310 {dimension_numbers = #tpu.dot_dimension_numbers<[1], [0], [0], [1], [0, 0, 1, 1], [], []>} : vector<8x8xf32>, vector<8x8xf32>, vector<8x8xf32> -> vector<8x8xf32>
    %c0_311 = arith.constant 0 : index
    %c24_312 = arith.constant 24 : index
    %756 = vector.load %arg23[%c0_311, %c24_312] : memref<16x32xf32, #tpu.memory_space<vmem>>, vector<8x8xf32>
    tpu.vector_store %arg23[%c0_311, %c24_312], %755 {strides = array<i32>} : memref<16x32xf32, #tpu.memory_space<vmem>>, vector<8x8xf32>,
    %757 = vector.extract_strided_slice %733 {offsets = [8, 0], sizes = [8, 8], strides = [1, 1]} : vector<16x8xf32> to vector<8x8xf32>
    %758 = vector.extract_strided_slice %734 {offsets = [8, 0], sizes = [8, 8], strides = [1, 1]} : vector<16x8xf32> to vector<8x8xf32>
    %759 = vector.extract_strided_slice %735 {offsets = [8, 0], sizes = [8, 8], strides = [1, 1]} : vector<16x8xf32> to vector<8x8xf32>
    %760 = tpu.transpose %758, [1, 0] : vector<8x8xf32> -> vector<8x8xf32>
    %cst_313 = arith.constant dense<0.000000e+00> : vector<8x8xf32>
    %761 = tpu.matmul %757, %760, %cst_313 {dimension_numbers = #tpu.dot_dimension_numbers<[1], [0], [0], [1], [0, 0, 1, 1], [], []>} : vector<8x8xf32>, vector<8x8xf32>, vector<8x8xf32> -> vector<8x8xf32>
    %cst_314 = arith.constant dense<0xFF800000> : vector<8xf32>
    %762 = vector.multi_reduction <maximumf>, %761, %cst_314 [1] : vector<8x8xf32> to vector<8xf32>
    %763 = vector.shape_cast %762 : vector<8xf32> to vector<8x1xf32>
    %764 = vector.broadcast %763 : vector<8x1xf32> to vector<8x8xf32>
    %765 = arith.subf %761, %764 : vector<8x8xf32>
    %766 = math.exp %765 : vector<8x8xf32>
    %cst_315 = arith.constant dense<0.000000e+00> : vector<8xf32>
    %767 = vector.multi_reduction <add>, %766, %cst_315 [1] : vector<8x8xf32> to vector<8xf32>
    %768 = vector.shape_cast %767 : vector<8xf32> to vector<8x1xf32>
    %769 = tpu.reciprocal %768 {approx = true} : vector<8x1xf32> -> vector<8x1xf32>
    %770 = arith.mulf %768, %769 : vector<8x1xf32>
    %cst_316 = arith.constant 2.000000e+00 : f32
    %771 = vector.broadcast %cst_316 : f32 to vector<8x1xf32>
    %772 = arith.subf %771, %770 : vector<8x1xf32>
    %773 = arith.mulf %769, %772 : vector<8x1xf32>
    %774 = vector.broadcast %773 : vector<8x1xf32> to vector<8x8xf32>
    %775 = arith.mulf %766, %774 : vector<8x8xf32>
    %cst_317 = arith.constant dense<0.000000e+00> : vector<8x8xf32>
    %776 = tpu.matmul %775, %759, %cst_317 {dimension_numbers = #tpu.dot_dimension_numbers<[1], [0], [0], [1], [0, 0, 1, 1], [], []>} : vector<8x8xf32>, vector<8x8xf32>, vector<8x8xf32> -> vector<8x8xf32>
    %c8_318 = arith.constant 8 : index
    %c24_319 = arith.constant 24 : index
    %777 = vector.load %arg23[%c8_318, %c24_319] : memref<16x32xf32, #tpu.memory_space<vmem>>, vector<8x8xf32>
    tpu.vector_store %arg23[%c8_318, %c24_319], %776 {strides = array<i32>} : memref<16x32xf32, #tpu.memory_space<vmem>>, vector<8x8xf32>,
    %c0_320 = arith.constant 0 : index
    %c0_321 = arith.constant 0 : index
    %778 = vector.load %arg23[%c0_320, %c0_321] : memref<16x32xf32, #tpu.memory_space<vmem>>, vector<16x32xf32>
    %c0_322 = arith.constant 0 : index
    %c0_323 = arith.constant 0 : index
    %c0_324 = arith.constant 0 : index
    %779 = vector.load %arg12[%c0_322, %c0_323, %c0_324] : memref<2x32x32xf32, #tpu.memory_space<vmem>>, vector<1x32x32xf32>
    %780 = vector.shape_cast %779 : vector<1x32x32xf32> to vector<32x32xf32>
    %cst_325 = arith.constant dense<0.000000e+00> : vector<16x32xf32>
    %781 = tpu.matmul %778, %780, %cst_325 {dimension_numbers = #tpu.dot_dimension_numbers<[1], [0], [0], [1], [0, 0, 1, 1], [], []>} : vector<16x32xf32>, vector<32x32xf32>, vector<16x32xf32> -> vector<16x32xf32>
    %c0_326 = arith.constant 0 : index
    %c0_327 = arith.constant 0 : index
    %c0_328 = arith.constant 0 : index
    %782 = vector.load %arg13[%c0_326, %c0_327, %c0_328] : memref<2x1x32xf32, #tpu.memory_space<vmem>>, vector<1x1x32xf32>
    %783 = vector.shape_cast %782 : vector<1x1x32xf32> to vector<1x32xf32>
    %784 = vector.broadcast %783 : vector<1x32xf32> to vector<16x32xf32>
    %785 = arith.addf %781, %784 : vector<16x32xf32>
    %786 = arith.addf %579, %785 : vector<16x32xf32>
    %c0_329 = arith.constant 0 : index
    %c0_330 = arith.constant 0 : index
    %c0_331 = arith.constant 0 : index
    %787 = vector.load %arg14[%c0_329, %c0_330, %c0_331] : memref<2x1x32xf32, #tpu.memory_space<vmem>>, vector<1x1x32xf32>
    %788 = vector.shape_cast %787 : vector<1x1x32xf32> to vector<1x32xf32>
    %c0_332 = arith.constant 0 : index
    %c0_333 = arith.constant 0 : index
    %c0_334 = arith.constant 0 : index
    %789 = vector.load %arg15[%c0_332, %c0_333, %c0_334] : memref<2x1x32xf32, #tpu.memory_space<vmem>>, vector<1x1x32xf32>
    %790 = vector.shape_cast %789 : vector<1x1x32xf32> to vector<1x32xf32>
    %cst_335 = arith.constant dense<0.000000e+00> : vector<16xf32>
    %791 = vector.multi_reduction <add>, %786, %cst_335 [1] : vector<16x32xf32> to vector<16xf32>
    %792 = vector.shape_cast %791 : vector<16xf32> to vector<16x1xf32>
    %cst_336 = arith.constant 3.200000e+01 : f32
    %793 = vector.broadcast %cst_336 : f32 to vector<16x1xf32>
    %794 = arith.divf %792, %793 : vector<16x1xf32>
    %795 = vector.broadcast %794 : vector<16x1xf32> to vector<16x32xf32>
    %796 = arith.subf %786, %795 : vector<16x32xf32>
    %797 = arith.mulf %796, %796 : vector<16x32xf32>
    %cst_337 = arith.constant dense<0.000000e+00> : vector<16xf32>
    %798 = vector.multi_reduction <add>, %797, %cst_337 [1] : vector<16x32xf32> to vector<16xf32>
    %799 = vector.shape_cast %798 : vector<16xf32> to vector<16x1xf32>
    %cst_338 = arith.constant 3.200000e+01 : f32
    %800 = vector.broadcast %cst_338 : f32 to vector<16x1xf32>
    %801 = arith.divf %799, %800 : vector<16x1xf32>
    %cst_339 = arith.constant 9.99999974E-6 : f32
    %802 = vector.broadcast %cst_339 : f32 to vector<16x1xf32>
    %803 = arith.addf %801, %802 : vector<16x1xf32>
    %804 = math.rsqrt %803 : vector<16x1xf32>
    %805 = vector.broadcast %804 : vector<16x1xf32> to vector<16x32xf32>
    %806 = arith.mulf %796, %805 : vector<16x32xf32>
    %807 = vector.broadcast %788 : vector<1x32xf32> to vector<16x32xf32>
    %808 = arith.mulf %806, %807 : vector<16x32xf32>
    %809 = vector.broadcast %790 : vector<1x32xf32> to vector<16x32xf32>
    %810 = arith.addf %808, %809 : vector<16x32xf32>
    %c0_340 = arith.constant 0 : index
    %c0_341 = arith.constant 0 : index
    %c0_342 = arith.constant 0 : index
    %811 = vector.load %arg16[%c0_340, %c0_341, %c0_342] : memref<2x32x128xf32, #tpu.memory_space<vmem>>, vector<1x32x128xf32>
    %812 = vector.shape_cast %811 : vector<1x32x128xf32> to vector<32x128xf32>
    %cst_343 = arith.constant dense<0.000000e+00> : vector<16x128xf32>
    %813 = tpu.matmul %810, %812, %cst_343 {dimension_numbers = #tpu.dot_dimension_numbers<[1], [0], [0], [1], [0, 0, 1, 1], [], []>} : vector<16x32xf32>, vector<32x128xf32>, vector<16x128xf32> -> vector<16x128xf32>
    %c0_344 = arith.constant 0 : index
    %c0_345 = arith.constant 0 : index
    %c0_346 = arith.constant 0 : index
    %814 = vector.load %arg17[%c0_344, %c0_345, %c0_346] : memref<2x1x128xf32, #tpu.memory_space<vmem>>, vector<1x1x128xf32>
    %815 = vector.shape_cast %814 : vector<1x1x128xf32> to vector<1x128xf32>
    %816 = vector.broadcast %815 : vector<1x128xf32> to vector<16x128xf32>
    %817 = arith.addf %813, %816 : vector<16x128xf32>
    %cst_347 = arith.constant 0.000000e+00 : f32
    %818 = vector.broadcast %cst_347 : f32 to vector<16x128xf32>
    %819 = arith.maximumf %817, %818 : vector<16x128xf32>
    %c0_348 = arith.constant 0 : index
    %c0_349 = arith.constant 0 : index
    %c0_350 = arith.constant 0 : index
    %820 = vector.load %arg18[%c0_348, %c0_349, %c0_350] : memref<2x128x32xf32, #tpu.memory_space<vmem>>, vector<1x128x32xf32>
    %821 = vector.shape_cast %820 : vector<1x128x32xf32> to vector<128x32xf32>
    %cst_351 = arith.constant dense<0.000000e+00> : vector<16x32xf32>
    %822 = tpu.matmul %819, %821, %cst_351 {dimension_numbers = #tpu.dot_dimension_numbers<[1], [0], [0], [1], [0, 0, 1, 1], [], []>} : vector<16x128xf32>, vector<128x32xf32>, vector<16x32xf32> -> vector<16x32xf32>
    %c0_352 = arith.constant 0 : index
    %c0_353 = arith.constant 0 : index
    %c0_354 = arith.constant 0 : index
    %823 = vector.load %arg19[%c0_352, %c0_353, %c0_354] : memref<2x1x32xf32, #tpu.memory_space<vmem>>, vector<1x1x32xf32>
    %824 = vector.shape_cast %823 : vector<1x1x32xf32> to vector<1x32xf32>
    %825 = vector.broadcast %824 : vector<1x32xf32> to vector<16x32xf32>
    %826 = arith.addf %822, %825 : vector<16x32xf32>
    %827 = arith.addf %810, %826 : vector<16x32xf32>
    %c0_355 = arith.constant 0 : index
    %c0_356 = arith.constant 0 : index
    %c0_357 = arith.constant 0 : index
    %828 = vector.load %arg20[%c0_355, %c0_356, %c0_357] : memref<2x1x32xf32, #tpu.memory_space<vmem>>, vector<1x1x32xf32>
    %829 = vector.shape_cast %828 : vector<1x1x32xf32> to vector<1x32xf32>
    %c0_358 = arith.constant 0 : index
    %c0_359 = arith.constant 0 : index
    %c0_360 = arith.constant 0 : index
    %830 = vector.load %arg21[%c0_358, %c0_359, %c0_360] : memref<2x1x32xf32, #tpu.memory_space<vmem>>, vector<1x1x32xf32>
    %831 = vector.shape_cast %830 : vector<1x1x32xf32> to vector<1x32xf32>
    %cst_361 = arith.constant dense<0.000000e+00> : vector<16xf32>
    %832 = vector.multi_reduction <add>, %827, %cst_361 [1] : vector<16x32xf32> to vector<16xf32>
    %833 = vector.shape_cast %832 : vector<16xf32> to vector<16x1xf32>
    %cst_362 = arith.constant 3.200000e+01 : f32
    %834 = vector.broadcast %cst_362 : f32 to vector<16x1xf32>
    %835 = arith.divf %833, %834 : vector<16x1xf32>
    %836 = vector.broadcast %835 : vector<16x1xf32> to vector<16x32xf32>
    %837 = arith.subf %827, %836 : vector<16x32xf32>
    %838 = arith.mulf %837, %837 : vector<16x32xf32>
    %cst_363 = arith.constant dense<0.000000e+00> : vector<16xf32>
    %839 = vector.multi_reduction <add>, %838, %cst_363 [1] : vector<16x32xf32> to vector<16xf32>
    %840 = vector.shape_cast %839 : vector<16xf32> to vector<16x1xf32>
    %cst_364 = arith.constant 3.200000e+01 : f32
    %841 = vector.broadcast %cst_364 : f32 to vector<16x1xf32>
    %842 = arith.divf %840, %841 : vector<16x1xf32>
    %cst_365 = arith.constant 9.99999974E-6 : f32
    %843 = vector.broadcast %cst_365 : f32 to vector<16x1xf32>
    %844 = arith.addf %842, %843 : vector<16x1xf32>
    %845 = math.rsqrt %844 : vector<16x1xf32>
    %846 = vector.broadcast %845 : vector<16x1xf32> to vector<16x32xf32>
    %847 = arith.mulf %837, %846 : vector<16x32xf32>
    %848 = vector.broadcast %829 : vector<1x32xf32> to vector<16x32xf32>
    %849 = arith.mulf %847, %848 : vector<16x32xf32>
    %850 = vector.broadcast %831 : vector<1x32xf32> to vector<16x32xf32>
    %851 = arith.addf %849, %850 : vector<16x32xf32>
    %c1_366 = arith.constant 1 : index
    %c0_367 = arith.constant 0 : index
    %c0_368 = arith.constant 0 : index
    %852 = vector.load %arg10[%c1_366, %c0_367, %c0_368] : memref<2x32x128xf32, #tpu.memory_space<vmem>>, vector<1x32x128xf32>
    %853 = vector.shape_cast %852 : vector<1x32x128xf32> to vector<32x128xf32>
    %cst_369 = arith.constant dense<0.000000e+00> : vector<16x128xf32>
    %854 = tpu.matmul %851, %853, %cst_369 {dimension_numbers = #tpu.dot_dimension_numbers<[1], [0], [0], [1], [0, 0, 1, 1], [], []>} : vector<16x32xf32>, vector<32x128xf32>, vector<16x128xf32> -> vector<16x128xf32>
    %c1_370 = arith.constant 1 : index
    %c0_371 = arith.constant 0 : index
    %c0_372 = arith.constant 0 : index
    %855 = vector.load %arg11[%c1_370, %c0_371, %c0_372] : memref<2x1x128xf32, #tpu.memory_space<vmem>>, vector<1x1x128xf32>
    %856 = vector.shape_cast %855 : vector<1x1x128xf32> to vector<1x128xf32>
    %857 = vector.broadcast %856 : vector<1x128xf32> to vector<16x128xf32>
    %858 = arith.addf %854, %857 : vector<16x128xf32>
    %859 = vector.extract_strided_slice %858 {offsets = [0, 0], sizes = [16, 32], strides = [1, 1]} : vector<16x128xf32> to vector<16x32xf32>
    %860 = vector.extract_strided_slice %858 {offsets = [0, 32], sizes = [16, 32], strides = [1, 1]} : vector<16x128xf32> to vector<16x32xf32>
    %861 = vector.extract_strided_slice %858 {offsets = [0, 64], sizes = [16, 32], strides = [1, 1]} : vector<16x128xf32> to vector<16x32xf32>
    %862 = vector.extract_strided_slice %859 {offsets = [0, 0], sizes = [16, 8], strides = [1, 1]} : vector<16x32xf32> to vector<16x8xf32>
    %cst_373 = arith.constant 0.353553385 : f32
    %863 = vector.broadcast %cst_373 : f32 to vector<16x8xf32>
    %864 = arith.mulf %862, %863 : vector<16x8xf32>
    %865 = vector.extract_strided_slice %860 {offsets = [0, 0], sizes = [16, 8], strides = [1, 1]} : vector<16x32xf32> to vector<16x8xf32>
    %866 = vector.extract_strided_slice %861 {offsets = [0, 0], sizes = [16, 8], strides = [1, 1]} : vector<16x32xf32> to vector<16x8xf32>
    %867 = vector.extract_strided_slice %864 {offsets = [0, 0], sizes = [8, 8], strides = [1, 1]} : vector<16x8xf32> to vector<8x8xf32>
    %868 = vector.extract_strided_slice %865 {offsets = [0, 0], sizes = [8, 8], strides = [1, 1]} : vector<16x8xf32> to vector<8x8xf32>
    %869 = vector.extract_strided_slice %866 {offsets = [0, 0], sizes = [8, 8], strides = [1, 1]} : vector<16x8xf32> to vector<8x8xf32>
    %870 = tpu.transpose %868, [1, 0] : vector<8x8xf32> -> vector<8x8xf32>
    %cst_374 = arith.constant dense<0.000000e+00> : vector<8x8xf32>
    %871 = tpu.matmul %867, %870, %cst_374 {dimension_numbers = #tpu.dot_dimension_numbers<[1], [0], [0], [1], [0, 0, 1, 1], [], []>} : vector<8x8xf32>, vector<8x8xf32>, vector<8x8xf32> -> vector<8x8xf32>
    %cst_375 = arith.constant dense<0xFF800000> : vector<8xf32>
    %872 = vector.multi_reduction <maximumf>, %871, %cst_375 [1] : vector<8x8xf32> to vector<8xf32>
    %873 = vector.shape_cast %872 : vector<8xf32> to vector<8x1xf32>
    %874 = vector.broadcast %873 : vector<8x1xf32> to vector<8x8xf32>
    %875 = arith.subf %871, %874 : vector<8x8xf32>
    %876 = math.exp %875 : vector<8x8xf32>
    %cst_376 = arith.constant dense<0.000000e+00> : vector<8xf32>
    %877 = vector.multi_reduction <add>, %876, %cst_376 [1] : vector<8x8xf32> to vector<8xf32>
    %878 = vector.shape_cast %877 : vector<8xf32> to vector<8x1xf32>
    %879 = tpu.reciprocal %878 {approx = true} : vector<8x1xf32> -> vector<8x1xf32>
    %880 = arith.mulf %878, %879 : vector<8x1xf32>
    %cst_377 = arith.constant 2.000000e+00 : f32
    %881 = vector.broadcast %cst_377 : f32 to vector<8x1xf32>
    %882 = arith.subf %881, %880 : vector<8x1xf32>
    %883 = arith.mulf %879, %882 : vector<8x1xf32>
    %884 = vector.broadcast %883 : vector<8x1xf32> to vector<8x8xf32>
    %885 = arith.mulf %876, %884 : vector<8x8xf32>
    %cst_378 = arith.constant dense<0.000000e+00> : vector<8x8xf32>
    %886 = tpu.matmul %885, %869, %cst_378 {dimension_numbers = #tpu.dot_dimension_numbers<[1], [0], [0], [1], [0, 0, 1, 1], [], []>} : vector<8x8xf32>, vector<8x8xf32>, vector<8x8xf32> -> vector<8x8xf32>
    %c0_379 = arith.constant 0 : index
    %c0_380 = arith.constant 0 : index
    %887 = vector.load %arg23[%c0_379, %c0_380] : memref<16x32xf32, #tpu.memory_space<vmem>>, vector<8x8xf32>
    tpu.vector_store %arg23[%c0_379, %c0_380], %886 {strides = array<i32>} : memref<16x32xf32, #tpu.memory_space<vmem>>, vector<8x8xf32>,
    %888 = vector.extract_strided_slice %864 {offsets = [8, 0], sizes = [8, 8], strides = [1, 1]} : vector<16x8xf32> to vector<8x8xf32>
    %889 = vector.extract_strided_slice %865 {offsets = [8, 0], sizes = [8, 8], strides = [1, 1]} : vector<16x8xf32> to vector<8x8xf32>
    %890 = vector.extract_strided_slice %866 {offsets = [8, 0], sizes = [8, 8], strides = [1, 1]} : vector<16x8xf32> to vector<8x8xf32>
    %891 = tpu.transpose %889, [1, 0] : vector<8x8xf32> -> vector<8x8xf32>
    %cst_381 = arith.constant dense<0.000000e+00> : vector<8x8xf32>
    %892 = tpu.matmul %888, %891, %cst_381 {dimension_numbers = #tpu.dot_dimension_numbers<[1], [0], [0], [1], [0, 0, 1, 1], [], []>} : vector<8x8xf32>, vector<8x8xf32>, vector<8x8xf32> -> vector<8x8xf32>
    %cst_382 = arith.constant dense<0xFF800000> : vector<8xf32>
    %893 = vector.multi_reduction <maximumf>, %892, %cst_382 [1] : vector<8x8xf32> to vector<8xf32>
    %894 = vector.shape_cast %893 : vector<8xf32> to vector<8x1xf32>
    %895 = vector.broadcast %894 : vector<8x1xf32> to vector<8x8xf32>
    %896 = arith.subf %892, %895 : vector<8x8xf32>
    %897 = math.exp %896 : vector<8x8xf32>
    %cst_383 = arith.constant dense<0.000000e+00> : vector<8xf32>
    %898 = vector.multi_reduction <add>, %897, %cst_383 [1] : vector<8x8xf32> to vector<8xf32>
    %899 = vector.shape_cast %898 : vector<8xf32> to vector<8x1xf32>
    %900 = tpu.reciprocal %899 {approx = true} : vector<8x1xf32> -> vector<8x1xf32>
    %901 = arith.mulf %899, %900 : vector<8x1xf32>
    %cst_384 = arith.constant 2.000000e+00 : f32
    %902 = vector.broadcast %cst_384 : f32 to vector<8x1xf32>
    %903 = arith.subf %902, %901 : vector<8x1xf32>
    %904 = arith.mulf %900, %903 : vector<8x1xf32>
    %905 = vector.broadcast %904 : vector<8x1xf32> to vector<8x8xf32>
    %906 = arith.mulf %897, %905 : vector<8x8xf32>
    %cst_385 = arith.constant dense<0.000000e+00> : vector<8x8xf32>
    %907 = tpu.matmul %906, %890, %cst_385 {dimension_numbers = #tpu.dot_dimension_numbers<[1], [0], [0], [1], [0, 0, 1, 1], [], []>} : vector<8x8xf32>, vector<8x8xf32>, vector<8x8xf32> -> vector<8x8xf32>
    %c8_386 = arith.constant 8 : index
    %c0_387 = arith.constant 0 : index
    %908 = vector.load %arg23[%c8_386, %c0_387] : memref<16x32xf32, #tpu.memory_space<vmem>>, vector<8x8xf32>
    tpu.vector_store %arg23[%c8_386, %c0_387], %907 {strides = array<i32>} : memref<16x32xf32, #tpu.memory_space<vmem>>, vector<8x8xf32>,
    %909 = vector.extract_strided_slice %859 {offsets = [0, 8], sizes = [16, 8], strides = [1, 1]} : vector<16x32xf32> to vector<16x8xf32>
    %cst_388 = arith.constant 0.353553385 : f32
    %910 = vector.broadcast %cst_388 : f32 to vector<16x8xf32>
    %911 = arith.mulf %909, %910 : vector<16x8xf32>
    %912 = vector.extract_strided_slice %860 {offsets = [0, 8], sizes = [16, 8], strides = [1, 1]} : vector<16x32xf32> to vector<16x8xf32>
    %913 = vector.extract_strided_slice %861 {offsets = [0, 8], sizes = [16, 8], strides = [1, 1]} : vector<16x32xf32> to vector<16x8xf32>
    %914 = vector.extract_strided_slice %911 {offsets = [0, 0], sizes = [8, 8], strides = [1, 1]} : vector<16x8xf32> to vector<8x8xf32>
    %915 = vector.extract_strided_slice %912 {offsets = [0, 0], sizes = [8, 8], strides = [1, 1]} : vector<16x8xf32> to vector<8x8xf32>
    %916 = vector.extract_strided_slice %913 {offsets = [0, 0], sizes = [8, 8], strides = [1, 1]} : vector<16x8xf32> to vector<8x8xf32>
    %917 = tpu.transpose %915, [1, 0] : vector<8x8xf32> -> vector<8x8xf32>
    %cst_389 = arith.constant dense<0.000000e+00> : vector<8x8xf32>
    %918 = tpu.matmul %914, %917, %cst_389 {dimension_numbers = #tpu.dot_dimension_numbers<[1], [0], [0], [1], [0, 0, 1, 1], [], []>} : vector<8x8xf32>, vector<8x8xf32>, vector<8x8xf32> -> vector<8x8xf32>
    %cst_390 = arith.constant dense<0xFF800000> : vector<8xf32>
    %919 = vector.multi_reduction <maximumf>, %918, %cst_390 [1] : vector<8x8xf32> to vector<8xf32>
    %920 = vector.shape_cast %919 : vector<8xf32> to vector<8x1xf32>
    %921 = vector.broadcast %920 : vector<8x1xf32> to vector<8x8xf32>
    %922 = arith.subf %918, %921 : vector<8x8xf32>
    %923 = math.exp %922 : vector<8x8xf32>
    %cst_391 = arith.constant dense<0.000000e+00> : vector<8xf32>
    %924 = vector.multi_reduction <add>, %923, %cst_391 [1] : vector<8x8xf32> to vector<8xf32>
    %925 = vector.shape_cast %924 : vector<8xf32> to vector<8x1xf32>
    %926 = tpu.reciprocal %925 {approx = true} : vector<8x1xf32> -> vector<8x1xf32>
    %927 = arith.mulf %925, %926 : vector<8x1xf32>
    %cst_392 = arith.constant 2.000000e+00 : f32
    %928 = vector.broadcast %cst_392 : f32 to vector<8x1xf32>
    %929 = arith.subf %928, %927 : vector<8x1xf32>
    %930 = arith.mulf %926, %929 : vector<8x1xf32>
    %931 = vector.broadcast %930 : vector<8x1xf32> to vector<8x8xf32>
    %932 = arith.mulf %923, %931 : vector<8x8xf32>
    %cst_393 = arith.constant dense<0.000000e+00> : vector<8x8xf32>
    %933 = tpu.matmul %932, %916, %cst_393 {dimension_numbers = #tpu.dot_dimension_numbers<[1], [0], [0], [1], [0, 0, 1, 1], [], []>} : vector<8x8xf32>, vector<8x8xf32>, vector<8x8xf32> -> vector<8x8xf32>
    %c0_394 = arith.constant 0 : index
    %c8_395 = arith.constant 8 : index
    %934 = vector.load %arg23[%c0_394, %c8_395] : memref<16x32xf32, #tpu.memory_space<vmem>>, vector<8x8xf32>
    tpu.vector_store %arg23[%c0_394, %c8_395], %933 {strides = array<i32>} : memref<16x32xf32, #tpu.memory_space<vmem>>, vector<8x8xf32>,
    %935 = vector.extract_strided_slice %911 {offsets = [8, 0], sizes = [8, 8], strides = [1, 1]} : vector<16x8xf32> to vector<8x8xf32>
    %936 = vector.extract_strided_slice %912 {offsets = [8, 0], sizes = [8, 8], strides = [1, 1]} : vector<16x8xf32> to vector<8x8xf32>
    %937 = vector.extract_strided_slice %913 {offsets = [8, 0], sizes = [8, 8], strides = [1, 1]} : vector<16x8xf32> to vector<8x8xf32>
    %938 = tpu.transpose %936, [1, 0] : vector<8x8xf32> -> vector<8x8xf32>
    %cst_396 = arith.constant dense<0.000000e+00> : vector<8x8xf32>
    %939 = tpu.matmul %935, %938, %cst_396 {dimension_numbers = #tpu.dot_dimension_numbers<[1], [0], [0], [1], [0, 0, 1, 1], [], []>} : vector<8x8xf32>, vector<8x8xf32>, vector<8x8xf32> -> vector<8x8xf32>
    %cst_397 = arith.constant dense<0xFF800000> : vector<8xf32>
    %940 = vector.multi_reduction <maximumf>, %939, %cst_397 [1] : vector<8x8xf32> to vector<8xf32>
    %941 = vector.shape_cast %940 : vector<8xf32> to vector<8x1xf32>
    %942 = vector.broadcast %941 : vector<8x1xf32> to vector<8x8xf32>
    %943 = arith.subf %939, %942 : vector<8x8xf32>
    %944 = math.exp %943 : vector<8x8xf32>
    %cst_398 = arith.constant dense<0.000000e+00> : vector<8xf32>
    %945 = vector.multi_reduction <add>, %944, %cst_398 [1] : vector<8x8xf32> to vector<8xf32>
    %946 = vector.shape_cast %945 : vector<8xf32> to vector<8x1xf32>
    %947 = tpu.reciprocal %946 {approx = true} : vector<8x1xf32> -> vector<8x1xf32>
    %948 = arith.mulf %946, %947 : vector<8x1xf32>
    %cst_399 = arith.constant 2.000000e+00 : f32
    %949 = vector.broadcast %cst_399 : f32 to vector<8x1xf32>
    %950 = arith.subf %949, %948 : vector<8x1xf32>
    %951 = arith.mulf %947, %950 : vector<8x1xf32>
    %952 = vector.broadcast %951 : vector<8x1xf32> to vector<8x8xf32>
    %953 = arith.mulf %944, %952 : vector<8x8xf32>
    %cst_400 = arith.constant dense<0.000000e+00> : vector<8x8xf32>
    %954 = tpu.matmul %953, %937, %cst_400 {dimension_numbers = #tpu.dot_dimension_numbers<[1], [0], [0], [1], [0, 0, 1, 1], [], []>} : vector<8x8xf32>, vector<8x8xf32>, vector<8x8xf32> -> vector<8x8xf32>
    %c8_401 = arith.constant 8 : index
    %c8_402 = arith.constant 8 : index
    %955 = vector.load %arg23[%c8_401, %c8_402] : memref<16x32xf32, #tpu.memory_space<vmem>>, vector<8x8xf32>
    tpu.vector_store %arg23[%c8_401, %c8_402], %954 {strides = array<i32>} : memref<16x32xf32, #tpu.memory_space<vmem>>, vector<8x8xf32>,
    %956 = vector.extract_strided_slice %859 {offsets = [0, 16], sizes = [16, 8], strides = [1, 1]} : vector<16x32xf32> to vector<16x8xf32>
    %cst_403 = arith.constant 0.353553385 : f32
    %957 = vector.broadcast %cst_403 : f32 to vector<16x8xf32>
    %958 = arith.mulf %956, %957 : vector<16x8xf32>
    %959 = vector.extract_strided_slice %860 {offsets = [0, 16], sizes = [16, 8], strides = [1, 1]} : vector<16x32xf32> to vector<16x8xf32>
    %960 = vector.extract_strided_slice %861 {offsets = [0, 16], sizes = [16, 8], strides = [1, 1]} : vector<16x32xf32> to vector<16x8xf32>
    %961 = vector.extract_strided_slice %958 {offsets = [0, 0], sizes = [8, 8], strides = [1, 1]} : vector<16x8xf32> to vector<8x8xf32>
    %962 = vector.extract_strided_slice %959 {offsets = [0, 0], sizes = [8, 8], strides = [1, 1]} : vector<16x8xf32> to vector<8x8xf32>
    %963 = vector.extract_strided_slice %960 {offsets = [0, 0], sizes = [8, 8], strides = [1, 1]} : vector<16x8xf32> to vector<8x8xf32>
    %964 = tpu.transpose %962, [1, 0] : vector<8x8xf32> -> vector<8x8xf32>
    %cst_404 = arith.constant dense<0.000000e+00> : vector<8x8xf32>
    %965 = tpu.matmul %961, %964, %cst_404 {dimension_numbers = #tpu.dot_dimension_numbers<[1], [0], [0], [1], [0, 0, 1, 1], [], []>} : vector<8x8xf32>, vector<8x8xf32>, vector<8x8xf32> -> vector<8x8xf32>
    %cst_405 = arith.constant dense<0xFF800000> : vector<8xf32>
    %966 = vector.multi_reduction <maximumf>, %965, %cst_405 [1] : vector<8x8xf32> to vector<8xf32>
    %967 = vector.shape_cast %966 : vector<8xf32> to vector<8x1xf32>
    %968 = vector.broadcast %967 : vector<8x1xf32> to vector<8x8xf32>
    %969 = arith.subf %965, %968 : vector<8x8xf32>
    %970 = math.exp %969 : vector<8x8xf32>
    %cst_406 = arith.constant dense<0.000000e+00> : vector<8xf32>
    %971 = vector.multi_reduction <add>, %970, %cst_406 [1] : vector<8x8xf32> to vector<8xf32>
    %972 = vector.shape_cast %971 : vector<8xf32> to vector<8x1xf32>
    %973 = tpu.reciprocal %972 {approx = true} : vector<8x1xf32> -> vector<8x1xf32>
    %974 = arith.mulf %972, %973 : vector<8x1xf32>
    %cst_407 = arith.constant 2.000000e+00 : f32
    %975 = vector.broadcast %cst_407 : f32 to vector<8x1xf32>
    %976 = arith.subf %975, %974 : vector<8x1xf32>
    %977 = arith.mulf %973, %976 : vector<8x1xf32>
    %978 = vector.broadcast %977 : vector<8x1xf32> to vector<8x8xf32>
    %979 = arith.mulf %970, %978 : vector<8x8xf32>
    %cst_408 = arith.constant dense<0.000000e+00> : vector<8x8xf32>
    %980 = tpu.matmul %979, %963, %cst_408 {dimension_numbers = #tpu.dot_dimension_numbers<[1], [0], [0], [1], [0, 0, 1, 1], [], []>} : vector<8x8xf32>, vector<8x8xf32>, vector<8x8xf32> -> vector<8x8xf32>
    %c0_409 = arith.constant 0 : index
    %c16_410 = arith.constant 16 : index
    %981 = vector.load %arg23[%c0_409, %c16_410] : memref<16x32xf32, #tpu.memory_space<vmem>>, vector<8x8xf32>
    tpu.vector_store %arg23[%c0_409, %c16_410], %980 {strides = array<i32>} : memref<16x32xf32, #tpu.memory_space<vmem>>, vector<8x8xf32>,
    %982 = vector.extract_strided_slice %958 {offsets = [8, 0], sizes = [8, 8], strides = [1, 1]} : vector<16x8xf32> to vector<8x8xf32>
    %983 = vector.extract_strided_slice %959 {offsets = [8, 0], sizes = [8, 8], strides = [1, 1]} : vector<16x8xf32> to vector<8x8xf32>
    %984 = vector.extract_strided_slice %960 {offsets = [8, 0], sizes = [8, 8], strides = [1, 1]} : vector<16x8xf32> to vector<8x8xf32>
    %985 = tpu.transpose %983, [1, 0] : vector<8x8xf32> -> vector<8x8xf32>
    %cst_411 = arith.constant dense<0.000000e+00> : vector<8x8xf32>
    %986 = tpu.matmul %982, %985, %cst_411 {dimension_numbers = #tpu.dot_dimension_numbers<[1], [0], [0], [1], [0, 0, 1, 1], [], []>} : vector<8x8xf32>, vector<8x8xf32>, vector<8x8xf32> -> vector<8x8xf32>
    %cst_412 = arith.constant dense<0xFF800000> : vector<8xf32>
    %987 = vector.multi_reduction <maximumf>, %986, %cst_412 [1] : vector<8x8xf32> to vector<8xf32>
    %988 = vector.shape_cast %987 : vector<8xf32> to vector<8x1xf32>
    %989 = vector.broadcast %988 : vector<8x1xf32> to vector<8x8xf32>
    %990 = arith.subf %986, %989 : vector<8x8xf32>
    %991 = math.exp %990 : vector<8x8xf32>
    %cst_413 = arith.constant dense<0.000000e+00> : vector<8xf32>
    %992 = vector.multi_reduction <add>, %991, %cst_413 [1] : vector<8x8xf32> to vector<8xf32>
    %993 = vector.shape_cast %992 : vector<8xf32> to vector<8x1xf32>
    %994 = tpu.reciprocal %993 {approx = true} : vector<8x1xf32> -> vector<8x1xf32>
    %995 = arith.mulf %993, %994 : vector<8x1xf32>
    %cst_414 = arith.constant 2.000000e+00 : f32
    %996 = vector.broadcast %cst_414 : f32 to vector<8x1xf32>
    %997 = arith.subf %996, %995 : vector<8x1xf32>
    %998 = arith.mulf %994, %997 : vector<8x1xf32>
    %999 = vector.broadcast %998 : vector<8x1xf32> to vector<8x8xf32>
    %1000 = arith.mulf %991, %999 : vector<8x8xf32>
    %cst_415 = arith.constant dense<0.000000e+00> : vector<8x8xf32>
    %1001 = tpu.matmul %1000, %984, %cst_415 {dimension_numbers = #tpu.dot_dimension_numbers<[1], [0], [0], [1], [0, 0, 1, 1], [], []>} : vector<8x8xf32>, vector<8x8xf32>, vector<8x8xf32> -> vector<8x8xf32>
    %c8_416 = arith.constant 8 : index
    %c16_417 = arith.constant 16 : index
    %1002 = vector.load %arg23[%c8_416, %c16_417] : memref<16x32xf32, #tpu.memory_space<vmem>>, vector<8x8xf32>
    tpu.vector_store %arg23[%c8_416, %c16_417], %1001 {strides = array<i32>} : memref<16x32xf32, #tpu.memory_space<vmem>>, vector<8x8xf32>,
    %1003 = vector.extract_strided_slice %859 {offsets = [0, 24], sizes = [16, 8], strides = [1, 1]} : vector<16x32xf32> to vector<16x8xf32>
    %cst_418 = arith.constant 0.353553385 : f32
    %1004 = vector.broadcast %cst_418 : f32 to vector<16x8xf32>
    %1005 = arith.mulf %1003, %1004 : vector<16x8xf32>
    %1006 = vector.extract_strided_slice %860 {offsets = [0, 24], sizes = [16, 8], strides = [1, 1]} : vector<16x32xf32> to vector<16x8xf32>
    %1007 = vector.extract_strided_slice %861 {offsets = [0, 24], sizes = [16, 8], strides = [1, 1]} : vector<16x32xf32> to vector<16x8xf32>
    %1008 = vector.extract_strided_slice %1005 {offsets = [0, 0], sizes = [8, 8], strides = [1, 1]} : vector<16x8xf32> to vector<8x8xf32>
    %1009 = vector.extract_strided_slice %1006 {offsets = [0, 0], sizes = [8, 8], strides = [1, 1]} : vector<16x8xf32> to vector<8x8xf32>
    %1010 = vector.extract_strided_slice %1007 {offsets = [0, 0], sizes = [8, 8], strides = [1, 1]} : vector<16x8xf32> to vector<8x8xf32>
    %1011 = tpu.transpose %1009, [1, 0] : vector<8x8xf32> -> vector<8x8xf32>
    %cst_419 = arith.constant dense<0.000000e+00> : vector<8x8xf32>
    %1012 = tpu.matmul %1008, %1011, %cst_419 {dimension_numbers = #tpu.dot_dimension_numbers<[1], [0], [0], [1], [0, 0, 1, 1], [], []>} : vector<8x8xf32>, vector<8x8xf32>, vector<8x8xf32> -> vector<8x8xf32>
    %cst_420 = arith.constant dense<0xFF800000> : vector<8xf32>
    %1013 = vector.multi_reduction <maximumf>, %1012, %cst_420 [1] : vector<8x8xf32> to vector<8xf32>
    %1014 = vector.shape_cast %1013 : vector<8xf32> to vector<8x1xf32>
    %1015 = vector.broadcast %1014 : vector<8x1xf32> to vector<8x8xf32>
    %1016 = arith.subf %1012, %1015 : vector<8x8xf32>
    %1017 = math.exp %1016 : vector<8x8xf32>
    %cst_421 = arith.constant dense<0.000000e+00> : vector<8xf32>
    %1018 = vector.multi_reduction <add>, %1017, %cst_421 [1] : vector<8x8xf32> to vector<8xf32>
    %1019 = vector.shape_cast %1018 : vector<8xf32> to vector<8x1xf32>
    %1020 = tpu.reciprocal %1019 {approx = true} : vector<8x1xf32> -> vector<8x1xf32>
    %1021 = arith.mulf %1019, %1020 : vector<8x1xf32>
    %cst_422 = arith.constant 2.000000e+00 : f32
    %1022 = vector.broadcast %cst_422 : f32 to vector<8x1xf32>
    %1023 = arith.subf %1022, %1021 : vector<8x1xf32>
    %1024 = arith.mulf %1020, %1023 : vector<8x1xf32>
    %1025 = vector.broadcast %1024 : vector<8x1xf32> to vector<8x8xf32>
    %1026 = arith.mulf %1017, %1025 : vector<8x8xf32>
    %cst_423 = arith.constant dense<0.000000e+00> : vector<8x8xf32>
    %1027 = tpu.matmul %1026, %1010, %cst_423 {dimension_numbers = #tpu.dot_dimension_numbers<[1], [0], [0], [1], [0, 0, 1, 1], [], []>} : vector<8x8xf32>, vector<8x8xf32>, vector<8x8xf32> -> vector<8x8xf32>
    %c0_424 = arith.constant 0 : index
    %c24_425 = arith.constant 24 : index
    %1028 = vector.load %arg23[%c0_424, %c24_425] : memref<16x32xf32, #tpu.memory_space<vmem>>, vector<8x8xf32>
    tpu.vector_store %arg23[%c0_424, %c24_425], %1027 {strides = array<i32>} : memref<16x32xf32, #tpu.memory_space<vmem>>, vector<8x8xf32>,
    %1029 = vector.extract_strided_slice %1005 {offsets = [8, 0], sizes = [8, 8], strides = [1, 1]} : vector<16x8xf32> to vector<8x8xf32>
    %1030 = vector.extract_strided_slice %1006 {offsets = [8, 0], sizes = [8, 8], strides = [1, 1]} : vector<16x8xf32> to vector<8x8xf32>
    %1031 = vector.extract_strided_slice %1007 {offsets = [8, 0], sizes = [8, 8], strides = [1, 1]} : vector<16x8xf32> to vector<8x8xf32>
    %1032 = tpu.transpose %1030, [1, 0] : vector<8x8xf32> -> vector<8x8xf32>
    %cst_426 = arith.constant dense<0.000000e+00> : vector<8x8xf32>
    %1033 = tpu.matmul %1029, %1032, %cst_426 {dimension_numbers = #tpu.dot_dimension_numbers<[1], [0], [0], [1], [0, 0, 1, 1], [], []>} : vector<8x8xf32>, vector<8x8xf32>, vector<8x8xf32> -> vector<8x8xf32>
    %cst_427 = arith.constant dense<0xFF800000> : vector<8xf32>
    %1034 = vector.multi_reduction <maximumf>, %1033, %cst_427 [1] : vector<8x8xf32> to vector<8xf32>
    %1035 = vector.shape_cast %1034 : vector<8xf32> to vector<8x1xf32>
    %1036 = vector.broadcast %1035 : vector<8x1xf32> to vector<8x8xf32>
    %1037 = arith.subf %1033, %1036 : vector<8x8xf32>
    %1038 = math.exp %1037 : vector<8x8xf32>
    %cst_428 = arith.constant dense<0.000000e+00> : vector<8xf32>
    %1039 = vector.multi_reduction <add>, %1038, %cst_428 [1] : vector<8x8xf32> to vector<8xf32>
    %1040 = vector.shape_cast %1039 : vector<8xf32> to vector<8x1xf32>
    %1041 = tpu.reciprocal %1040 {approx = true} : vector<8x1xf32> -> vector<8x1xf32>
    %1042 = arith.mulf %1040, %1041 : vector<8x1xf32>
    %cst_429 = arith.constant 2.000000e+00 : f32
    %1043 = vector.broadcast %cst_429 : f32 to vector<8x1xf32>
    %1044 = arith.subf %1043, %1042 : vector<8x1xf32>
    %1045 = arith.mulf %1041, %1044 : vector<8x1xf32>
    %1046 = vector.broadcast %1045 : vector<8x1xf32> to vector<8x8xf32>
    %1047 = arith.mulf %1038, %1046 : vector<8x8xf32>
    %cst_430 = arith.constant dense<0.000000e+00> : vector<8x8xf32>
    %1048 = tpu.matmul %1047, %1031, %cst_430 {dimension_numbers = #tpu.dot_dimension_numbers<[1], [0], [0], [1], [0, 0, 1, 1], [], []>} : vector<8x8xf32>, vector<8x8xf32>, vector<8x8xf32> -> vector<8x8xf32>
    %c8_431 = arith.constant 8 : index
    %c24_432 = arith.constant 24 : index
    %1049 = vector.load %arg23[%c8_431, %c24_432] : memref<16x32xf32, #tpu.memory_space<vmem>>, vector<8x8xf32>
    tpu.vector_store %arg23[%c8_431, %c24_432], %1048 {strides = array<i32>} : memref<16x32xf32, #tpu.memory_space<vmem>>, vector<8x8xf32>,
    %c0_433 = arith.constant 0 : index
    %c0_434 = arith.constant 0 : index
    %1050 = vector.load %arg23[%c0_433, %c0_434] : memref<16x32xf32, #tpu.memory_space<vmem>>, vector<16x32xf32>
    %c1_435 = arith.constant 1 : index
    %c0_436 = arith.constant 0 : index
    %c0_437 = arith.constant 0 : index
    %1051 = vector.load %arg12[%c1_435, %c0_436, %c0_437] : memref<2x32x32xf32, #tpu.memory_space<vmem>>, vector<1x32x32xf32>
    %1052 = vector.shape_cast %1051 : vector<1x32x32xf32> to vector<32x32xf32>
    %cst_438 = arith.constant dense<0.000000e+00> : vector<16x32xf32>
    %1053 = tpu.matmul %1050, %1052, %cst_438 {dimension_numbers = #tpu.dot_dimension_numbers<[1], [0], [0], [1], [0, 0, 1, 1], [], []>} : vector<16x32xf32>, vector<32x32xf32>, vector<16x32xf32> -> vector<16x32xf32>
    %c1_439 = arith.constant 1 : index
    %c0_440 = arith.constant 0 : index
    %c0_441 = arith.constant 0 : index
    %1054 = vector.load %arg13[%c1_439, %c0_440, %c0_441] : memref<2x1x32xf32, #tpu.memory_space<vmem>>, vector<1x1x32xf32>
    %1055 = vector.shape_cast %1054 : vector<1x1x32xf32> to vector<1x32xf32>
    %1056 = vector.broadcast %1055 : vector<1x32xf32> to vector<16x32xf32>
    %1057 = arith.addf %1053, %1056 : vector<16x32xf32>
    %1058 = arith.addf %851, %1057 : vector<16x32xf32>
    %c1_442 = arith.constant 1 : index
    %c0_443 = arith.constant 0 : index
    %c0_444 = arith.constant 0 : index
    %1059 = vector.load %arg14[%c1_442, %c0_443, %c0_444] : memref<2x1x32xf32, #tpu.memory_space<vmem>>, vector<1x1x32xf32>
    %1060 = vector.shape_cast %1059 : vector<1x1x32xf32> to vector<1x32xf32>
    %c1_445 = arith.constant 1 : index
    %c0_446 = arith.constant 0 : index
    %c0_447 = arith.constant 0 : index
    %1061 = vector.load %arg15[%c1_445, %c0_446, %c0_447] : memref<2x1x32xf32, #tpu.memory_space<vmem>>, vector<1x1x32xf32>
    %1062 = vector.shape_cast %1061 : vector<1x1x32xf32> to vector<1x32xf32>
    %cst_448 = arith.constant dense<0.000000e+00> : vector<16xf32>
    %1063 = vector.multi_reduction <add>, %1058, %cst_448 [1] : vector<16x32xf32> to vector<16xf32>
    %1064 = vector.shape_cast %1063 : vector<16xf32> to vector<16x1xf32>
    %cst_449 = arith.constant 3.200000e+01 : f32
    %1065 = vector.broadcast %cst_449 : f32 to vector<16x1xf32>
    %1066 = arith.divf %1064, %1065 : vector<16x1xf32>
    %1067 = vector.broadcast %1066 : vector<16x1xf32> to vector<16x32xf32>
    %1068 = arith.subf %1058, %1067 : vector<16x32xf32>
    %1069 = arith.mulf %1068, %1068 : vector<16x32xf32>
    %cst_450 = arith.constant dense<0.000000e+00> : vector<16xf32>
    %1070 = vector.multi_reduction <add>, %1069, %cst_450 [1] : vector<16x32xf32> to vector<16xf32>
    %1071 = vector.shape_cast %1070 : vector<16xf32> to vector<16x1xf32>
    %cst_451 = arith.constant 3.200000e+01 : f32
    %1072 = vector.broadcast %cst_451 : f32 to vector<16x1xf32>
    %1073 = arith.divf %1071, %1072 : vector<16x1xf32>
    %cst_452 = arith.constant 9.99999974E-6 : f32
    %1074 = vector.broadcast %cst_452 : f32 to vector<16x1xf32>
    %1075 = arith.addf %1073, %1074 : vector<16x1xf32>
    %1076 = math.rsqrt %1075 : vector<16x1xf32>
    %1077 = vector.broadcast %1076 : vector<16x1xf32> to vector<16x32xf32>
    %1078 = arith.mulf %1068, %1077 : vector<16x32xf32>
    %1079 = vector.broadcast %1060 : vector<1x32xf32> to vector<16x32xf32>
    %1080 = arith.mulf %1078, %1079 : vector<16x32xf32>
    %1081 = vector.broadcast %1062 : vector<1x32xf32> to vector<16x32xf32>
    %1082 = arith.addf %1080, %1081 : vector<16x32xf32>
    %c1_453 = arith.constant 1 : index
    %c0_454 = arith.constant 0 : index
    %c0_455 = arith.constant 0 : index
    %1083 = vector.load %arg16[%c1_453, %c0_454, %c0_455] : memref<2x32x128xf32, #tpu.memory_space<vmem>>, vector<1x32x128xf32>
    %1084 = vector.shape_cast %1083 : vector<1x32x128xf32> to vector<32x128xf32>
    %cst_456 = arith.constant dense<0.000000e+00> : vector<16x128xf32>
    %1085 = tpu.matmul %1082, %1084, %cst_456 {dimension_numbers = #tpu.dot_dimension_numbers<[1], [0], [0], [1], [0, 0, 1, 1], [], []>} : vector<16x32xf32>, vector<32x128xf32>, vector<16x128xf32> -> vector<16x128xf32>
    %c1_457 = arith.constant 1 : index
    %c0_458 = arith.constant 0 : index
    %c0_459 = arith.constant 0 : index
    %1086 = vector.load %arg17[%c1_457, %c0_458, %c0_459] : memref<2x1x128xf32, #tpu.memory_space<vmem>>, vector<1x1x128xf32>
    %1087 = vector.shape_cast %1086 : vector<1x1x128xf32> to vector<1x128xf32>
    %1088 = vector.broadcast %1087 : vector<1x128xf32> to vector<16x128xf32>
    %1089 = arith.addf %1085, %1088 : vector<16x128xf32>
    %cst_460 = arith.constant 0.000000e+00 : f32
    %1090 = vector.broadcast %cst_460 : f32 to vector<16x128xf32>
    %1091 = arith.maximumf %1089, %1090 : vector<16x128xf32>
    %c1_461 = arith.constant 1 : index
    %c0_462 = arith.constant 0 : index
    %c0_463 = arith.constant 0 : index
    %1092 = vector.load %arg18[%c1_461, %c0_462, %c0_463] : memref<2x128x32xf32, #tpu.memory_space<vmem>>, vector<1x128x32xf32>
    %1093 = vector.shape_cast %1092 : vector<1x128x32xf32> to vector<128x32xf32>
    %cst_464 = arith.constant dense<0.000000e+00> : vector<16x32xf32>
    %1094 = tpu.matmul %1091, %1093, %cst_464 {dimension_numbers = #tpu.dot_dimension_numbers<[1], [0], [0], [1], [0, 0, 1, 1], [], []>} : vector<16x128xf32>, vector<128x32xf32>, vector<16x32xf32> -> vector<16x32xf32>
    %c1_465 = arith.constant 1 : index
    %c0_466 = arith.constant 0 : index
    %c0_467 = arith.constant 0 : index
    %1095 = vector.load %arg19[%c1_465, %c0_466, %c0_467] : memref<2x1x32xf32, #tpu.memory_space<vmem>>, vector<1x1x32xf32>
    %1096 = vector.shape_cast %1095 : vector<1x1x32xf32> to vector<1x32xf32>
    %1097 = vector.broadcast %1096 : vector<1x32xf32> to vector<16x32xf32>
    %1098 = arith.addf %1094, %1097 : vector<16x32xf32>
    %1099 = arith.addf %1082, %1098 : vector<16x32xf32>
    %c1_468 = arith.constant 1 : index
    %c0_469 = arith.constant 0 : index
    %c0_470 = arith.constant 0 : index
    %1100 = vector.load %arg20[%c1_468, %c0_469, %c0_470] : memref<2x1x32xf32, #tpu.memory_space<vmem>>, vector<1x1x32xf32>
    %1101 = vector.shape_cast %1100 : vector<1x1x32xf32> to vector<1x32xf32>
    %c1_471 = arith.constant 1 : index
    %c0_472 = arith.constant 0 : index
    %c0_473 = arith.constant 0 : index
    %1102 = vector.load %arg21[%c1_471, %c0_472, %c0_473] : memref<2x1x32xf32, #tpu.memory_space<vmem>>, vector<1x1x32xf32>
    %1103 = vector.shape_cast %1102 : vector<1x1x32xf32> to vector<1x32xf32>
    %cst_474 = arith.constant dense<0.000000e+00> : vector<16xf32>
    %1104 = vector.multi_reduction <add>, %1099, %cst_474 [1] : vector<16x32xf32> to vector<16xf32>
    %1105 = vector.shape_cast %1104 : vector<16xf32> to vector<16x1xf32>
    %cst_475 = arith.constant 3.200000e+01 : f32
    %1106 = vector.broadcast %cst_475 : f32 to vector<16x1xf32>
    %1107 = arith.divf %1105, %1106 : vector<16x1xf32>
    %1108 = vector.broadcast %1107 : vector<16x1xf32> to vector<16x32xf32>
    %1109 = arith.subf %1099, %1108 : vector<16x32xf32>
    %1110 = arith.mulf %1109, %1109 : vector<16x32xf32>
    %cst_476 = arith.constant dense<0.000000e+00> : vector<16xf32>
    %1111 = vector.multi_reduction <add>, %1110, %cst_476 [1] : vector<16x32xf32> to vector<16xf32>
    %1112 = vector.shape_cast %1111 : vector<16xf32> to vector<16x1xf32>
    %cst_477 = arith.constant 3.200000e+01 : f32
    %1113 = vector.broadcast %cst_477 : f32 to vector<16x1xf32>
    %1114 = arith.divf %1112, %1113 : vector<16x1xf32>
    %cst_478 = arith.constant 9.99999974E-6 : f32
    %1115 = vector.broadcast %cst_478 : f32 to vector<16x1xf32>
    %1116 = arith.addf %1114, %1115 : vector<16x1xf32>
    %1117 = math.rsqrt %1116 : vector<16x1xf32>
    %1118 = vector.broadcast %1117 : vector<16x1xf32> to vector<16x32xf32>
    %1119 = arith.mulf %1109, %1118 : vector<16x32xf32>
    %1120 = vector.broadcast %1101 : vector<1x32xf32> to vector<16x32xf32>
    %1121 = arith.mulf %1119, %1120 : vector<16x32xf32>
    %1122 = vector.broadcast %1103 : vector<1x32xf32> to vector<16x32xf32>
    %1123 = arith.addf %1121, %1122 : vector<16x32xf32>
    %c0_479 = arith.constant 0 : index
    %c0_480 = arith.constant 0 : index
    %1124 = vector.load %arg6[%c0_479, %c0_480] : memref<32x64xf32, #tpu.memory_space<vmem>>, vector<32x64xf32>
    %cst_481 = arith.constant dense<0.000000e+00> : vector<16x64xf32>
    %1125 = tpu.matmul %1123, %1124, %cst_481 {dimension_numbers = #tpu.dot_dimension_numbers<[1], [0], [0], [1], [0, 0, 1, 1], [], []>} : vector<16x32xf32>, vector<32x64xf32>, vector<16x64xf32> -> vector<16x64xf32>
    %c0_482 = arith.constant 0 : index
    %c0_483 = arith.constant 0 : index
    %1126 = vector.load %arg7[%c0_482, %c0_483] : memref<1x64xf32, #tpu.memory_space<vmem>>, vector<1x64xf32>
    %1127 = vector.broadcast %1126 : vector<1x64xf32> to vector<16x64xf32>
    %1128 = arith.addf %1125, %1127 : vector<16x64xf32>
    %cst_484 = arith.constant 0.000000e+00 : f32
    %1129 = vector.broadcast %cst_484 : f32 to vector<16x64xf32>
    %1130 = arith.maximumf %1128, %1129 : vector<16x64xf32>
    %c0_485 = arith.constant 0 : index
    %c0_486 = arith.constant 0 : index
    %1131 = vector.load %arg8[%c0_485, %c0_486] : memref<64x128xf32, #tpu.memory_space<vmem>>, vector<64x128xf32>
    %cst_487 = arith.constant dense<0.000000e+00> : vector<16x128xf32>
    %1132 = tpu.matmul %1130, %1131, %cst_487 {dimension_numbers = #tpu.dot_dimension_numbers<[1], [0], [0], [1], [0, 0, 1, 1], [], []>} : vector<16x64xf32>, vector<64x128xf32>, vector<16x128xf32> -> vector<16x128xf32>
    %c0_488 = arith.constant 0 : index
    %c0_489 = arith.constant 0 : index
    %1133 = vector.load %arg9[%c0_488, %c0_489] : memref<1x128xf32, #tpu.memory_space<vmem>>, vector<1x128xf32>
    %1134 = vector.broadcast %1133 : vector<1x128xf32> to vector<16x128xf32>
    %1135 = arith.addf %1132, %1134 : vector<16x128xf32>
    %c1_490 = arith.constant 1 : index
    %c0_491 = arith.constant 0 : index
    %c0_492 = arith.constant 0 : index
    %1136 = vector.load %arg22[%c1_490, %c0_491, %c0_492] : memref<2x16x128xf32, #tpu.memory_space<vmem>>, vector<1x16x128xf32>
    %1137 = vector.shape_cast %1136 : vector<1x16x128xf32> to vector<16x128xf32>
    %1138 = vector.shape_cast %1135 : vector<16x128xf32> to vector<1x16x128xf32>
    tpu.vector_store %arg22[%c1_490, %c0_491, %c0_492], %1138 {strides = array<i32>} : memref<2x16x128xf32, #tpu.memory_space<vmem>>, vector<1x16x128xf32>,
    return
  }
}

</mosaic_0001>

<bundles_post_ra>
// kernel: hypernet_forward.1
= control target key start
LH: loop header
LB: loop body
LE: loop exit
PB: predicated region body
PF: predicated region fallthrough
CT: control target
= control target key end

     0   :  { %vm85_vm0 = vcmask 523264   ;;  %vm172_vm1 = vcmask 261120   ;;  %s5589_s23 = smov 112   ;;  %vm207_vm2 = vcmask 64512   ;;  %s5583_s26 = smov 48   ;;  %vm415_vm3 = vcmask 130112   ;;  %s5555_s2 = inlined_call_operand.vmem [shape: f32[64,64], index: 2, kind: input, shape index: {}]   ;;  %s5556_s4 = inlined_call_operand.vmem [shape: f32[64,32], index: 4, kind: input, shape index: {}]   ;;  %s5557_s3 = inlined_call_operand.vmem [shape: f32[1,64], index: 3, kind: input, shape index: {}]   ;;  %s5558_s0 = inlined_call_operand.vmem [shape: f32[16,64], index: 0, kind: input, shape index: {}]   ;;  %s5559_s1 = inlined_call_operand.vmem [shape: f32[2,1,32], index: 1, kind: input, shape index: {}]   ;;  %s5560_s5 = inlined_call_operand.vmem [shape: f32[1,32], index: 5, kind: input, shape index: {}]   ;;  %s5561_s10 = inlined_call_operand.vmem [shape: f32[2,32,128], index: 10, kind: input, shape index: {}]   ;;  %s5562_s11 = inlined_call_operand.vmem [shape: f32[2,1,128], index: 11, kind: input, shape index: {}]   ;;  %s5563_s13 = inlined_call_operand.vmem [shape: f32[2,1,32], index: 13, kind: input, shape index: {}]   ;;  %s5564_s12 = inlined_call_operand.vmem [shape: f32[2,32,32], index: 12, kind: input, shape index: {}]   ;;  %s5565_s14 = inlined_call_operand.vmem [shape: f32[2,1,32], index: 14, kind: input, shape index: {}]   ;;  %s5566_s15 = inlined_call_operand.vmem [shape: f32[2,1,32], index: 15, kind: input, shape index: {}]   ;;  %s5567_s17 = inlined_call_operand.vmem [shape: f32[2,1,128], index: 17, kind: input, shape index: {}]   ;;  %s5568_s16 = inlined_call_operand.vmem [shape: f32[2,32,128], index: 16, kind: input, shape index: {}]   ;;  %s5569_s18 = inlined_call_operand.vmem [shape: f32[2,128,32], index: 18, kind: input, shape index: {}]   ;;  %s5570_s19 = inlined_call_operand.vmem [shape: f32[2,1,32], index: 19, kind: input, shape index: {}]   ;;  %s5571_s20 = inlined_call_operand.vmem [shape: f32[2,1,32], index: 20, kind: input, shape index: {}]   ;;  %s5572_s21 = inlined_call_operand.vmem [shape: f32[2,1,32], index: 21, kind: input, shape index: {}]   ;;  %s5573_s7 = inlined_call_operand.vmem [shape: f32[1,64], index: 7, kind: input, shape index: {}]   ;;  %s5574_s6 = inlined_call_operand.vmem [shape: f32[32,64], index: 6, kind: input, shape index: {}]   ;;  %s5575_s8 = inlined_call_operand.vmem [shape: f32[64,128], index: 8, kind: input, shape index: {}]   ;;  %s5576_s9 = inlined_call_operand.vmem [shape: f32[1,128], index: 9, kind: input, shape index: {}]   ;;  %s5577_s22 = inlined_call_operand.vmem [shape: f32[2,16,128], index: 22, kind: output, shape index: {}]  }
   0x1   :  { %5628 = sst [smem:[#allocation3_spill]] %s5555_s2  ;;  %v4038_v37 = vld [vmem:[%s5562_s11] ss:$0 sm:$0xff]  ;;  %s5603_s2 = smov 120   ;;  %vm562_vm4 = vcmask 195712   ;;  %vm709_vm5 = vcmask 261312  }
   0x2   :  { %5629 = sst [smem:[#allocation4_spill]] %s5556_s4  ;;  %s5587_s4 = smov 104  }
   0x3   :  { %5630 = sst [smem:[#allocation5_spill]] %s5557_s3  ;;  %s5585_s3 = smov 40  }
   0x4   :  { %5631 = sst [smem:[#allocation6_spill]] %s5558_s0  ;;  %s5593_s28 = smov 8  }
   0x5   :  { %5632 = sst [smem:[#allocation7_spill]] %s5559_s1  ;;  %s5607_s1 = smov 88  }
   0x6   :  { %5633 = sst [smem:[#allocation8_spill]] %s5560_s5  ;;  %s5601_s5 = smov 64  }
   0x7   :  { %5634 = sst [smem:[#allocation9_spill]] %s5561_s10  ;;  %s5595_s10 = smov 80  }
   0x8   :  { %5635 = sst [smem:[#allocation10_spill]] %s5570_s19 }
   0x9   :  { %5636 = sst [smem:[#allocation11_spill]] %s5573_s7 }
   0xa   :  { %5637 = sst [smem:[#allocation12_spill]] %s5574_s6 }
   0xb   :  { %5638 = sst [smem:[#allocation13_spill]] %s5575_s8 }
   0xc   :  { %5639 = sst [smem:[#allocation14_spill]] %s5576_s9 }
   0xd   :  { %5640 = sst [smem:[#allocation15_spill]] %s5577_s22 }
   0xe   :  { %s5641_s29 = sld [smem:[#allocation3_spill]] }
   0xf   :  { %s5642_s24 = sld [smem:[#allocation4_spill]] }
  0x10   :  { %s5643_s30 = sld [smem:[#allocation6_spill]] }
  0x11   :  { %s5644_s27 = sld [smem:[#allocation9_spill]] }
  0x12   :  { %s5646_s25 = sld [smem:[#allocation8_spill]] }
  0x13   :  { %s5647_s0 = sld [smem:[#allocation7_spill]] }
  0x14   :  { %v80_v0 = vld [vmem:[%s5641_s29 + $0x38] sm:$0xff]  ;;  %v79_v1 = vld [vmem:[%s5641_s29 + $0x30] sm:$0xff]  ;;  %v78_v2 = vld [vmem:[%s5641_s29 + $0x28] sm:$0xff] }
  0x15   :  { %100 = vmatpush.msra.mxu0 %v80_v0  ;;  %v124_v3 = vld [vmem:[%s5642_s24 + $0x38] sm:$0xff]  ;;  %v123_v4 = vld [vmem:[%s5642_s24 + $0x30] sm:$0xff]  ;;  %v77_v5 = vld [vmem:[%s5641_s29 + $0x20] sm:$0xff] }
  0x16   :  { %143 = vmatpush.msra.mxu1 %v124_v3  ;;  %v122_v6 = vld [vmem:[%s5642_s24 + $0x28] sm:$0xff]  ;;  %v76_v7 = vld [vmem:[%s5641_s29 + $0x18] sm:$0xff]  ;;  %v121_v8 = vld [vmem:[%s5642_s24 + $0x20] sm:$0xff] }
  0x17   :  { %101 = vmatpush.msra.mxu0 %v79_v1  ;;  %v75_v9 = vld [vmem:[%s5641_s29 + $0x10] sm:$0xff]  ;;  %v120_v10 = vld [vmem:[%s5642_s24 + $0x18] sm:$0xff]  ;;  %v74_v11 = vld [vmem:[%s5641_s29 + $0x8] sm:$0xff] }
  0x18   :  { %144 = vmatpush.msra.mxu1 %v123_v4  ;;  %v73_v12 = vld [vmem:[%s5641_s29] sm:$0xff]  ;;  %v72_v14 = vld [vmem:[%s5643_s30 + $0x8] sm:$0xff]  ;;  %v119_v15 = vld [vmem:[%s5642_s24 + $0x10] sm:$0xff]  ;;  %s5591_s29 = smov 72  }
  0x19   :  { %102 = vmatpush.msra.mxu0 %v78_v2  ;;  %v71_v13 = vld [vmem:[%s5643_s30] sm:$0xff]  ;;  %v118_v16 = vld [vmem:[%s5642_s24 + $0x8] sm:$0xff]  ;;  %v167_v18 = vld [vmem:[%s5644_s27 + $0x18] sm:$0xff]  ;;  %s5645_s30 = sld [smem:[#allocation5_spill]] }
  0x1a   :  { %145 = vmatpush.msra.mxu1 %v122_v6  ;;  %v117_v17 = vld [vmem:[%s5642_s24] sm:$0xff]  ;;  %v166_v26 = vld [vmem:[%s5644_s27 + $0x10] sm:$0xff]  ;;  %v165_v27 = vld [vmem:[%s5644_s27 + $0x8] sm:$0xff]  ;;  %s5605_s24 = smov 96  }
  0x1b   :  { %103 = vmatpush.msra.mxu0 %v77_v5  ;;  %v164_v28 = vld [vmem:[%s5644_s27] sm:$0xff] }
  0x1c   :  { %146 = vmatpush.msra.mxu1 %v121_v8  ;;  %v4035_v29 = vld [vmem:[%s5646_s25] ss:$0 sm:$0xff]  ;;  %s5597_s25 = smov 56  }
  0x1d   :  { %104 = vmatpush.msra.mxu0 %v76_v7  ;;  %v4036_v30 = vld [vmem:[%s5647_s0] ss:$0 sm:$0xff] }
  0x1e   :  { %147 = vmatpush.msra.mxu1 %v120_v10 }
  0x1f   :  { %105 = vmatpush.msra.mxu0 %v75_v9  ;;  %v4034_v19 = vld [vmem:[%s5645_s30] ss:$0 sm:$0xff]  ;;  %s5599_s30 = smov 16  }
  0x20   :  { %148 = vmatpush.msra.mxu1 %v119_v15 }
  0x21   :  { %106 = vmatpush.msra.mxu0 %v74_v11 }
  0x22   :  { %149 = vmatpush.msra.mxu1 %v118_v16 }
  0x23   :  { %107 = vmatpush.msra.mxu0 %v73_v12 }
  0x24   :  { %3772 = vmatmul.msk.f32.vlgmr.msra.gmra.mxu0 %vm85_vm0, %v71_v13  ;;  %150 = vmatpush.msra.mxu1 %v117_v17 }
  0x26   :  { %191 = vmatpush.msrb.mxu1 %v167_v18 }
  0x28   :  { %192 = vmatpush.msrb.mxu1 %v166_v26 }
  0x2a   :  { %193 = vmatpush.msrb.mxu1 %v165_v27 }
  0x2c   :  { %3773 = vmatmul.msk.f32.gmra.mxu0 %vm85_vm0, %v72_v14  ;;  %194 = vmatpush.msrb.mxu1 %v164_v28 }
  0xa1   :  { %v109_v20 = vpop.f32.mrf.mxu0 }
  0xa2   :  { %v110_v21 = vadd.f32 %v4034_v19, %v109_v20 }
  0xa4   :  { %v115_v22 = vmax.f32 %v110_v21, 0.0 }
  0xa6   :  { %3774 = vmatmul.msk.f32.vlgmr.msra.gmra.mxu1 %vm85_vm0, %v115_v22 }
  0xa9   :  { %v112_v23 = vpop.f32.mrf.mxu0 }
  0xaa   :  { %v113_v24 = vadd.f32 %v4034_v19, %v112_v23 }
  0xac   :  { %v116_v25 = vmax.f32 %v113_v24, 0.0 }
  0xae   :  { %3775 = vmatmul.msk.f32.gmra.mxu1 %vm85_vm0, %v116_v25 }
 0x123   :  { %v152_v31 = vpop.f32.mrf.mxu1 }
 0x124   :  { %v153_v32 = vadd.f32 %v4035_v29, %v152_v31 }
 0x126   :  { %v4445_v33 = vadd.f32 %v4036_v30, %v153_v32 }
 0x128   :  { %3776 = vmatmul.msk.f32.vlgmr.msrb.gmra.mxu1 %vm172_vm1, %v4445_v33 }
 0x12b   :  { %v155_v34 = vpop.f32.mrf.mxu1 }
 0x12c   :  { %v156_v35 = vadd.f32 %v4035_v29, %v155_v34 }
 0x12e   :  { %v4449_v36 = vadd.f32 %v4036_v30, %v156_v35 }
 0x130   :  { %3777 = vmatmul.msk.f32.gmra.mxu1 %vm172_vm1, %v4449_v36 }
 0x1a5   :  { %v196_v38 = vpop.f32.mrf.mxu1 }
 0x1a6   :  { %v4456_v39 = vadd.f32 %v4038_v37, %v196_v38 }
 0x1a8   :  { %205 = vrot.lane.b32.xlu0 %v4456_v39, %s5605_s24  ;;  %v202_v42 = vmul.f32 0.35355338, %v4456_v39 }
 0x1ad   :  { %v199_v40 = vpop.f32.mrf.mxu1 }
 0x1ae   :  { %v4460_v41 = vadd.f32 %v4038_v37, %v199_v40 }
 0x1b0   :  { %275 = vrot.lane.b32.xlu2 %v4460_v41, %s5605_s24  ;;  %v203_v43 = vmul.f32 0.35355338, %v4460_v41  ;;  %v3994_v23 = vpack.i.bf16 %v4460_v41, %v4456_v39 }
 0x1b8   :  { %345 = vrot.lane.b32.xlu2 %v4456_v39, %s5607_s1 }
 0x1c0   :  { %343 = vrot.lane.b32.xlu2 %v202_v42, %s5603_s2 }
 0x1c8   :  { %419 = vrot.lane.b32.xlu2 %v4460_v41, %s5607_s1 }
 0x1d0   :  { %417 = vrot.lane.b32.xlu2 %v203_v43, %s5603_s2 }
 0x1d8   :  { %490 = vrot.lane.b32.xlu2 %v202_v42, %s5589_s23 }
 0x1e0   :  { %637 = vrot.lane.b32.xlu2 %v202_v42, %s5587_s4 }
 0x1e8   :  { %713 = vrot.lane.b32.xlu2 %v4460_v41, %s5591_s29 }
 0x20a   :  { %v276_v52 = vpop.permute.xlu2 %275 }
 0x212   :  { %v346_v53 = vpop.permute.xlu2 %345 }
 0x21a   :  { %v206_v44 = vpop.permute.xlu0 %205  ;;  %v344_v55 = vpop.permute.xlu2 %343 }
 0x21b   :  { %3778 = vmatpush.xpose.msk.msra.mxu3 %vm207_vm2, %v206_v44 }
 0x21e   :  { %3779 = vmatmul.msk.f32.vlgmr.msra.gmra.mxu3 %vm207_vm2, %v202_v42 }
 0x222   :  { %v420_v57 = vpop.permute.xlu2 %419 }
 0x22a   :  { %v418_v61 = vpop.permute.xlu2 %417 }
 0x232   :  { %v491_v0 = vpop.permute.xlu2 %490 }
 0x23a   :  { %v638_v3 = vpop.permute.xlu2 %637 }
 0x242   :  { %v714_v5 = vpop.permute.xlu2 %713 }
 0x2a1   :  { %v230_v45 = vpop.f32.mrf.mxu3 }
 0x2a2   :  { %v233_v46 = vsel %vm207_vm2, %v230_v45, -inf }
 0x2a3   :  { %234 = vmax.xlane.f32.xlu0 %v233_v46 }
 0x2b7   :  { %564 = vrot.lane.b32.xlu0 %v203_v43, %s5589_s23  ;;  %s5648_s23 = smov 56  }
 0x316   :  { %v235_v47 = vpop.xlane.xlu0 %234 }
 0x317   :  { %v236_v48 = vsub.f32 %v230_v45, %v235_v47 }
 0x319   :  { %v237_v49 = vmul.f32 1.442695, %v236_v48 }
 0x31b   :  { %4074 = vpow2.f32 %v237_v49 }
 0x321   :  { %v4075_v50 = vpop.eup %4074 }
 0x322   :  { %v239_v51 = vsel %vm207_vm2, %v4075_v50, 0.0 }
 0x323   :  { %240 = vadd.xlane.f32.xlu1 %v239_v51 }
 0x329   :  { %v565_v6 = vpop.permute.xlu0 %564 }
 0x33c   :  { %247 = vrot.lane.b32.xlu1 %v4456_v39, %s5601_s5 }
 0x344   :  { %492 = vrot.lane.b32.xlu1 %v4456_v39, %s5595_s10 }
 0x34c   :  { %639 = vrot.lane.b32.xlu1 %v4456_v39, %s5591_s29  ;;  %s5650_s29 = smov 72  }
 0x354   :  { %566 = vrot.lane.b32.xlu1 %v4460_v41, %s5595_s10  ;;  %s5651_s10 = smov 112  }
 0x35c   :  { %711 = vrot.lane.b32.xlu1 %v203_v43, %s5587_s4  ;;  %s5649_s4 = smov 80  }
 0x396   :  { %v241_v54 = vpop.xlane.xlu1 %240 }
 0x397   :  { %4076 = vrcp.f32 %v241_v54 }
 0x39d   :  { %v4077_v56 = vpop.eup %4076 }
 0x39e   :  { %v243_v58 = vmul.f32 %v4077_v56, %v241_v54 }
 0x3a0   :  { %v244_v59 = vsub.f32 2.0, %v243_v58 }
 0x3a2   :  { %v245_v60 = vmul.f32 %v4077_v56, %v244_v59 }
 0x3a4   :  { %v246_v63 = vmul.f32 %v4075_v50, %v245_v60 }
 0x3ae   :  { %v248_v62 = vpop.permute.xlu1 %247 }
 0x3af   :  { %268 = vmatpush.msrb.mxu3 %v248_v62 }
 0x3b0   :  { %3780 = vmatmul.msk.f32.vlgmr.msrb.gmra.mxu3 %vm207_vm2, %v246_v63 }
 0x3b1   :  { %3781 = vmatpush.xpose.msk.msra.mxu3 %vm207_vm2, %v276_v52 }
 0x3b5   :  { %3784 = vmatpush.xpose.msk.msrb.mxu3 %vm207_vm2, %v346_v53 }
 0x3b6   :  { %v493_v1 = vpop.permute.xlu1 %492 }
 0x3b8   :  { %3782 = vmatmul.msk.f32.vlgmr.msra.gmra.mxu3 %vm207_vm2, %v203_v43 }
 0x3b9   :  { %3787 = vmatpush.xpose.msk.msra.mxu3 %vm207_vm2, %v420_v57 }
 0x3be   :  { %v640_v2 = vpop.permute.xlu1 %639 }
 0x3c0   :  { %3785 = vmatmul.msk.f32.vlgmr.msrb.gmra.mxu3 %vm207_vm2, %v344_v55 }
 0x3c1   :  { %3790 = vmatpush.xpose.msk.msrb.mxu3 %vm207_vm2, %v493_v1 }
 0x3c6   :  { %v567_v4 = vpop.permute.xlu1 %566 }
 0x3c7   :  { %3793 = vmatpush.xpose.msk.msra.mxu1 %vm207_vm2, %v567_v4 }
 0x3c8   :  { %3788 = vmatmul.msk.f32.vlgmr.msra.gmra.mxu3 %vm207_vm2, %v418_v61 }
 0x3c9   :  { %3796 = vmatpush.xpose.msk.msra.mxu3 %vm207_vm2, %v640_v2 }
 0x3ca   :  { %3794 = vmatmul.msk.f32.vlgmr.msra.gmra.mxu1 %vm207_vm2, %v565_v6 }
 0x3cb   :  { %3799 = vmatpush.xpose.msk.msrb.mxu1 %vm207_vm2, %v714_v5 }
 0x3ce   :  { %v712_v7 = vpop.permute.xlu1 %711 }
 0x3d0   :  { %3791 = vmatmul.msk.f32.vlgmr.msrb.gmra.mxu3 %vm207_vm2, %v491_v0 }
 0x3d2   :  { %3800 = vmatmul.msk.f32.vlgmr.msrb.gmra.mxu1 %vm207_vm2, %v712_v7 }
 0x3d8   :  { %3797 = vmatmul.msk.f32.vlgmr.msra.gmra.mxu3 %vm207_vm2, %v638_v3 }
 0x433   :  { %v270_v8 = vpop.f32.mrf.mxu3 }
 0x434   :  { %273 = vst.msk [vmem:[#allocation2] sm:$0xff] %vm207_vm2, %v270_v8 }
 0x43b   :  { %v299_v9 = vpop.f32.mrf.mxu3 }
 0x43c   :  { %v302_v10 = vsel %vm207_vm2, %v299_v9, -inf }
 0x43d   :  { %303 = vmax.xlane.f32.xlu2 %v302_v10 }
 0x443   :  { %v368_v11 = vpop.f32.mrf.mxu3 }
 0x444   :  { %v371_v12 = vsel %vm207_vm2, %v368_v11, -inf }
 0x445   :  { %372 = vmax.xlane.f32.xlu1 %v371_v12 }
 0x447   :  { %v589_v13 = vpop.f32.mrf.mxu1 }
 0x448   :  { %v592_v16 = vsel %vm207_vm2, %v589_v13, -inf }
 0x44b   :  { %v442_v14 = vpop.f32.mrf.mxu3 }
 0x44c   :  { %v445_v15 = vsel %vm207_vm2, %v442_v14, -inf }
 0x44d   :  { %446 = vmax.xlane.f32.xlu0 %v445_v15  ;;  %593 = vmax.xlane.f32.xlu1 %v592_v16 }
 0x44f   :  { %v736_v19 = vpop.f32.mrf.mxu1 }
 0x450   :  { %v739_v22 = vsel %vm207_vm2, %v736_v19, -inf }
 0x453   :  { %v515_v17 = vpop.f32.mrf.mxu3 }
 0x454   :  { %v518_v18 = vsel %vm207_vm2, %v515_v17, -inf }
 0x455   :  { %519 = vmax.xlane.f32.xlu2 %v518_v18 }
 0x45b   :  { %v662_v20 = vpop.f32.mrf.mxu3 }
 0x45c   :  { %v665_v21 = vsel %vm207_vm2, %v662_v20, -inf }
 0x45d   :  { %666 = vmax.xlane.f32.xlu0 %v665_v21  ;;  %740 = vmax.xlane.f32.xlu2 %v739_v22 }
 0x466   :  { %3995 = vrot.lane.b32.xlu1 %v3994_v23, %s5597_s25  ;;  %s5652_s25 = smov 104  }
 0x475   :  { %316 = vrot.lane.b32.xlu2 %v4460_v41, %s5601_s5 }
 0x47d   :  { %4000 = vrot.lane.b32.xlu2 %v3994_v23, %s5583_s26  ;;  %s5614_s26 = smov 24  }
 0x485   :  { %679 = vrot.lane.b32.xlu2 %v4456_v39, %s5585_s3 }
 0x4b0   :  { %v304_v24 = vpop.xlane.xlu2 %303 }
 0x4b1   :  { %v305_v25 = vsub.f32 %v299_v9, %v304_v24 }
 0x4b3   :  { %v306_v26 = vmul.f32 1.442695, %v305_v25 }
 0x4b5   :  { %4078 = vpow2.f32 %v306_v26 }
 0x4b8   :  { %v373_v27 = vpop.xlane.xlu1 %372 }
 0x4b9   :  { %v374_v35 = vsub.f32 %v368_v11, %v373_v27 }
 0x4bb   :  { %v4079_v28 = vpop.eup %4078  ;;  %v375_v40 = vmul.f32 1.442695, %v374_v35 }
 0x4bc   :  { %v308_v29 = vsel %vm207_vm2, %v4079_v28, 0.0 }
 0x4bd   :  { %309 = vadd.xlane.f32.xlu1 %v308_v29 }
 0x4c0   :  { %v594_v30 = vpop.xlane.xlu1 %593  ;;  %v447_v31 = vpop.xlane.xlu0 %446 }
 0x4c1   :  { %v595_v32 = vsub.f32 %v589_v13, %v594_v30  ;;  %v448_v34 = vsub.f32 %v442_v14, %v447_v31 }
 0x4c3   :  { %v596_v37 = vmul.f32 1.442695, %v595_v32  ;;  %v449_v38 = vmul.f32 1.442695, %v448_v34 }
 0x4c5   :  { %4080 = vpow2.f32 %v596_v37 }
 0x4c6   :  { %4082 = vpow2.f32 %v449_v38 }
 0x4c7   :  { %4084 = vpow2.f32 %v375_v40 }
 0x4c8   :  { %v520_v39 = vpop.xlane.xlu2 %519 }
 0x4c9   :  { %v521_v43 = vsub.f32 %v515_v17, %v520_v39 }
 0x4cb   :  { %v4522_v42 = vpop.eup %4080  ;;  %v522_v47 = vmul.f32 1.442695, %v521_v43 }
 0x4cc   :  { %v4524_v44 = vpop.eup %4082  ;;  %v598_v45 = vsel %vm207_vm2, %v4522_v42, 0.0 }
 0x4cd   :  { %599 = vadd.xlane.f32.xlu0 %v598_v45  ;;  %v451_v46 = vsel %vm207_vm2, %v4524_v44, 0.0  ;;  %v4085_v50 = vpop.eup %4084  ;;  %4086 = vpow2.f32 %v522_v47 }
 0x4ce   :  { %452 = vadd.xlane.f32.xlu1 %v451_v46  ;;  %v377_v52 = vsel %vm207_vm2, %v4085_v50, 0.0 }
 0x4d0   :  { %v741_v48 = vpop.xlane.xlu2 %740  ;;  %v667_v49 = vpop.xlane.xlu0 %666 }
 0x4d1   :  { %v668_v51 = vsub.f32 %v662_v20, %v667_v49  ;;  %v742_v58 = vsub.f32 %v736_v19, %v741_v48 }
 0x4d3   :  { %v669_v53 = vmul.f32 1.442695, %v668_v51  ;;  %v4087_v56 = vpop.eup %4086  ;;  %v743_v60 = vmul.f32 1.442695, %v742_v58 }
 0x4d4   :  { %v524_v59 = vsel %vm207_vm2, %v4087_v56, 0.0 }
 0x4d5   :  { %378 = vadd.xlane.f32.xlu0 %v377_v52  ;;  %4088 = vpow2.f32 %v669_v53 }
 0x4d6   :  { %4090 = vpow2.f32 %v743_v60  ;;  %v788_v60 = vld [vmem:[%s5564_s12 + $0x10] sm:$0xff] }
 0x4d8   :  { %v317_v54 = vpop.permute.xlu2 %316  ;;  %v3996_v55 = vpop.permute.xlu1 %3995 }
 0x4d9   :  { %337 = vmatpush.msra.mxu2 %v317_v54  ;;  %v3997_v57 = vunpack.i.l.bf16 %v3996_v55  ;;  %v3998_v10 = vunpack.i.h.bf16 %v3996_v55 }
 0x4db   :  { %406 = vmatpush.msrb.mxu2 %v3997_v57  ;;  %v4532_v62 = vpop.eup %4088 }
 0x4dc   :  { %v671_v0 = vsel %vm207_vm2, %v4532_v62, 0.0  ;;  %v4538_v2 = vpop.eup %4090 }
 0x4dd   :  { %525 = vadd.xlane.f32.xlu0 %v524_v59  ;;  %v745_v3 = vsel %vm207_vm2, %v4538_v2, 0.0  ;;  %v789_v59 = vld [vmem:[%s5564_s12 + $0x18] sm:$0xff] }
 0x4de   :  { %812 = vmatpush.msrb.mxu3 %v789_v59 }
 0x4e0   :  { %v4001_v61 = vpop.permute.xlu2 %4000  ;;  %813 = vmatpush.msrb.mxu3 %v788_v60 }
 0x4e1   :  { %v4002_v63 = vunpack.i.l.bf16 %v4001_v61  ;;  %v4003_v24 = vunpack.i.h.bf16 %v4001_v61  ;;  %v787_v61 = vld [vmem:[%s5564_s12 + $0x8] sm:$0xff] }
 0x4e2   :  { %814 = vmatpush.msrb.mxu3 %v787_v61  ;;  %v933_v61 = vld [vmem:[%s5569_s18 + $0x30] sm:$0xff] }
 0x4e3   :  { %553 = vmatpush.msrb.mxu0 %v4002_v63 }
 0x4e5   :  { %672 = vadd.xlane.f32.xlu0 %v671_v0 }
 0x4e7   :  { %753 = vrot.lane.b32.xlu1 %v4460_v41, %s5585_s3  ;;  %s5653_s3 = smov 40  }
 0x4e8   :  { %v680_v1 = vpop.permute.xlu2 %679 }
 0x4e9   :  { %700 = vmatpush.msra.mxu0 %v680_v1 }
 0x4ed   :  { %746 = vadd.xlane.f32.xlu0 %v745_v3 }
 0x530   :  { %v310_v4 = vpop.xlane.xlu1 %309 }
 0x531   :  { %4092 = vrcp.f32 %v310_v4 }
 0x537   :  { %v4093_v5 = vpop.eup %4092 }
 0x538   :  { %v312_v6 = vmul.f32 %v4093_v5, %v310_v4 }
 0x53a   :  { %v313_v7 = vsub.f32 2.0, %v312_v6  ;;  %v4039_v6 = vld [vmem:[%s5563_s13] ss:$0 sm:$0xff] }
 0x53c   :  { %v314_v8 = vmul.f32 %v4093_v5, %v313_v7 }
 0x53e   :  { %v315_v9 = vmul.f32 %v4079_v28, %v314_v8 }
 0x540   :  { %3783 = vmatmul.msk.f32.vlgmr.msra.gmra.mxu2 %vm207_vm2, %v315_v9  ;;  %v600_v11 = vpop.xlane.xlu0 %599 }
 0x541   :  { %480 = vmatpush.msra.mxu2 %v3998_v10  ;;  %v453_v41 = vpop.xlane.xlu1 %452 }
 0x542   :  { %4094 = vrcp.f32 %v453_v41 }
 0x548   :  { %v379_v12 = vpop.xlane.xlu0 %378  ;;  %v4095_v13 = vpop.eup %4094 }
 0x549   :  { %4096 = vrcp.f32 %v379_v12  ;;  %v455_v17 = vmul.f32 %v4095_v13, %v453_v41 }
 0x54a   :  { %4098 = vrcp.f32 %v600_v11 }
 0x54b   :  { %v456_v21 = vsub.f32 2.0, %v455_v17 }
 0x54d   :  { %v457_v27 = vmul.f32 %v4095_v13, %v456_v21 }
 0x54f   :  { %v4097_v14 = vpop.eup %4096  ;;  %v458_v31 = vmul.f32 %v4524_v44, %v457_v27 }
 0x550   :  { %v381_v15 = vmul.f32 %v4097_v14, %v379_v12  ;;  %v526_v16 = vpop.xlane.xlu0 %525  ;;  %v4099_v20 = vpop.eup %4098 }
 0x551   :  { %4100 = vrcp.f32 %v526_v16  ;;  %v602_v28 = vmul.f32 %v4099_v20, %v600_v11 }
 0x552   :  { %v382_v18 = vsub.f32 2.0, %v381_v15 }
 0x553   :  { %v603_v32 = vsub.f32 2.0, %v602_v28 }
 0x554   :  { %v383_v19 = vmul.f32 %v4097_v14, %v382_v18  ;;  %v4250_v14 = vmov 32.0  }
 0x555   :  { %v604_v39 = vmul.f32 %v4099_v20, %v603_v32  ;;  %v888_v32 = vld [vmem:[%s5568_s16] sm:$0xff] }
 0x556   :  { %v384_v22 = vmul.f32 %v4085_v50, %v383_v19 }
 0x557   :  { %v4101_v23 = vpop.eup %4100  ;;  %v605_v46 = vmul.f32 %v4522_v42, %v604_v39  ;;  %v940_v39 = vld [vmem:[%s5569_s18 + $0x68] sm:$0xff] }
 0x558   :  { %v528_v25 = vmul.f32 %v4101_v23, %v526_v16  ;;  %3786 = vmatmul.msk.f32.vlgmr.msrb.gmra.mxu2 %vm207_vm2, %v384_v22  ;;  %v673_v26 = vpop.xlane.xlu0 %672 }
 0x559   :  { %627 = vmatpush.msrb.mxu2 %v4003_v24  ;;  %4102 = vrcp.f32 %v673_v26  ;;  %v754_v37 = vpop.permute.xlu1 %753 }
 0x55a   :  { %v529_v29 = vsub.f32 2.0, %v528_v25 }
 0x55c   :  { %v530_v30 = vmul.f32 %v4101_v23, %v529_v29  ;;  %v891_v29 = vld [vmem:[%s5568_s16 + $0x18] sm:$0xff] }
 0x55e   :  { %v531_v34 = vmul.f32 %v4087_v56, %v530_v30  ;;  %v890_v30 = vld [vmem:[%s5568_s16 + $0x10] sm:$0xff] }
 0x55f   :  { %v4103_v35 = vpop.eup %4102 }
 0x560   :  { %v675_v38 = vmul.f32 %v4103_v35, %v673_v26  ;;  %3789 = vmatmul.msk.f32.vlgmr.msra.gmra.mxu2 %vm207_vm2, %v458_v31  ;;  %3792 = vmatmul.msk.f32.vlgmr.msrb.gmra.mxu0 %vm207_vm2, %v531_v34  ;;  %v747_v40 = vpop.xlane.xlu0 %746  ;;  %v889_v31 = vld [vmem:[%s5568_s16 + $0x8] sm:$0xff] }
 0x561   :  { %774 = vmatpush.msra.mxu2 %v754_v37  ;;  %4104 = vrcp.f32 %v747_v40  ;;  %914 = vmatpush.msrb.mxu0 %v891_v29 }
 0x562   :  { %v676_v43 = vsub.f32 2.0, %v675_v38  ;;  %4106 = vrcp.f32 %v4250_v14  ;;  %v942_v38 = vld [vmem:[%s5569_s18 + $0x78] sm:$0xff]  ;;  %v927_v14 = vld [vmem:[%s5569_s18] sm:$0xff] }
 0x563   :  { %915 = vmatpush.msrb.mxu0 %v890_v30  ;;  %947 = vmatpush.msra.mxu1 %v942_v38 }
 0x564   :  { %v677_v45 = vmul.f32 %v4103_v35, %v676_v43 }
 0x565   :  { %916 = vmatpush.msrb.mxu0 %v889_v31 }
 0x566   :  { %v678_v47 = vmul.f32 %v4532_v62, %v677_v45  ;;  %v786_v62 = vld [vmem:[%s5564_s12] sm:$0xff] }
 0x567   :  { %v4105_v44 = vpop.eup %4104  ;;  %815 = vmatpush.msrb.mxu3 %v786_v62  ;;  %917 = vmatpush.msrb.mxu0 %v888_v32 }
 0x568   :  { %v749_v48 = vmul.f32 %v4105_v44, %v747_v40  ;;  %3795 = vmatmul.msk.f32.vlgmr.msrb.gmra.mxu2 %vm207_vm2, %v605_v46  ;;  %3798 = vmatmul.msk.f32.vlgmr.msra.gmra.mxu0 %vm207_vm2, %v678_v47  ;;  %v4107_v15 = vpop.eup %4106  ;;  %v941_v40 = vld [vmem:[%s5569_s18 + $0x70] sm:$0xff]  ;;  %v939_v46 = vld [vmem:[%s5569_s18 + $0x60] sm:$0xff] }
 0x569   :  { %v834_v16 = vmul.f32 32.0, %v4107_v15  ;;  %vm838_vm6 = vweird.f32 %v4107_v15  ;;  %948 = vmatpush.msra.mxu1 %v941_v40 }
 0x56a   :  { %v750_v49 = vsub.f32 2.0, %v749_v48 }
 0x56b   :  { %v835_v17 = vsub.f32 1.0, %v834_v16  ;;  %949 = vmatpush.msra.mxu1 %v940_v39 }
 0x56c   :  { %v751_v50 = vmul.f32 %v4105_v44, %v750_v49  ;;  %v938_v49 = vld [vmem:[%s5569_s18 + $0x58] sm:$0xff] }
 0x56d   :  { %v836_v18 = vmul.f32 %v4107_v15, %v835_v17  ;;  %950 = vmatpush.msra.mxu1 %v939_v46  ;;  %v3808_v46 = vld [vmem:[%s5644_s27 + $0x30] sm:$0xff] }
 0x56e   :  { %v752_v51 = vmul.f32 %v4538_v2, %v751_v50 }
 0x56f   :  { %v837_v19 = vadd.f32 %v4107_v15, %v836_v18  ;;  %951 = vmatpush.msra.mxu1 %v938_v49 }
 0x570   :  { %3801 = vmatmul.msk.f32.vlgmr.msra.gmra.mxu2 %vm207_vm2, %v752_v51  ;;  %v937_v51 = vld [vmem:[%s5569_s18 + $0x50] sm:$0xff] }
 0x571   :  { %v4587_v20 = vsel %vm838_vm6, %v4107_v15, %v837_v19  ;;  %952 = vmatpush.msra.mxu1 %v937_v51  ;;  %v4042_v15 = vld [vmem:[%s5567_s17] ss:$0 sm:$0xff] }
 0x5c3   :  { %v339_v52 = vpop.f32.mrf.mxu2 }
 0x5c4   :  { %342 = vst.msk [vmem:[#allocation2 + $0x8] sm:$0xff] %vm207_vm2, %v339_v52 }
 0x5db   :  { %v408_v53 = vpop.f32.mrf.mxu2 }
 0x5dc   :  { %412 = vrot.lane.b32.xlu0 %v408_v53, %s5593_s28  ;;  %v936_v53 = vld [vmem:[%s5569_s18 + $0x48] sm:$0xff] }
 0x5dd   :  { %v555_v42 = vpop.f32.mrf.mxu0  ;;  %953 = vmatpush.msra.mxu1 %v936_v53 }
 0x5de   :  { %559 = vrot.lane.b32.xlu2 %v555_v42, %s5599_s30 }
 0x5e3   :  { %v482_v54 = vpop.f32.mrf.mxu2 }
 0x5e5   :  { %v702_v55 = vpop.f32.mrf.mxu0 }
 0x5e6   :  { %486 = vrot.lane.b32.xlu2 %v482_v54, %s5593_s28  ;;  %706 = vrot.lane.b32.xlu1 %v702_v55, %s5614_s26  ;;  %v935_v54 = vld [vmem:[%s5569_s18 + $0x40] sm:$0xff]  ;;  %s5654_s28 = smov 48  }
 0x5e7   :  { %954 = vmatpush.msra.mxu1 %v935_v54 }
 0x5eb   :  { %v629_v56 = vpop.f32.mrf.mxu2 }
 0x5ee   :  { %633 = vrot.lane.b32.xlu1 %v629_v56, %s5599_s30  ;;  %s5655_s30 = smov 8  }
 0x5f3   :  { %v776_v57 = vpop.f32.mrf.mxu2 }
 0x5f4   :  { %780 = vrot.lane.b32.xlu2 %v776_v57, %s5614_s26  ;;  %v934_v57 = vld [vmem:[%s5569_s18 + $0x38] sm:$0xff] }
 0x5f5   :  { %955 = vmatpush.msra.mxu1 %v934_v57 }
 0x5f7   :  { %956 = vmatpush.msra.mxu1 %v933_v61 }
 0x638   :  { %v560_v58 = vpop.permute.xlu2 %559 }
 0x640   :  { %v487_v63 = vpop.permute.xlu2 %486 }
 0x641   :  { %489 = vst.msk [vmem:[#allocation2 + $0x8] sm:$0xff] %vm415_vm3, %v487_v63 }
 0x64e   :  { %v413_v0 = vpop.permute.xlu0 %412  ;;  %v781_v4 = vpop.permute.xlu2 %780 }
 0x64f   :  { %416 = vst.msk [vmem:[#allocation2] sm:$0xff] %vm415_vm3, %v413_v0  ;;  %v4041_v0 = vld [vmem:[%s5566_s15] ss:$0 sm:$0xff] }
 0x650   :  { %563 = vst.msk [vmem:[#allocation2] sm:$0xff] %vm562_vm4, %v560_v58  ;;  %v4040_v58 = vld [vmem:[%s5565_s14] ss:$0 sm:$0xff] }
 0x658   :  { %v707_v1 = vpop.permute.xlu1 %706 }
 0x659   :  { %710 = vst.msk [vmem:[#allocation2] sm:$0xff] %vm709_vm5, %v707_v1  ;;  %v932_v1 = vld [vmem:[%s5569_s18 + $0x28] sm:$0xff] }
 0x65a   :  { %957 = vmatpush.msra.mxu1 %v932_v1  ;;  %v4045_v1 = vld [vmem:[%s5572_s21] ss:$0 sm:$0xff] }
 0x660   :  { %v634_v2 = vpop.permute.xlu1 %633  ;;  %v784_v3 = vld [vmem:[#allocation2] sm:$0xff] }
 0x661   :  { %636 = vst.msk [vmem:[#allocation2 + $0x8] sm:$0xff] %vm562_vm4, %v634_v2  ;;  %3802 = vmatmul.msk.f32.vlgmr.msrb.gmra.mxu3 %vm172_vm1, %v784_v3 }
 0x662   :  { %783 = vst.msk [vmem:[#allocation2 + $0x8] sm:$0xff] %vm709_vm5, %v781_v4  ;;  %v931_v4 = vld [vmem:[%s5569_s18 + $0x20] sm:$0xff] }
 0x663   :  { %958 = vmatpush.msra.mxu1 %v931_v4 }
 0x669   :  { %v785_v5 = vld [vmem:[#allocation2 + $0x8] sm:$0xff] }
 0x66a   :  { %3803 = vmatmul.msk.f32.gmra.mxu3 %vm172_vm1, %v785_v5 }
 0x6e4   :  { %v817_v7 = vpop.f32.mrf.mxu3 }
 0x6e5   :  { %v818_v8 = vadd.f32 %v4039_v6, %v817_v7  ;;  %v930_v7 = vld [vmem:[%s5569_s18 + $0x18] sm:$0xff] }
 0x6e6   :  { %959 = vmatpush.msra.mxu1 %v930_v7 }
 0x6e7   :  { %v823_v9 = vadd.f32 %v818_v8, %v4445_v33 }
 0x6e9   :  { %v827_v10 = vsel %vm172_vm1, %v823_v9, 0.0 }
 0x6ea   :  { %828 = vadd.xlane.f32.xlu0 %v827_v10 }
 0x6ed   :  { %v820_v11 = vpop.f32.mrf.mxu3 }
 0x6ee   :  { %v821_v41 = vadd.f32 %v4039_v6, %v820_v11 }
 0x6f0   :  { %v824_v12 = vadd.f32 %v821_v41, %v4449_v36 }
 0x6f2   :  { %v830_v13 = vsel %vm172_vm1, %v824_v12, 0.0 }
 0x6f3   :  { %831 = vadd.xlane.f32.xlu1 %v830_v13  ;;  %v928_v13 = vld [vmem:[%s5569_s18 + $0x8] sm:$0xff] }
 0x75d   :  { %v829_v33 = vpop.xlane.xlu0 %828 }
 0x75e   :  { %v840_v21 = vmul.f32 %v4587_v20, %v829_v33 }
 0x760   :  { %v842_v22 = vsub.f32 %v823_v9, %v840_v21 }
 0x762   :  { %v844_v23 = vmul.f32 %v842_v22, %v842_v22 }
 0x764   :  { %v846_v36 = vsel %vm172_vm1, %v844_v23, 0.0 }
 0x765   :  { %847 = vadd.xlane.f32.xlu2 %v846_v36 }
 0x766   :  { %v832_v24 = vpop.xlane.xlu1 %831 }
 0x767   :  { %v841_v25 = vmul.f32 %v4587_v20, %v832_v24 }
 0x769   :  { %v4592_v26 = vsub.f32 %v824_v12, %v841_v25  ;;  %v929_v12 = vld [vmem:[%s5569_s18 + $0x10] sm:$0xff] }
 0x76a   :  { %960 = vmatpush.msra.mxu1 %v929_v12 }
 0x76b   :  { %v845_v27 = vmul.f32 %v4592_v26, %v4592_v26 }
 0x76c   :  { %961 = vmatpush.msra.mxu1 %v928_v13 }
 0x76d   :  { %v849_v28 = vsel %vm172_vm1, %v845_v27, 0.0 }
 0x76e   :  { %850 = vadd.xlane.f32.xlu0 %v849_v28  ;;  %962 = vmatpush.msra.mxu1 %v927_v14 }
 0x7d8   :  { %v848_v34 = vpop.xlane.xlu2 %847 }
 0x7d9   :  { %v852_v35 = vmul.f32 %v848_v34, %v4587_v20 }
 0x7db   :  { %v854_v37 = vadd.f32 1e-05, %v852_v35 }
 0x7dd   :  { %4108 = vrsqrt.f32 %v854_v37  ;;  %vm862_vm8 = vweird.f32 %v854_v37 }
 0x7e1   :  { %v851_v43 = vpop.xlane.xlu0 %850 }
 0x7e2   :  { %v853_v45 = vmul.f32 %v851_v43, %v4587_v20 }
 0x7e3   :  { %v4109_v47 = vpop.eup %4108 }
 0x7e4   :  { %v857_v44 = vmul.f32 %v4109_v47, %v854_v37  ;;  %v855_v48 = vadd.f32 1e-05, %v853_v45  ;;  %vm863_vm7 = vweird.f32 %v4109_v47  ;;  %v3809_v45 = vld [vmem:[%s5644_s27 + $0x38] sm:$0xff] }
 0x7e5   :  { %vm864_vm9 = vmor %vm862_vm8, %vm863_vm7  ;;  %1056 = vmatpush.msrb.mxu2 %v3809_v45 }
 0x7e6   :  { %v858_v50 = vmul.f32 %v4109_v47, %v857_v44  ;;  %4110 = vrsqrt.f32 %v855_v48  ;;  %vm872_vm11 = vweird.f32 %v855_v48  ;;  %v3806_v44 = vld [vmem:[%s5644_s27 + $0x20] sm:$0xff] }
 0x7e7   :  { %1057 = vmatpush.msrb.mxu2 %v3808_v46 }
 0x7e8   :  { %v859_v52 = vmul.f32 0.5, %v858_v50 }
 0x7ea   :  { %v860_v42 = vsub.f32 1.5, %v859_v52 }
 0x7ec   :  { %v4111_v55 = vpop.eup %4110  ;;  %v861_v56 = vmul.f32 %v4109_v47, %v860_v42 }
 0x7ed   :  { %v867_v59 = vmul.f32 %v4111_v55, %v855_v48  ;;  %vm873_vm10 = vweird.f32 %v4111_v55 }
 0x7ee   :  { %v865_v60 = vsel %vm864_vm9, %v4109_v47, %v861_v56  ;;  %vm874_vm12 = vmor %vm872_vm11, %vm873_vm10  ;;  %v3807_v47 = vld [vmem:[%s5644_s27 + $0x28] sm:$0xff] }
 0x7ef   :  { %v876_v62 = vmul.f32 %v865_v60, %v842_v22  ;;  %v868_v63 = vmul.f32 %v4111_v55, %v867_v59  ;;  %v4043_v22 = vld [vmem:[%s5570_s19] ss:$0 sm:$0xff]  ;;  %1058 = vmatpush.msrb.mxu2 %v3807_v47 }
 0x7f0   :  { %v4044_v60 = vld [vmem:[%s5571_s20] ss:$0 sm:$0xff] }
 0x7f1   :  { %v881_v2 = vmul.f32 %v4040_v58, %v876_v62  ;;  %v869_v3 = vmul.f32 0.5, %v868_v63  ;;  %1059 = vmatpush.msrb.mxu2 %v3806_v44 }
 0x7f3   :  { %v870_v5 = vsub.f32 1.5, %v869_v3  ;;  %v886_v6 = vadd.f32 %v4041_v0, %v881_v2 }
 0x7f5   :  { %v871_v8 = vmul.f32 %v4111_v55, %v870_v5  ;;  %3804 = vmatmul.msk.f32.vlgmr.msrb.gmra.mxu0 %vm172_vm1, %v886_v6 }
 0x7f7   :  { %v875_v9 = vsel %vm874_vm12, %v4111_v55, %v871_v8 }
 0x7f8   :  { %v877_v10 = vmul.f32 %v875_v9, %v4592_v26 }
 0x7fa   :  { %v882_v11 = vmul.f32 %v4040_v58, %v877_v10 }
 0x7fc   :  { %v887_v41 = vadd.f32 %v4041_v0, %v882_v11  ;;  %v4046_v11 = vld [vmem:[%s5562_s11 + $0x1] ss:$0 sm:$0xff] }
 0x7fe   :  { %3805 = vmatmul.msk.f32.gmra.mxu0 %vm172_vm1, %v887_v41 }
 0x872   :  { %v919_v16 = vpop.f32.mrf.mxu0 }
 0x873   :  { %v920_v17 = vadd.f32 %v4042_v15, %v919_v16 }
 0x875   :  { %v925_v18 = vmax.f32 %v920_v17, 0.0 }
 0x877   :  { %963 = vmatmul.f32.vlgmr.msra.gmra.mxu1 %v925_v18 }
 0x87b   :  { %v922_v19 = vpop.f32.mrf.mxu0 }
 0x87c   :  { %v923_v33 = vadd.f32 %v4042_v15, %v922_v19 }
 0x87e   :  { %v926_v21 = vmax.f32 %v923_v33, 0.0 }
 0x880   :  { %966 = vmatmul.f32.gmra.mxu1 %v926_v21 }
 0x8f4   :  { %v964_v23 = vpop.f32.mrf.mxu1 }
 0x8f5   :  { %v965_v36 = vadd.f32 %v4043_v22, %v964_v23 }
 0x8f7   :  { %v970_v24 = vadd.f32 %v965_v36, %v886_v6 }
 0x8f9   :  { %v974_v25 = vsel %vm172_vm1, %v970_v24, 0.0 }
 0x8fa   :  { %975 = vadd.xlane.f32.xlu1 %v974_v25 }
 0x8fd   :  { %v967_v26 = vpop.f32.mrf.mxu1 }
 0x8fe   :  { %v968_v27 = vadd.f32 %v4043_v22, %v967_v26 }
 0x900   :  { %v971_v28 = vadd.f32 %v968_v27, %v887_v41 }
 0x902   :  { %v977_v29 = vsel %vm172_vm1, %v971_v28, 0.0 }
 0x903   :  { %978 = vadd.xlane.f32.xlu2 %v977_v29 }
 0x96d   :  { %v976_v30 = vpop.xlane.xlu1 %975 }
 0x96e   :  { %v980_v31 = vmul.f32 %v976_v30, %v4587_v20 }
 0x970   :  { %v982_v32 = vsub.f32 %v970_v24, %v980_v31 }
 0x972   :  { %v984_v34 = vmul.f32 %v982_v32, %v982_v32 }
 0x974   :  { %v986_v35 = vsel %vm172_vm1, %v984_v34, 0.0 }
 0x975   :  { %987 = vadd.xlane.f32.xlu0 %v986_v35 }
 0x976   :  { %v979_v37 = vpop.xlane.xlu2 %978 }
 0x977   :  { %v981_v38 = vmul.f32 %v979_v37, %v4587_v20 }
 0x979   :  { %v983_v40 = vsub.f32 %v971_v28, %v981_v38 }
 0x97b   :  { %v985_v39 = vmul.f32 %v983_v40, %v983_v40 }
 0x97d   :  { %v989_v43 = vsel %vm172_vm1, %v985_v39, 0.0 }
 0x97e   :  { %990 = vadd.xlane.f32.xlu1 %v989_v43 }
 0x9e8   :  { %v988_v48 = vpop.xlane.xlu0 %987 }
 0x9e9   :  { %v992_v49 = vmul.f32 %v988_v48, %v4587_v20 }
 0x9eb   :  { %v994_v50 = vadd.f32 1e-05, %v992_v49 }
 0x9ed   :  { %4112 = vrsqrt.f32 %v994_v50  ;;  %vm1002_vm14 = vweird.f32 %v994_v50 }
 0x9f1   :  { %v991_v51 = vpop.xlane.xlu1 %990 }
 0x9f2   :  { %v993_v52 = vmul.f32 %v991_v51, %v4587_v20 }
 0x9f3   :  { %v4113_v53 = vpop.eup %4112 }
 0x9f4   :  { %v997_v42 = vmul.f32 %v4113_v53, %v994_v50  ;;  %v995_v54 = vadd.f32 1e-05, %v993_v52  ;;  %vm1003_vm13 = vweird.f32 %v4113_v53 }
 0x9f5   :  { %vm1004_vm15 = vmor %vm1002_vm14, %vm1003_vm13 }
 0x9f6   :  { %v998_v55 = vmul.f32 %v4113_v53, %v997_v42  ;;  %4114 = vrsqrt.f32 %v995_v54  ;;  %vm1012_vm7 = vweird.f32 %v995_v54 }
 0x9f8   :  { %v999_v56 = vmul.f32 0.5, %v998_v55 }
 0x9fa   :  { %v1000_v57 = vsub.f32 1.5, %v999_v56 }
 0x9fc   :  { %v4115_v58 = vpop.eup %4114  ;;  %v1001_v59 = vmul.f32 %v4113_v53, %v1000_v57 }
 0x9fd   :  { %v1007_v61 = vmul.f32 %v4115_v58, %v995_v54  ;;  %vm1013_vm6 = vweird.f32 %v4115_v58 }
 0x9fe   :  { %v1005_v62 = vsel %vm1004_vm15, %v4113_v53, %v1001_v59  ;;  %vm1014_vm8 = vmor %vm1012_vm7, %vm1013_vm6 }
 0x9ff   :  { %v1016_v63 = vmul.f32 %v1005_v62, %v982_v32  ;;  %v1008_v0 = vmul.f32 %v4115_v58, %v1007_v61 }
 0xa01   :  { %v1021_v2 = vmul.f32 %v4044_v60, %v1016_v63  ;;  %v1009_v3 = vmul.f32 0.5, %v1008_v0 }
 0xa03   :  { %v1010_v4 = vsub.f32 1.5, %v1009_v3  ;;  %v4700_v5 = vadd.f32 %v4045_v1, %v1021_v2 }
 0xa05   :  { %v1011_v6 = vmul.f32 %v4115_v58, %v1010_v4  ;;  %3811 = vmatmul.msk.f32.vlgmr.msrb.gmra.mxu2 %vm172_vm1, %v4700_v5 }
 0xa07   :  { %v1015_v7 = vsel %vm1014_vm8, %v4115_v58, %v1011_v6 }
 0xa08   :  { %v1017_v8 = vmul.f32 %v1015_v7, %v983_v40 }
 0xa0a   :  { %v1022_v9 = vmul.f32 %v4044_v60, %v1017_v8 }
 0xa0c   :  { %v4704_v10 = vadd.f32 %v4045_v1, %v1022_v9 }
 0xa0e   :  { %3812 = vmatmul.msk.f32.gmra.mxu2 %vm172_vm1, %v4704_v10 }
 0xa88   :  { %v1061_v41 = vpop.f32.mrf.mxu2 }
 0xa89   :  { %v4711_v12 = vadd.f32 %v4046_v11, %v1061_v41 }
 0xa8b   :  { %1070 = vrot.lane.b32.xlu2 %v4711_v12, %s5605_s24  ;;  %v4722_v15 = vmul.f32 0.35355338, %v4711_v12 }
 0xa91   :  { %v1064_v13 = vpop.f32.mrf.mxu2 }
 0xa92   :  { %v4715_v14 = vadd.f32 %v4046_v11, %v1064_v13 }
 0xa93   :  { %1111 = vrot.lane.b32.xlu2 %v4711_v12, %s5601_s5 }
 0xa94   :  { %1139 = vrot.lane.b32.xlu0 %v4715_v14, %s5605_s24  ;;  %v4736_v22 = vmul.f32 0.35355338, %v4715_v14  ;;  %s5657_s24 = smov 88  }
 0xa9b   :  { %1207 = vrot.lane.b32.xlu2 %v4722_v15, %s5603_s2 }
 0xaa3   :  { %1180 = vrot.lane.b32.xlu2 %v4715_v14, %s5601_s5  ;;  %s5656_s5 = smov 16  }
 0xaab   :  { %1282 = vrot.lane.b32.xlu2 %v4715_v14, %s5607_s1 }
 0xae5   :  { %v1071_v16 = vpop.permute.xlu2 %1070 }
 0xae6   :  { %3813 = vmatpush.xpose.msk.msra.mxu3 %vm207_vm2, %v1071_v16 }
 0xae9   :  { %3814 = vmatmul.msk.f32.vlgmr.msra.gmra.mxu3 %vm207_vm2, %v4722_v15 }
 0xaed   :  { %v1112_v17 = vpop.permute.xlu2 %1111 }
 0xaee   :  { %1132 = vmatpush.msra.mxu0 %v1112_v17 }
 0xaf5   :  { %v1208_v18 = vpop.permute.xlu2 %1207 }
 0xafd   :  { %v1181_v19 = vpop.permute.xlu2 %1180 }
 0xafe   :  { %1201 = vmatpush.msrb.mxu3 %v1181_v19 }
 0xb05   :  { %v1283_v33 = vpop.permute.xlu2 %1282 }
 0xb06   :  { %v1140_v21 = vpop.permute.xlu0 %1139  ;;  %3822 = vmatpush.xpose.msk.msra.mxu3 %vm207_vm2, %v1283_v33 }
 0xb07   :  { %3816 = vmatpush.xpose.msk.msra.mxu2 %vm207_vm2, %v1140_v21 }
 0xb0a   :  { %3817 = vmatmul.msk.f32.vlgmr.msra.gmra.mxu2 %vm207_vm2, %v4736_v22 }
 0xb6c   :  { %v1094_v23 = vpop.f32.mrf.mxu3 }
 0xb6d   :  { %v1097_v36 = vsel %vm207_vm2, %v1094_v23, -inf }
 0xb6e   :  { %1098 = vmax.xlane.f32.xlu1 %v1097_v36 }
 0xb8d   :  { %v1163_v24 = vpop.f32.mrf.mxu2 }
 0xb8e   :  { %v1166_v25 = vsel %vm207_vm2, %v1163_v24, -inf }
 0xb8f   :  { %1167 = vmax.xlane.f32.xlu1 %v1166_v25 }
 0xbe1   :  { %v1099_v26 = vpop.xlane.xlu1 %1098 }
 0xbe2   :  { %v1100_v27 = vsub.f32 %v1094_v23, %v1099_v26 }
 0xbe4   :  { %v1101_v28 = vmul.f32 1.442695, %v1100_v27 }
 0xbe6   :  { %4116 = vpow2.f32 %v1101_v28 }
 0xbec   :  { %v4117_v29 = vpop.eup %4116 }
 0xbed   :  { %v1103_v30 = vsel %vm207_vm2, %v4117_v29, 0.0 }
 0xbee   :  { %1104 = vadd.xlane.f32.xlu1 %v1103_v30 }
 0xc02   :  { %v1168_v31 = vpop.xlane.xlu1 %1167 }
 0xc03   :  { %v1169_v32 = vsub.f32 %v1163_v24, %v1168_v31 }
 0xc05   :  { %v1170_v34 = vmul.f32 1.442695, %v1169_v32 }
 0xc07   :  { %4118 = vpow2.f32 %v1170_v34  ;;  %1209 = vrot.lane.b32.xlu1 %v4711_v12, %s5607_s1  ;;  %s5660_s1 = smov 64  }
 0xc0d   :  { %v4119_v35 = vpop.eup %4118 }
 0xc0e   :  { %v1172_v37 = vsel %vm207_vm2, %v4119_v35, 0.0 }
 0xc0f   :  { %1280 = vrot.lane.b32.xlu1 %v4736_v22, %s5603_s2  ;;  %1173 = vadd.xlane.f32.xlu0 %v1172_v37  ;;  %s5662_s2 = smov 56  }
 0xc23   :  { %1249 = vrot.lane.b32.xlu0 %v4711_v12, %s5648_s23 }
 0xc61   :  { %v1105_v38 = vpop.xlane.xlu1 %1104 }
 0xc62   :  { %4120 = vrcp.f32 %v1105_v38 }
 0xc68   :  { %v4121_v40 = vpop.eup %4120 }
 0xc69   :  { %v1107_v39 = vmul.f32 %v4121_v40, %v1105_v38 }
 0xc6b   :  { %v1108_v43 = vsub.f32 2.0, %v1107_v39 }
 0xc6d   :  { %v1109_v45 = vmul.f32 %v4121_v40, %v1108_v43 }
 0xc6f   :  { %v1110_v46 = vmul.f32 %v4117_v29, %v1109_v45 }
 0xc71   :  { %3815 = vmatmul.msk.f32.vlgmr.msra.gmra.mxu0 %vm207_vm2, %v1110_v46 }
 0xc79   :  { %v1210_v47 = vpop.permute.xlu1 %1209 }
 0xc7a   :  { %3819 = vmatpush.xpose.msk.msrb.mxu0 %vm207_vm2, %v1210_v47 }
 0xc7d   :  { %3820 = vmatmul.msk.f32.vlgmr.msrb.gmra.mxu0 %vm207_vm2, %v1208_v18 }
 0xc81   :  { %v1281_v42 = vpop.permute.xlu1 %1280 }
 0xc82   :  { %v1174_v44 = vpop.xlane.xlu0 %1173 }
 0xc83   :  { %4122 = vrcp.f32 %v1174_v44 }
 0xc89   :  { %v4123_v48 = vpop.eup %4122 }
 0xc8a   :  { %v1176_v49 = vmul.f32 %v4123_v48, %v1174_v44 }
 0xc8c   :  { %v1177_v50 = vsub.f32 2.0, %v1176_v49 }
 0xc8e   :  { %v1178_v51 = vmul.f32 %v4123_v48, %v1177_v50 }
 0xc90   :  { %v1179_v52 = vmul.f32 %v4119_v35, %v1178_v51 }
 0xc92   :  { %3818 = vmatmul.msk.f32.vlgmr.msrb.gmra.mxu3 %vm207_vm2, %v1179_v52 }
 0xc95   :  { %v1250_v53 = vpop.permute.xlu0 %1249 }
 0xc96   :  { %1270 = vmatpush.msrb.mxu2 %v1250_v53 }
 0xc9a   :  { %3823 = vmatmul.msk.f32.vlgmr.msra.gmra.mxu3 %vm207_vm2, %v1281_v42 }
 0xcee   :  { %v1134_v54 = vpop.f32.mrf.mxu0 }
 0xcef   :  { %1137 = vst.msk [vmem:[#allocation2] sm:$0xff] %vm207_vm2, %v1134_v54 }
 0xcfa   :  { %v1232_v55 = vpop.f32.mrf.mxu0 }
 0xcfb   :  { %v1235_v56 = vsel %vm207_vm2, %v1232_v55, -inf }
 0xcfc   :  { %1236 = vmax.xlane.f32.xlu2 %v1235_v56 }
 0xd14   :  { %1355 = vrot.lane.b32.xlu2 %v4711_v12, %s5649_s4 }
 0xd15   :  { %v1203_v57 = vpop.f32.mrf.mxu3 }
 0xd16   :  { %1206 = vst.msk [vmem:[#allocation2 + $0x8] sm:$0xff] %vm207_vm2, %v1203_v57 }
 0xd1c   :  { %1501 = vrot.lane.b32.xlu2 %v4711_v12, %s5650_s29 }
 0xd1d   :  { %v1305_v58 = vpop.f32.mrf.mxu3 }
 0xd1e   :  { %v1308_v59 = vsel %vm207_vm2, %v1305_v58, -inf }
 0xd1f   :  { %1309 = vmax.xlane.f32.xlu1 %v1308_v59 }
 0xd24   :  { %1322 = vrot.lane.b32.xlu2 %v4715_v14, %s5648_s23  ;;  %s5663_s23 = smov 40  }
 0xd2c   :  { %1574 = vrot.lane.b32.xlu2 %v4715_v14, %s5650_s29 }
 0xd38   :  { %1353 = vrot.lane.b32.xlu1 %v4722_v15, %s5651_s10 }
 0xd40   :  { %1499 = vrot.lane.b32.xlu1 %v4722_v15, %s5652_s25 }
 0xd48   :  { %1426 = vrot.lane.b32.xlu1 %v4736_v22, %s5651_s10 }
 0xd50   :  { %1572 = vrot.lane.b32.xlu1 %v4736_v22, %s5652_s25  ;;  %s5665_s25 = smov 8  }
 0xd6f   :  { %v1237_v60 = vpop.xlane.xlu2 %1236 }
 0xd70   :  { %v1238_v61 = vsub.f32 %v1232_v55, %v1237_v60 }
 0xd72   :  { %v1239_v62 = vmul.f32 1.442695, %v1238_v61 }
 0xd74   :  { %4124 = vpow2.f32 %v1239_v62 }
 0xd77   :  { %v1356_v63 = vpop.permute.xlu2 %1355 }
 0xd78   :  { %3825 = vmatpush.xpose.msk.msra.mxu2 %vm207_vm2, %v1356_v63 }
 0xd7a   :  { %v4125_v0 = vpop.eup %4124 }
 0xd7b   :  { %v1241_v1 = vsel %vm207_vm2, %v4125_v0, 0.0 }
 0xd7c   :  { %1242 = vadd.xlane.f32.xlu0 %v1241_v1 }
 0xd7f   :  { %v1502_v2 = vpop.permute.xlu2 %1501 }
 0xd87   :  { %v1323_v3 = vpop.permute.xlu2 %1322 }
 0xd88   :  { %1343 = vmatpush.msra.mxu0 %v1323_v3 }
 0xd8f   :  { %v1575_v26 = vpop.permute.xlu2 %1574 }
 0xd92   :  { %v1310_v4 = vpop.xlane.xlu1 %1309 }
 0xd93   :  { %v1311_v6 = vsub.f32 %v1305_v58, %v1310_v4 }
 0xd95   :  { %v1312_v7 = vmul.f32 1.442695, %v1311_v6 }
 0xd97   :  { %4126 = vpow2.f32 %v1312_v7 }
 0xd9d   :  { %v4127_v8 = vpop.eup %4126 }
 0xd9e   :  { %v1314_v9 = vsel %vm207_vm2, %v4127_v8, 0.0 }
 0xd9f   :  { %1315 = vadd.xlane.f32.xlu0 %v1314_v9 }
 0xdaa   :  { %v1354_v18 = vpop.permute.xlu1 %1353 }
 0xdb2   :  { %v1500_v19 = vpop.permute.xlu1 %1499 }
 0xdb3   :  { %1428 = vrot.lane.b32.xlu0 %v4715_v14, %s5649_s4 }
 0xdba   :  { %v1427_v27 = vpop.permute.xlu1 %1426 }
 0xdc2   :  { %v1573_v28 = vpop.permute.xlu1 %1572 }
 0xdef   :  { %v1243_v11 = vpop.xlane.xlu0 %1242 }
 0xdf0   :  { %4128 = vrcp.f32 %v1243_v11 }
 0xdf6   :  { %v4129_v41 = vpop.eup %4128 }
 0xdf7   :  { %v1245_v13 = vmul.f32 %v4129_v41, %v1243_v11 }
 0xdf9   :  { %v1246_v15 = vsub.f32 2.0, %v1245_v13 }
 0xdfb   :  { %v1247_v16 = vmul.f32 %v4129_v41, %v1246_v15 }
 0xdfd   :  { %v1248_v17 = vmul.f32 %v4125_v0, %v1247_v16 }
 0xdff   :  { %3821 = vmatmul.msk.f32.vlgmr.msrb.gmra.mxu2 %vm207_vm2, %v1248_v17 }
 0xe00   :  { %3831 = vmatpush.xpose.msk.msrb.mxu2 %vm207_vm2, %v1502_v2 }
 0xe07   :  { %3826 = vmatmul.msk.f32.vlgmr.msra.gmra.mxu2 %vm207_vm2, %v1354_v18 }
 0xe0f   :  { %3832 = vmatmul.msk.f32.vlgmr.msrb.gmra.mxu2 %vm207_vm2, %v1500_v19 }
 0xe12   :  { %v1316_v33 = vpop.xlane.xlu0 %1315 }
 0xe13   :  { %4130 = vrcp.f32 %v1316_v33 }
 0xe19   :  { %v4131_v21 = vpop.eup %4130 }
 0xe1a   :  { %v1318_v22 = vmul.f32 %v4131_v21, %v1316_v33 }
 0xe1c   :  { %v1319_v23 = vsub.f32 2.0, %v1318_v22 }
 0xe1e   :  { %v1320_v36 = vmul.f32 %v4131_v21, %v1319_v23 }
 0xe20   :  { %v1321_v24 = vmul.f32 %v4127_v8, %v1320_v36 }
 0xe22   :  { %3824 = vmatmul.msk.f32.vlgmr.msra.gmra.mxu0 %vm207_vm2, %v1321_v24 }
 0xe25   :  { %v1429_v25 = vpop.permute.xlu0 %1428 }
 0xe26   :  { %3828 = vmatpush.xpose.msk.msrb.mxu0 %vm207_vm2, %v1429_v25 }
 0xe2a   :  { %3834 = vmatpush.xpose.msk.msra.mxu0 %vm207_vm2, %v1575_v26 }
 0xe2b   :  { %3829 = vmatmul.msk.f32.vlgmr.msrb.gmra.mxu0 %vm207_vm2, %v1427_v27 }
 0xe33   :  { %3835 = vmatmul.msk.f32.vlgmr.msra.gmra.mxu0 %vm207_vm2, %v1573_v28 }
 0xe82   :  { %v1272_v29 = vpop.f32.mrf.mxu2 }
 0xe8a   :  { %v1378_v30 = vpop.f32.mrf.mxu2 }
 0xe8b   :  { %v1381_v31 = vsel %vm207_vm2, %v1378_v30, -inf }
 0xe8c   :  { %1382 = vmax.xlane.f32.xlu2 %v1381_v31 }
 0xe92   :  { %v1524_v32 = vpop.f32.mrf.mxu2 }
 0xe93   :  { %v1527_v34 = vsel %vm207_vm2, %v1524_v32, -inf }
 0xe94   :  { %1528 = vmax.xlane.f32.xlu1 %v1527_v34  ;;  %v3839_v34 = vld [vmem:[%s5564_s12 + $0x30] sm:$0xff] }
 0xe9f   :  { %v1345_v35 = vpop.f32.mrf.mxu0 }
 0xea8   :  { %v1451_v37 = vpop.f32.mrf.mxu0 }
 0xea9   :  { %v1454_v38 = vsel %vm207_vm2, %v1451_v37, -inf }
 0xeaa   :  { %1455 = vmax.xlane.f32.xlu0 %v1454_v38 }
 0xeb0   :  { %v1597_v40 = vpop.f32.mrf.mxu0 }
 0xeb1   :  { %v1600_v39 = vsel %vm207_vm2, %v1597_v40, -inf }
 0xeb2   :  { %1601 = vmax.xlane.f32.xlu2 %v1600_v39 }
 0xebe   :  { %1541 = vrot.lane.b32.xlu0 %v4711_v12, %s5653_s3 }
 0xeff   :  { %v1383_v43 = vpop.xlane.xlu2 %1382 }
 0xf00   :  { %v1384_v45 = vsub.f32 %v1378_v30, %v1383_v43 }
 0xf02   :  { %v1385_v46 = vmul.f32 1.442695, %v1384_v45 }
 0xf04   :  { %4132 = vpow2.f32 %v1385_v46 }
 0xf07   :  { %v1529_v47 = vpop.xlane.xlu1 %1528 }
 0xf08   :  { %v1530_v44 = vsub.f32 %v1524_v32, %v1529_v47  ;;  %v3840_v32 = vld [vmem:[%s5564_s12 + $0x38] sm:$0xff]  ;;  %v4047_v47 = vld [vmem:[%s5563_s13 + $0x1] ss:$0 sm:$0xff] }
 0xf09   :  { %1675 = vmatpush.msra.mxu2 %v3840_v32 }
 0xf0a   :  { %v4133_v48 = vpop.eup %4132  ;;  %v1531_v49 = vmul.f32 1.442695, %v1530_v44 }
 0xf0b   :  { %v1387_v50 = vsel %vm207_vm2, %v4133_v48, 0.0  ;;  %1676 = vmatpush.msra.mxu2 %v3839_v34  ;;  %v3858_v34 = vld [vmem:[%s5569_s18 + $0xa8] sm:$0xff] }
 0xf0c   :  { %4134 = vpow2.f32 %v1531_v49  ;;  %1388 = vadd.xlane.f32.xlu1 %v1387_v50 }
 0xf12   :  { %v4135_v51 = vpop.eup %4134 }
 0xf13   :  { %v1533_v52 = vsel %vm207_vm2, %v4135_v51, 0.0 }
 0xf14   :  { %1534 = vadd.xlane.f32.xlu2 %v1533_v52 }
 0xf1d   :  { %v1456_v53 = vpop.xlane.xlu0 %1455 }
 0xf1e   :  { %v1457_v42 = vsub.f32 %v1451_v37, %v1456_v53  ;;  %v3837_v37 = vld [vmem:[%s5564_s12 + $0x20] sm:$0xff] }
 0xf20   :  { %v1458_v54 = vmul.f32 1.442695, %v1457_v42 }
 0xf22   :  { %4136 = vpow2.f32 %v1458_v54 }
 0xf25   :  { %v1602_v55 = vpop.xlane.xlu2 %1601  ;;  %1395 = vrot.lane.b32.xlu1 %v4711_v12, %s5654_s28 }
 0xf26   :  { %v1603_v56 = vsub.f32 %v1597_v40, %v1602_v55 }
 0xf28   :  { %v4137_v57 = vpop.eup %4136  ;;  %v1604_v58 = vmul.f32 1.442695, %v1603_v56 }
 0xf29   :  { %v1460_v59 = vsel %vm207_vm2, %v4137_v57, 0.0 }
 0xf2a   :  { %4138 = vpow2.f32 %v1604_v58  ;;  %1461 = vadd.xlane.f32.xlu0 %v1460_v59 }
 0xf2d   :  { %1276 = vrot.lane.b32.xlu1 %v1272_v29, %s5655_s30 }
 0xf30   :  { %v4139_v60 = vpop.eup %4138  ;;  %v1542_v6 = vpop.permute.xlu0 %1541 }
 0xf31   :  { %v1606_v61 = vsel %vm207_vm2, %v4139_v60, 0.0 }
 0xf32   :  { %1607 = vadd.xlane.f32.xlu2 %v1606_v61 }
 0xf35   :  { %1349 = vrot.lane.b32.xlu1 %v1345_v35, %s5655_s30  ;;  %v3838_v35 = vld [vmem:[%s5564_s12 + $0x28] sm:$0xff]  ;;  %s5661_s30 = smov 104  }
 0xf36   :  { %1677 = vmatpush.msra.mxu2 %v3838_v35 }
 0xf38   :  { %1678 = vmatpush.msra.mxu2 %v3837_v37  ;;  %v3857_v37 = vld [vmem:[%s5569_s18 + $0xa0] sm:$0xff] }
 0xf3e   :  { %1614 = vrot.lane.b32.xlu0 %v4715_v14, %s5653_s3  ;;  %s5666_s3 = smov 24  }
 0xf4a   :  { %1468 = vrot.lane.b32.xlu2 %v4715_v14, %s5654_s28 }
 0xf7f   :  { %v1389_v12 = vpop.xlane.xlu1 %1388 }
 0xf80   :  { %4140 = vrcp.f32 %v1389_v12 }
 0xf86   :  { %v4141_v63 = vpop.eup %4140 }
 0xf87   :  { %v1535_v62 = vpop.xlane.xlu2 %1534  ;;  %v1391_v0 = vmul.f32 %v4141_v63, %v1389_v12  ;;  %v3849_v12 = vld [vmem:[%s5568_s16 + $0x38] sm:$0xff] }
 0xf88   :  { %4142 = vrcp.f32 %v1535_v62 }
 0xf89   :  { %v1392_v1 = vsub.f32 2.0, %v1391_v0  ;;  %v3846_v0 = vld [vmem:[%s5568_s16 + $0x20] sm:$0xff] }
 0xf8b   :  { %v1393_v3 = vmul.f32 %v4141_v63, %v1392_v1  ;;  %v3847_v63 = vld [vmem:[%s5568_s16 + $0x28] sm:$0xff] }
 0xf8d   :  { %v1394_v7 = vmul.f32 %v4133_v48, %v1393_v3 }
 0xf8e   :  { %v4143_v2 = vpop.eup %4142 }
 0xf8f   :  { %v1537_v4 = vmul.f32 %v4143_v2, %v1535_v62  ;;  %v3848_v62 = vld [vmem:[%s5568_s16 + $0x30] sm:$0xff] }
 0xf91   :  { %v1538_v8 = vsub.f32 2.0, %v1537_v4 }
 0xf93   :  { %v1539_v11 = vmul.f32 %v4143_v2, %v1538_v8  ;;  %v3867_v8 = vld [vmem:[%s5569_s18 + $0xf0] sm:$0xff] }
 0xf95   :  { %v1540_v41 = vmul.f32 %v4135_v51, %v1539_v11  ;;  %v3866_v11 = vld [vmem:[%s5569_s18 + $0xe8] sm:$0xff] }
 0xf97   :  { %v1396_v9 = vpop.permute.xlu1 %1395 }
 0xf98   :  { %1416 = vmatpush.msrb.mxu3 %v1396_v9 }
 0xf99   :  { %3827 = vmatmul.msk.f32.vlgmr.msrb.gmra.mxu3 %vm207_vm2, %v1394_v7  ;;  %v3868_v7 = vld [vmem:[%s5569_s18 + $0xf8] sm:$0xff] }
 0xf9a   :  { %1562 = vmatpush.msra.mxu3 %v1542_v6  ;;  %1809 = vmatpush.msrb.mxu0 %v3868_v7 }
 0xf9c   :  { %1774 = vmatpush.msrb.mxu3 %v3849_v12  ;;  %1810 = vmatpush.msrb.mxu0 %v3867_v8 }
 0xf9d   :  { %v1462_v14 = vpop.xlane.xlu0 %1461 }
 0xf9e   :  { %4144 = vrcp.f32 %v1462_v14  ;;  %1775 = vmatpush.msrb.mxu3 %v3848_v62  ;;  %1811 = vmatpush.msrb.mxu0 %v3866_v11  ;;  %v1894_v11 = vld [vmem:[%s5574_s6 + $0x10] sm:$0xff] }
 0xf9f   :  { %v1277_v13 = vpop.permute.xlu1 %1276 }
 0xfa0   :  { %1279 = vst.msk [vmem:[#allocation2] sm:$0xff] %vm415_vm3, %v1277_v13  ;;  %1776 = vmatpush.msrb.mxu3 %v3847_v63 }
 0xfa1   :  { %3833 = vmatmul.msk.f32.vlgmr.msra.gmra.mxu3 %vm207_vm2, %v1540_v41 }
 0xfa2   :  { %1777 = vmatpush.msrb.mxu3 %v3846_v0 }
 0xfa4   :  { %v4145_v15 = vpop.eup %4144 }
 0xfa5   :  { %v1464_v16 = vmul.f32 %v4145_v15, %v1462_v14  ;;  %v1608_v17 = vpop.xlane.xlu2 %1607 }
 0xfa6   :  { %4146 = vrcp.f32 %v1608_v17 }
 0xfa7   :  { %v1465_v18 = vsub.f32 2.0, %v1464_v16  ;;  %v1350_v19 = vpop.permute.xlu1 %1349 }
 0xfa8   :  { %1352 = vst.msk [vmem:[#allocation2 + $0x8] sm:$0xff] %vm415_vm3, %v1350_v19 }
 0xfa9   :  { %v1466_v33 = vmul.f32 %v4145_v15, %v1465_v18  ;;  %v3865_v15 = vld [vmem:[%s5569_s18 + $0xe0] sm:$0xff]  ;;  %v3864_v18 = vld [vmem:[%s5569_s18 + $0xd8] sm:$0xff] }
 0xfaa   :  { %1812 = vmatpush.msrb.mxu0 %v3865_v15  ;;  %v1892_v15 = vld [vmem:[%s5574_s6] sm:$0xff] }
 0xfab   :  { %v1467_v22 = vmul.f32 %v4137_v57, %v1466_v33  ;;  %v3863_v33 = vld [vmem:[%s5569_s18 + $0xd0] sm:$0xff] }
 0xfac   :  { %v4147_v21 = vpop.eup %4146  ;;  %1813 = vmatpush.msrb.mxu0 %v3864_v18 }
 0xfad   :  { %v1610_v23 = vmul.f32 %v4147_v21, %v1608_v17  ;;  %v1469_v36 = vpop.permute.xlu2 %1468 }
 0xfae   :  { %1489 = vmatpush.msrb.mxu1 %v1469_v36  ;;  %1814 = vmatpush.msrb.mxu0 %v3863_v33 }
 0xfaf   :  { %v1611_v24 = vsub.f32 2.0, %v1610_v23  ;;  %3830 = vmatmul.msk.f32.vlgmr.msrb.gmra.mxu1 %vm207_vm2, %v1467_v22  ;;  %v3862_v23 = vld [vmem:[%s5569_s18 + $0xc8] sm:$0xff] }
 0xfb0   :  { %v1615_v25 = vpop.permute.xlu0 %1614  ;;  %1815 = vmatpush.msrb.mxu0 %v3862_v23 }
 0xfb1   :  { %v1612_v26 = vmul.f32 %v4147_v21, %v1611_v24  ;;  %1635 = vmatpush.msra.mxu1 %v1615_v25  ;;  %v4048_v21 = vld [vmem:[%s5565_s14 + $0x1] ss:$0 sm:$0xff] }
 0xfb2   :  { %v4049_v24 = vld [vmem:[%s5566_s15 + $0x1] ss:$0 sm:$0xff] }
 0xfb3   :  { %v1613_v27 = vmul.f32 %v4139_v60, %v1612_v26  ;;  %v3861_v25 = vld [vmem:[%s5569_s18 + $0xc0] sm:$0xff] }
 0xfb4   :  { %1816 = vmatpush.msrb.mxu0 %v3861_v25 }
 0xfb7   :  { %3836 = vmatmul.msk.f32.vlgmr.msra.gmra.mxu1 %vm207_vm2, %v1613_v27 }
0x101c   :  { %v1418_v28 = vpop.f32.mrf.mxu3 }
0x101d   :  { %1422 = vrot.lane.b32.xlu0 %v1418_v28, %s5656_s5  ;;  %v3860_v28 = vld [vmem:[%s5569_s18 + $0xb8] sm:$0xff] }
0x101e   :  { %1817 = vmatpush.msrb.mxu0 %v3860_v28  ;;  %v1936_v28 = vld [vmem:[%s5575_s8 + $0x28] sm:$0xff] }
0x1024   :  { %v1564_v29 = vpop.f32.mrf.mxu3 }
0x1025   :  { %1568 = vrot.lane.b32.xlu2 %v1564_v29, %s5614_s26 }
0x102c   :  { %v1491_v30 = vpop.f32.mrf.mxu1 }
0x102d   :  { %1495 = vrot.lane.b32.xlu0 %v1491_v30, %s5656_s5 }
0x1034   :  { %v1637_v31 = vpop.f32.mrf.mxu1 }
0x1035   :  { %1641 = vrot.lane.b32.xlu2 %v1637_v31, %s5614_s26  ;;  %v3859_v31 = vld [vmem:[%s5569_s18 + $0xb0] sm:$0xff]  ;;  %s5659_s26 = smov 120  }
0x1036   :  { %1818 = vmatpush.msrb.mxu0 %v3859_v31  ;;  %v1935_v31 = vld [vmem:[%s5575_s8 + $0x20] sm:$0xff] }
0x1038   :  { %1819 = vmatpush.msrb.mxu0 %v3858_v34  ;;  %v1934_v34 = vld [vmem:[%s5575_s8 + $0x18] sm:$0xff] }
0x103a   :  { %1820 = vmatpush.msrb.mxu0 %v3857_v37 }
0x107f   :  { %v1569_v40 = vpop.permute.xlu2 %1568 }
0x108f   :  { %v1423_v38 = vpop.permute.xlu0 %1422  ;;  %v1642_v45 = vpop.permute.xlu2 %1641 }
0x1090   :  { %1425 = vst.msk [vmem:[#allocation2] sm:$0xff] %vm562_vm4, %v1423_v38 }
0x1091   :  { %1571 = vst.msk [vmem:[#allocation2] sm:$0xff] %vm709_vm5, %v1569_v40  ;;  %v3856_v40 = vld [vmem:[%s5569_s18 + $0x98] sm:$0xff] }
0x1092   :  { %1821 = vmatpush.msrb.mxu0 %v3856_v40  ;;  %v4053_v40 = vld [vmem:[%s5572_s21 + $0x1] ss:$0 sm:$0xff] }
0x1098   :  { %v1645_v39 = vld [vmem:[#allocation2] sm:$0xff] }
0x1099   :  { %3842 = vmatmul.msk.f32.vlgmr.msra.gmra.mxu2 %vm172_vm1, %v1645_v39 }
0x109f   :  { %v1496_v43 = vpop.permute.xlu0 %1495 }
0x10a0   :  { %1498 = vst.msk [vmem:[#allocation2 + $0x8] sm:$0xff] %vm562_vm4, %v1496_v43 }
0x10a1   :  { %1644 = vst.msk [vmem:[#allocation2 + $0x8] sm:$0xff] %vm709_vm5, %v1642_v45 }
0x10a8   :  { %v1646_v46 = vld [vmem:[#allocation2 + $0x8] sm:$0xff] }
0x10a9   :  { %3843 = vmatmul.msk.f32.gmra.mxu2 %vm172_vm1, %v1646_v46 }
0x111c   :  { %v1680_v44 = vpop.f32.mrf.mxu2 }
0x111d   :  { %v1681_v48 = vadd.f32 %v4047_v47, %v1680_v44  ;;  %v3855_v44 = vld [vmem:[%s5569_s18 + $0x90] sm:$0xff] }
0x111e   :  { %1822 = vmatpush.msrb.mxu0 %v3855_v44 }
0x111f   :  { %v1686_v49 = vadd.f32 %v1681_v48, %v4700_v5  ;;  %v3854_v48 = vld [vmem:[%s5569_s18 + $0x88] sm:$0xff] }
0x1120   :  { %1823 = vmatpush.msrb.mxu0 %v3854_v48 }
0x1121   :  { %v1692_v50 = vsel %vm172_vm1, %v1686_v49, 0.0 }
0x1122   :  { %1693 = vadd.xlane.f32.xlu1 %v1692_v50  ;;  %v4050_v50 = vld [vmem:[%s5567_s17 + $0x1] ss:$0 sm:$0xff] }
0x112c   :  { %v1683_v51 = vpop.f32.mrf.mxu2 }
0x112d   :  { %v1684_v52 = vadd.f32 %v4047_v47, %v1683_v51 }
0x112f   :  { %v1687_v53 = vadd.f32 %v1684_v52, %v4704_v10 }
0x1131   :  { %v1695_v42 = vsel %vm172_vm1, %v1687_v53, 0.0 }
0x1132   :  { %1696 = vadd.xlane.f32.xlu0 %v1695_v42 }
0x1195   :  { %v1694_v54 = vpop.xlane.xlu1 %1693 }
0x1196   :  { %v1698_v55 = vmul.f32 %v1694_v54, %v4587_v20 }
0x1198   :  { %v1700_v56 = vsub.f32 %v1686_v49, %v1698_v55  ;;  %v3853_v49 = vld [vmem:[%s5569_s18 + $0x80] sm:$0xff] }
0x1199   :  { %1824 = vmatpush.msrb.mxu0 %v3853_v49 }
0x119a   :  { %v1702_v57 = vmul.f32 %v1700_v56, %v1700_v56 }
0x119c   :  { %v1704_v58 = vsel %vm172_vm1, %v1702_v57, 0.0 }
0x119d   :  { %1705 = vadd.xlane.f32.xlu2 %v1704_v58 }
0x11a5   :  { %v1697_v59 = vpop.xlane.xlu0 %1696 }
0x11a6   :  { %v1699_v5 = vmul.f32 %v1697_v59, %v4587_v20 }
0x11a8   :  { %v4845_v60 = vsub.f32 %v1687_v53, %v1699_v5 }
0x11aa   :  { %v1703_v61 = vmul.f32 %v4845_v60, %v4845_v60 }
0x11ac   :  { %v1707_v10 = vsel %vm172_vm1, %v1703_v61, 0.0 }
0x11ad   :  { %1708 = vadd.xlane.f32.xlu1 %v1707_v10 }
0x1210   :  { %v1706_v1 = vpop.xlane.xlu2 %1705 }
0x1211   :  { %v1710_v2 = vmul.f32 %v1706_v1, %v4587_v20 }
0x1213   :  { %v1712_v3 = vadd.f32 1e-05, %v1710_v2 }
0x1215   :  { %4148 = vrsqrt.f32 %v1712_v3  ;;  %vm1720_vm10 = vweird.f32 %v1712_v3 }
0x121b   :  { %v4149_v4 = vpop.eup %4148 }
0x121c   :  { %v1715_v6 = vmul.f32 %v4149_v4, %v1712_v3  ;;  %vm1721_vm9 = vweird.f32 %v4149_v4 }
0x121d   :  { %vm1722_vm11 = vmor %vm1720_vm10, %vm1721_vm9 }
0x121e   :  { %v1716_v9 = vmul.f32 %v4149_v4, %v1715_v6 }
0x1220   :  { %v1709_v14 = vpop.xlane.xlu1 %1708  ;;  %v1717_v41 = vmul.f32 0.5, %v1716_v9  ;;  %v1895_v9 = vld [vmem:[%s5574_s6 + $0x18] sm:$0xff] }
0x1221   :  { %v1711_v13 = vmul.f32 %v1709_v14, %v4587_v20  ;;  %1918 = vmatpush.msrb.mxu1 %v1895_v9  ;;  %v1984_v14 = vld [vmem:[%s5644_s27 + $0x18] sm:$0xff]  ;;  %v4056_v9 = vld [vmem:[%s5576_s9] ss:$0 sm:$0xff] }
0x1222   :  { %v1718_v16 = vsub.f32 1.5, %v1717_v41  ;;  %2007 = vmatpush.msra.mxu3 %v1984_v14  ;;  %v1893_v41 = vld [vmem:[%s5574_s6 + $0x8] sm:$0xff] }
0x1223   :  { %v1713_v17 = vadd.f32 1e-05, %v1711_v13  ;;  %1919 = vmatpush.msrb.mxu1 %v1894_v11  ;;  %v1983_v13 = vld [vmem:[%s5644_s27 + $0x10] sm:$0xff] }
0x1224   :  { %v1719_v19 = vmul.f32 %v4149_v4, %v1718_v16  ;;  %2008 = vmatpush.msra.mxu3 %v1983_v13  ;;  %v1982_v16 = vld [vmem:[%s5644_s27 + $0x8] sm:$0xff] }
0x1225   :  { %4150 = vrsqrt.f32 %v1713_v17  ;;  %vm1730_vm13 = vweird.f32 %v1713_v17  ;;  %1920 = vmatpush.msrb.mxu1 %v1893_v41 }
0x1226   :  { %v1723_v22 = vsel %vm1722_vm11, %v4149_v4, %v1719_v19  ;;  %2009 = vmatpush.msra.mxu3 %v1982_v16 }
0x1227   :  { %v1734_v36 = vmul.f32 %v1723_v22, %v1700_v56  ;;  %v4051_v56 = vld [vmem:[%s5570_s19 + $0x1] ss:$0 sm:$0xff]  ;;  %1921 = vmatpush.msrb.mxu1 %v1892_v15  ;;  %s5664_s19 = smov 48  }
0x1229   :  { %v1739_v26 = vmul.f32 %v4048_v21, %v1734_v36  ;;  %v1938_v36 = vld [vmem:[%s5575_s8 + $0x38] sm:$0xff] }
0x122a   :  { %1957 = vmatpush.msrb.mxu2 %v1938_v36 }
0x122b   :  { %v4151_v27 = vpop.eup %4150  ;;  %v1744_v30 = vadd.f32 %v4049_v24, %v1739_v26 }
0x122c   :  { %v1725_v29 = vmul.f32 %v4151_v27, %v1713_v17  ;;  %vm1731_vm12 = vweird.f32 %v4151_v27  ;;  %v1981_v17 = vld [vmem:[%s5644_s27] sm:$0xff] }
0x122d   :  { %3851 = vmatmul.msk.f32.vlgmr.msrb.gmra.mxu3 %vm172_vm1, %v1744_v30  ;;  %vm1732_vm14 = vmor %vm1730_vm13, %vm1731_vm12 }
0x122e   :  { %v1726_v32 = vmul.f32 %v4151_v27, %v1725_v29  ;;  %2010 = vmatpush.msra.mxu3 %v1981_v17 }
0x1230   :  { %v1727_v35 = vmul.f32 0.5, %v1726_v32 }
0x1232   :  { %v1728_v38 = vsub.f32 1.5, %v1727_v35  ;;  %v4052_v35 = vld [vmem:[%s5571_s20 + $0x1] ss:$0 sm:$0xff] }
0x1234   :  { %v1729_v39 = vmul.f32 %v4151_v27, %v1728_v38 }
0x1236   :  { %v1733_v43 = vsel %vm1732_vm14, %v4151_v27, %v1729_v39  ;;  %v4037_v39 = vld [vmem:[%s5647_s0 + $0x1] ss:$0 sm:$0xff]  ;;  %s5658_s0 = smov 96  }
0x1237   :  { %v1735_v45 = vmul.f32 %v1733_v43, %v4845_v60 }
0x1239   :  { %v1740_v46 = vmul.f32 %v4048_v21, %v1735_v45 }
0x123b   :  { %v1745_v47 = vadd.f32 %v4049_v24, %v1740_v46  ;;  %v1937_v24 = vld [vmem:[%s5575_s8 + $0x30] sm:$0xff] }
0x123c   :  { %1958 = vmatpush.msrb.mxu2 %v1937_v24 }
0x123d   :  { %3852 = vmatmul.msk.f32.gmra.mxu3 %vm172_vm1, %v1745_v47 }
0x123e   :  { %1959 = vmatpush.msrb.mxu2 %v1936_v28 }
0x1240   :  { %1960 = vmatpush.msrb.mxu2 %v1935_v31 }
0x1242   :  { %1961 = vmatpush.msrb.mxu2 %v1934_v34 }
0x12b0   :  { %v1779_v51 = vpop.f32.mrf.mxu3 }
0x12b1   :  { %v1780_v52 = vadd.f32 %v4050_v50, %v1779_v51 }
0x12b3   :  { %v1785_v53 = vmax.f32 %v1780_v52, 0.0 }
0x12b5   :  { %1825 = vmatmul.f32.vlgmr.msrb.gmra.mxu0 %v1785_v53 }
0x12c0   :  { %v1782_v42 = vpop.f32.mrf.mxu3 }
0x12c1   :  { %v1783_v54 = vadd.f32 %v4050_v50, %v1782_v42 }
0x12c3   :  { %v1786_v55 = vmax.f32 %v1783_v54, 0.0 }
0x12c5   :  { %1828 = vmatmul.f32.gmra.mxu0 %v1786_v55 }
0x1332   :  { %v1826_v57 = vpop.f32.mrf.mxu0 }
0x1333   :  { %v1827_v58 = vadd.f32 %v4051_v56, %v1826_v57  ;;  %v1932_v57 = vld [vmem:[%s5575_s8 + $0x8] sm:$0xff] }
0x1335   :  { %v1832_v59 = vadd.f32 %v1827_v58, %v1744_v30  ;;  %v1931_v58 = vld [vmem:[%s5575_s8] sm:$0xff] }
0x1337   :  { %v1838_v5 = vsel %vm172_vm1, %v1832_v59, 0.0 }
0x1338   :  { %1839 = vadd.xlane.f32.xlu2 %v1838_v5 }
0x1342   :  { %v1829_v60 = vpop.f32.mrf.mxu0 }
0x1343   :  { %v1830_v61 = vadd.f32 %v4051_v56, %v1829_v60  ;;  %v1933_v56 = vld [vmem:[%s5575_s8 + $0x10] sm:$0xff]  ;;  %s5667_s8 = sld [smem:[#allocation10_spill]] }
0x1344   :  { %1962 = vmatpush.msrb.mxu2 %v1933_v56 }
0x1345   :  { %v1833_v10 = vadd.f32 %v1830_v61, %v1745_v47 }
0x1346   :  { %1963 = vmatpush.msrb.mxu2 %v1932_v57 }
0x1347   :  { %v1841_v12 = vsel %vm172_vm1, %v1833_v10, 0.0 }
0x1348   :  { %1842 = vadd.xlane.f32.xlu0 %v1841_v12  ;;  %1964 = vmatpush.msrb.mxu2 %v1931_v58 }
0x13ab   :  { %v1840_v62 = vpop.xlane.xlu2 %1839 }
0x13ac   :  { %v1844_v63 = vmul.f32 %v1840_v62, %v4587_v20 }
0x13ae   :  { %v1846_v0 = vsub.f32 %v1832_v59, %v1844_v63  ;;  %v4054_v59 = vld [vmem:[%s5573_s7] ss:$0 sm:$0xff] }
0x13b0   :  { %v1848_v1 = vmul.f32 %v1846_v0, %v1846_v0 }
0x13b2   :  { %v1850_v2 = vsel %vm172_vm1, %v1848_v1, 0.0 }
0x13b3   :  { %1851 = vadd.xlane.f32.xlu1 %v1850_v2 }
0x13bb   :  { %v1843_v3 = vpop.xlane.xlu0 %1842 }
0x13bc   :  { %v1845_v4 = vmul.f32 %v1843_v3, %v4587_v20 }
0x13be   :  { %v4932_v6 = vsub.f32 %v1833_v10, %v1845_v4  ;;  %v4055_v10 = vld [vmem:[%s5562_s11] ss:$0 sm:$0xff] }
0x13c0   :  { %v1849_v7 = vmul.f32 %v4932_v6, %v4932_v6 }
0x13c2   :  { %v1853_v8 = vsel %vm172_vm1, %v1849_v7, 0.0 }
0x13c3   :  { %1854 = vadd.xlane.f32.xlu2 %v1853_v8 }
0x1426   :  { %v1852_v18 = vpop.xlane.xlu1 %1851 }
0x1427   :  { %v1856_v19 = vmul.f32 %v1852_v18, %v4587_v20 }
0x1429   :  { %v1858_v33 = vadd.f32 1e-05, %v1856_v19 }
0x142b   :  { %4152 = vrsqrt.f32 %v1858_v33  ;;  %vm1866_vm6 = vweird.f32 %v1858_v33 }
0x1431   :  { %v4153_v21 = vpop.eup %4152 }
0x1432   :  { %v1861_v22 = vmul.f32 %v4153_v21, %v1858_v33  ;;  %vm1867_vm15 = vweird.f32 %v4153_v21 }
0x1433   :  { %vm1868_vm7 = vmor %vm1866_vm6, %vm1867_vm15 }
0x1434   :  { %v1862_v23 = vmul.f32 %v4153_v21, %v1861_v22 }
0x1436   :  { %v1855_v25 = vpop.xlane.xlu2 %1854  ;;  %v1863_v26 = vmul.f32 0.5, %v1862_v23 }
0x1437   :  { %v1857_v27 = vmul.f32 %v1855_v25, %v4587_v20 }
0x1438   :  { %v1864_v29 = vsub.f32 1.5, %v1863_v26 }
0x1439   :  { %v1859_v30 = vadd.f32 1e-05, %v1857_v27 }
0x143a   :  { %v1865_v32 = vmul.f32 %v4153_v21, %v1864_v29 }
0x143b   :  { %4154 = vrsqrt.f32 %v1859_v30  ;;  %vm1876_vm9 = vweird.f32 %v1859_v30 }
0x143c   :  { %v1869_v37 = vsel %vm1868_vm7, %v4153_v21, %v1865_v32 }
0x143d   :  { %v1880_v38 = vmul.f32 %v1869_v37, %v1846_v0 }
0x143f   :  { %v1885_v43 = vmul.f32 %v4052_v35, %v1880_v38 }
0x1441   :  { %v4155_v45 = vpop.eup %4154  ;;  %v1890_v47 = vadd.f32 %v4053_v40, %v1885_v43 }
0x1442   :  { %v1871_v46 = vmul.f32 %v4155_v45, %v1859_v30  ;;  %vm1877_vm8 = vweird.f32 %v4155_v45 }
0x1443   :  { %3872 = vmatmul.msk.f32.vlgmr.msrb.gmra.mxu1 %vm172_vm1, %v1890_v47  ;;  %v4988_v48 = vadd.f32 %v4037_v39, %v1890_v47  ;;  %vm1878_vm10 = vmor %vm1876_vm9, %vm1877_vm8 }
0x1444   :  { %v1872_v44 = vmul.f32 %v4155_v45, %v1871_v46 }
0x1445   :  { %3877 = vmatmul.msk.f32.vlgmr.msra.gmra.mxu3 %vm172_vm1, %v4988_v48 }
0x1446   :  { %v1873_v49 = vmul.f32 0.5, %v1872_v44 }
0x1448   :  { %v1874_v50 = vsub.f32 1.5, %v1873_v49 }
0x144a   :  { %v1875_v51 = vmul.f32 %v4155_v45, %v1874_v50 }
0x144c   :  { %v1879_v52 = vsel %vm1878_vm10, %v4155_v45, %v1875_v51 }
0x144d   :  { %v1881_v53 = vmul.f32 %v1879_v52, %v4932_v6 }
0x144f   :  { %v1886_v42 = vmul.f32 %v4052_v35, %v1881_v53 }
0x1451   :  { %v1891_v54 = vadd.f32 %v4053_v40, %v1886_v42 }
0x1453   :  { %3873 = vmatmul.msk.f32.gmra.mxu1 %vm172_vm1, %v1891_v54  ;;  %v4994_v55 = vadd.f32 %v4037_v39, %v1891_v54 }
0x1455   :  { %3878 = vmatmul.msk.f32.gmra.mxu3 %vm172_vm1, %v4994_v55 }
0x14c0   :  { %v1923_v5 = vpop.f32.mrf.mxu1 }
0x14c1   :  { %v1924_v60 = vadd.f32 %v4054_v59, %v1923_v5 }
0x14c3   :  { %v1929_v61 = vmax.f32 %v1924_v60, 0.0 }
0x14c5   :  { %3874 = vmatmul.msk.f32.vlgmr.msrb.gmra.mxu2 %vm85_vm0, %v1929_v61 }
0x14c8   :  { %v2012_v12 = vpop.f32.mrf.mxu3 }
0x14c9   :  { %v5014_v62 = vadd.f32 %v4055_v10, %v2012_v12 }
0x14cb   :  { %2160 = vrot.lane.b32.xlu2 %v5014_v62, %s5657_s24  ;;  %2021 = vrot.lane.b32.xlu0 %v5014_v62, %s5658_s0  ;;  %v2018_v6 = vmul.f32 0.35355338, %v5014_v62 }
0x14d0   :  { %v1926_v63 = vpop.f32.mrf.mxu1 }
0x14d1   :  { %v1927_v0 = vadd.f32 %v4054_v59, %v1926_v63 }
0x14d3   :  { %v1930_v1 = vmax.f32 %v1927_v0, 0.0 }
0x14d5   :  { %3875 = vmatmul.msk.f32.gmra.mxu2 %vm85_vm0, %v1930_v1 }
0x14d8   :  { %v2015_v2 = vpop.f32.mrf.mxu3 }
0x14d9   :  { %v5021_v3 = vadd.f32 %v4055_v10, %v2015_v2 }
0x14db   :  { %2090 = vrot.lane.b32.xlu1 %v5021_v3, %s5658_s0  ;;  %v2019_v4 = vmul.f32 0.35355338, %v5021_v3  ;;  %v5033_v7 = vpack.i.bf16 %v5021_v3, %v5014_v62 }
0x14dd   :  { %2231 = vrot.lane.b32.xlu2 %v2019_v4, %s5659_s26 }
0x14e3   :  { %2158 = vrot.lane.b32.xlu1 %v2018_v6, %s5659_s26 }
0x14eb   :  { %2306 = vrot.lane.b32.xlu1 %v5014_v62, %s5649_s4 }
0x14f3   :  { %4005 = vrot.lane.b32.xlu1 %v5033_v7, %s5660_s1 }
0x14fb   :  { %2304 = vrot.lane.b32.xlu1 %v2018_v6, %s5651_s10 }
0x1503   :  { %2233 = vrot.lane.b32.xlu1 %v5021_v3, %s5657_s24 }
0x150b   :  { %2377 = vrot.lane.b32.xlu1 %v2019_v4, %s5651_s10 }
0x1513   :  { %2525 = vrot.lane.b32.xlu1 %v5021_v3, %s5650_s29 }
0x1525   :  { %v2161_v21 = vpop.permute.xlu2 %2160 }
0x1537   :  { %v2232_v27 = vpop.permute.xlu2 %2231 }
0x153d   :  { %v2022_v8 = vpop.permute.xlu0 %2021 }
0x153e   :  { %3879 = vmatpush.xpose.msk.msra.mxu1 %vm207_vm2, %v2022_v8 }
0x1541   :  { %3880 = vmatmul.msk.f32.vlgmr.msra.gmra.mxu1 %vm207_vm2, %v2018_v6 }
0x1548   :  { %v1966_v11 = vpop.f32.mrf.mxu2 }
0x1549   :  { %v1967_v14 = vadd.f32 %v4056_v9, %v1966_v11 }
0x154b   :  { %1972 = vst [vmem:[%s5577_s22] sm:$0xff] %v1967_v14 }
0x154d   :  { %v2091_v41 = vpop.permute.xlu1 %2090 }
0x154e   :  { %3882 = vmatpush.xpose.msk.msra.mxu2 %vm207_vm2, %v2091_v41 }
0x1551   :  { %3883 = vmatmul.msk.f32.vlgmr.msra.gmra.mxu2 %vm207_vm2, %v2019_v4 }
0x1555   :  { %v2159_v13 = vpop.permute.xlu1 %2158 }
0x1558   :  { %v1969_v15 = vpop.f32.mrf.mxu2 }
0x1559   :  { %v1970_v16 = vadd.f32 %v4056_v9, %v1969_v15 }
0x155b   :  { %1973 = vst [vmem:[%s5577_s22 + $0x8] sm:$0xff] %v1970_v16 }
0x155d   :  { %v2307_v17 = vpop.permute.xlu1 %2306 }
0x1565   :  { %v4006_v18 = vpop.permute.xlu1 %4005 }
0x1566   :  { %v4008_v19 = vunpack.i.h.bf16 %v4006_v18  ;;  %v4007_v33 = vunpack.i.l.bf16 %v4006_v18 }
0x1568   :  { %2083 = vmatpush.msrb.mxu1 %v4007_v33  ;;  %2152 = vmatpush.msrb.mxu3 %v4008_v19 }
0x156a   :  { %3885 = vmatpush.xpose.msk.msra.mxu1 %vm207_vm2, %v2161_v21 }
0x156d   :  { %v2305_v22 = vpop.permute.xlu1 %2304 }
0x1575   :  { %v2234_v23 = vpop.permute.xlu1 %2233 }
0x1576   :  { %3888 = vmatpush.xpose.msk.msra.mxu3 %vm207_vm2, %v2234_v23 }
0x157d   :  { %v2378_v56 = vpop.permute.xlu1 %2377 }
0x1585   :  { %v2526_v59 = vpop.permute.xlu1 %2525 }
0x15be   :  { %v2045_v36 = vpop.f32.mrf.mxu1 }
0x15bf   :  { %v2048_v24 = vsel %vm207_vm2, %v2045_v36, -inf }
0x15c0   :  { %2049 = vmax.xlane.f32.xlu2 %v2048_v24 }
0x15d4   :  { %v2114_v25 = vpop.f32.mrf.mxu2 }
0x15d5   :  { %v2117_v26 = vsel %vm207_vm2, %v2114_v25, -inf }
0x15d6   :  { %2118 = vmax.xlane.f32.xlu2 %v2117_v26 }
0x15ee   :  { %2452 = vrot.lane.b32.xlu2 %v5014_v62, %s5650_s29 }
0x15f6   :  { %2450 = vrot.lane.b32.xlu2 %v2018_v6, %s5661_s30 }
0x1633   :  { %v2050_v28 = vpop.xlane.xlu2 %2049 }
0x1634   :  { %v2051_v29 = vsub.f32 %v2045_v36, %v2050_v28 }
0x1636   :  { %v2052_v30 = vmul.f32 1.442695, %v2051_v29 }
0x1638   :  { %4156 = vpow2.f32 %v2052_v30 }
0x163e   :  { %v4157_v31 = vpop.eup %4156 }
0x163f   :  { %v2054_v32 = vsel %vm207_vm2, %v4157_v31, 0.0 }
0x1640   :  { %2055 = vadd.xlane.f32.xlu0 %v2054_v32 }
0x1649   :  { %v2119_v34 = vpop.xlane.xlu2 %2118 }
0x164a   :  { %v2120_v35 = vsub.f32 %v2114_v25, %v2119_v34 }
0x164c   :  { %v2121_v37 = vmul.f32 1.442695, %v2120_v35 }
0x164e   :  { %4158 = vpow2.f32 %v2121_v37 }
0x1651   :  { %v2453_v43 = vpop.permute.xlu2 %2452 }
0x1654   :  { %v4159_v38 = vpop.eup %4158  ;;  %2379 = vrot.lane.b32.xlu0 %v5021_v3, %s5649_s4 }
0x1655   :  { %v2123_v40 = vsel %vm207_vm2, %v4159_v38, 0.0 }
0x1656   :  { %2124 = vadd.xlane.f32.xlu2 %v2123_v40 }
0x1659   :  { %v2451_v49 = vpop.permute.xlu2 %2450 }
0x166e   :  { %2523 = vrot.lane.b32.xlu2 %v2019_v4, %s5661_s30 }
0x16b3   :  { %v2056_v39 = vpop.xlane.xlu0 %2055 }
0x16b4   :  { %4160 = vrcp.f32 %v2056_v39 }
0x16ba   :  { %v4161_v45 = vpop.eup %4160 }
0x16bb   :  { %v2058_v46 = vmul.f32 %v4161_v45, %v2056_v39 }
0x16bd   :  { %v2059_v47 = vsub.f32 2.0, %v2058_v46 }
0x16bf   :  { %v2060_v44 = vmul.f32 %v4161_v45, %v2059_v47 }
0x16c1   :  { %v2061_v50 = vmul.f32 %v4157_v31, %v2060_v44 }
0x16c3   :  { %3881 = vmatmul.msk.f32.vlgmr.msrb.gmra.mxu1 %vm207_vm2, %v2061_v50 }
0x16c4   :  { %3891 = vmatpush.xpose.msk.msrb.mxu1 %vm207_vm2, %v2307_v17 }
0x16c6   :  { %v2380_v58 = vpop.permute.xlu0 %2379 }
0x16c9   :  { %v2125_v51 = vpop.xlane.xlu2 %2124 }
0x16ca   :  { %4162 = vrcp.f32 %v2125_v51 }
0x16cb   :  { %3886 = vmatmul.msk.f32.vlgmr.msra.gmra.mxu1 %vm207_vm2, %v2159_v13 }
0x16cc   :  { %3897 = vmatpush.xpose.msk.msra.mxu1 %vm207_vm2, %v2453_v43 }
0x16d0   :  { %v4163_v52 = vpop.eup %4162 }
0x16d1   :  { %v2127_v53 = vmul.f32 %v4163_v52, %v2125_v51  ;;  %v2524_v5 = vpop.permute.xlu2 %2523 }
0x16d3   :  { %v2128_v42 = vsub.f32 2.0, %v2127_v53  ;;  %3892 = vmatmul.msk.f32.vlgmr.msrb.gmra.mxu1 %vm207_vm2, %v2305_v22 }
0x16d5   :  { %v2129_v54 = vmul.f32 %v4163_v52, %v2128_v42 }
0x16d7   :  { %v2130_v57 = vmul.f32 %v4159_v38, %v2129_v54 }
0x16d9   :  { %3884 = vmatmul.msk.f32.vlgmr.msrb.gmra.mxu3 %vm207_vm2, %v2130_v57 }
0x16da   :  { %3894 = vmatpush.xpose.msk.msrb.mxu3 %vm207_vm2, %v2380_v58 }
0x16db   :  { %3898 = vmatmul.msk.f32.vlgmr.msra.gmra.mxu1 %vm207_vm2, %v2451_v49 }
0x16e1   :  { %3889 = vmatmul.msk.f32.vlgmr.msra.gmra.mxu3 %vm207_vm2, %v2232_v27 }
0x16e2   :  { %3900 = vmatpush.xpose.msk.msra.mxu3 %vm207_vm2, %v2526_v59 }
0x16e9   :  { %3895 = vmatmul.msk.f32.vlgmr.msrb.gmra.mxu3 %vm207_vm2, %v2378_v56 }
0x16f1   :  { %3901 = vmatmul.msk.f32.vlgmr.msra.gmra.mxu3 %vm207_vm2, %v2524_v5 }
0x1740   :  { %v2085_v60 = vpop.f32.mrf.mxu1 }
0x1741   :  { %2088 = vst.msk [vmem:[#allocation2] sm:$0xff] %vm207_vm2, %v2085_v60 }
0x1748   :  { %v2183_v61 = vpop.f32.mrf.mxu1 }
0x1749   :  { %v2186_v10 = vsel %vm207_vm2, %v2183_v61, -inf }
0x174a   :  { %2187 = vmax.xlane.f32.xlu0 %v2186_v10 }
0x1750   :  { %v2329_v12 = vpop.f32.mrf.mxu1 }
0x1751   :  { %v2332_v63 = vsel %vm207_vm2, %v2329_v12, -inf }
0x1752   :  { %2333 = vmax.xlane.f32.xlu1 %v2332_v63 }
0x1758   :  { %v2475_v0 = vpop.f32.mrf.mxu1 }
0x1759   :  { %v2478_v1 = vsel %vm207_vm2, %v2475_v0, -inf }
0x175a   :  { %2479 = vmax.xlane.f32.xlu0 %v2478_v1 }
0x175c   :  { %v2154_v2 = vpop.f32.mrf.mxu3 }
0x175d   :  { %2157 = vst.msk [vmem:[#allocation2 + $0x8] sm:$0xff] %vm207_vm2, %v2154_v2 }
0x1764   :  { %v2256_v4 = vpop.f32.mrf.mxu3 }
0x1765   :  { %v2259_v6 = vsel %vm207_vm2, %v2256_v4, -inf }
0x1766   :  { %2260 = vmax.xlane.f32.xlu2 %v2259_v6 }
0x176c   :  { %v2402_v8 = vpop.f32.mrf.mxu3 }
0x176d   :  { %v2405_v9 = vsel %vm207_vm2, %v2402_v8, -inf }
0x176e   :  { %2406 = vmax.xlane.f32.xlu1 %v2405_v9  ;;  %4010 = vrot.lane.b32.xlu0 %v5033_v7, %s5662_s2 }
0x1774   :  { %v2548_v11 = vpop.f32.mrf.mxu3 }
0x1775   :  { %v2551_v14 = vsel %vm207_vm2, %v2548_v11, -inf }
0x1776   :  { %2552 = vmax.xlane.f32.xlu2 %v2551_v14 }
0x17bd   :  { %v2188_v41 = vpop.xlane.xlu0 %2187 }
0x17be   :  { %v2189_v13 = vsub.f32 %v2183_v61, %v2188_v41 }
0x17c0   :  { %v2190_v15 = vmul.f32 1.442695, %v2189_v13 }
0x17c2   :  { %4164 = vpow2.f32 %v2190_v15 }
0x17c5   :  { %v2334_v16 = vpop.xlane.xlu1 %2333 }
0x17c6   :  { %v2335_v17 = vsub.f32 %v2329_v12, %v2334_v16 }
0x17c8   :  { %v4165_v18 = vpop.eup %4164  ;;  %v2336_v19 = vmul.f32 1.442695, %v2335_v17 }
0x17c9   :  { %v2192_v33 = vsel %vm207_vm2, %v4165_v18, 0.0 }
0x17ca   :  { %4166 = vpow2.f32 %v2336_v19  ;;  %2193 = vadd.xlane.f32.xlu0 %v2192_v33 }
0x17cd   :  { %v2480_v21 = vpop.xlane.xlu0 %2479 }
0x17ce   :  { %v2481_v22 = vsub.f32 %v2475_v0, %v2480_v21 }
0x17d0   :  { %v5091_v23 = vpop.eup %4166  ;;  %v2482_v7 = vmul.f32 1.442695, %v2481_v22 }
0x17d1   :  { %v2338_v36 = vsel %vm207_vm2, %v5091_v23, 0.0 }
0x17d2   :  { %4168 = vpow2.f32 %v2482_v7  ;;  %2339 = vadd.xlane.f32.xlu1 %v2338_v36 }
0x17d8   :  { %v5095_v24 = vpop.eup %4168 }
0x17d9   :  { %v2261_v25 = vpop.xlane.xlu2 %2260  ;;  %v2484_v27 = vsel %vm207_vm2, %v5095_v24, 0.0 }
0x17da   :  { %v2262_v26 = vsub.f32 %v2256_v4, %v2261_v25  ;;  %2485 = vadd.xlane.f32.xlu1 %v2484_v27 }
0x17dc   :  { %v2263_v28 = vmul.f32 1.442695, %v2262_v26 }
0x17de   :  { %4170 = vpow2.f32 %v2263_v28  ;;  %2492 = vrot.lane.b32.xlu0 %v5014_v62, %s5663_s23 }
0x17e0   :  { %v4011_v29 = vpop.permute.xlu0 %4010 }
0x17e1   :  { %v2407_v30 = vpop.xlane.xlu1 %2406  ;;  %v4013_v31 = vunpack.i.h.bf16 %v4011_v29  ;;  %v4012_v32 = vunpack.i.l.bf16 %v4011_v29 }
0x17e2   :  { %v2408_v34 = vsub.f32 %v2402_v8, %v2407_v30  ;;  %v2601_v30 = vld [vmem:[%s5564_s12 + $0x18] sm:$0xff] }
0x17e3   :  { %2221 = vmatpush.msrb.mxu2 %v4012_v32  ;;  %2294 = vmatpush.msra.mxu0 %v4013_v31  ;;  %v2600_v31 = vld [vmem:[%s5564_s12 + $0x10] sm:$0xff]  ;;  %v2599_v32 = vld [vmem:[%s5564_s12 + $0x8] sm:$0xff] }
0x17e4   :  { %v4171_v35 = vpop.eup %4170  ;;  %v2409_v37 = vmul.f32 1.442695, %v2408_v34  ;;  %2624 = vmatpush.msrb.mxu1 %v2601_v30  ;;  %v2598_v34 = vld [vmem:[%s5564_s12] sm:$0xff]  ;;  %v2737_v30 = vld [vmem:[%s5569_s18 + $0x28] sm:$0xff] }
0x17e5   :  { %v2265_v38 = vsel %vm207_vm2, %v4171_v35, 0.0 }
0x17e6   :  { %4172 = vpow2.f32 %v2409_v37  ;;  %2266 = vadd.xlane.f32.xlu2 %v2265_v38  ;;  %2565 = vrot.lane.b32.xlu0 %v5021_v3, %s5663_s23 }
0x17e7   :  { %2625 = vmatpush.msrb.mxu1 %v2600_v31 }
0x17e9   :  { %v2553_v40 = vpop.xlane.xlu2 %2552  ;;  %2626 = vmatpush.msrb.mxu1 %v2599_v32 }
0x17ea   :  { %v2554_v39 = vsub.f32 %v2548_v11, %v2553_v40 }
0x17eb   :  { %2627 = vmatpush.msrb.mxu1 %v2598_v34  ;;  %v2736_v34 = vld [vmem:[%s5569_s18 + $0x20] sm:$0xff] }
0x17ec   :  { %v4173_v43 = vpop.eup %4172  ;;  %v2555_v45 = vmul.f32 1.442695, %v2554_v39 }
0x17ed   :  { %v2411_v46 = vsel %vm207_vm2, %v4173_v43, 0.0 }
0x17ee   :  { %4174 = vpow2.f32 %v2555_v45  ;;  %2412 = vadd.xlane.f32.xlu2 %v2411_v46  ;;  %v4057_v46 = vld [vmem:[%s5563_s13] ss:$0 sm:$0xff] }
0x17f3   :  { %2346 = vrot.lane.b32.xlu1 %v5014_v62, %s5664_s19 }
0x17f4   :  { %v4175_v47 = vpop.eup %4174 }
0x17f5   :  { %v2557_v44 = vsel %vm207_vm2, %v4175_v47, 0.0 }
0x17f6   :  { %2558 = vadd.xlane.f32.xlu2 %v2557_v44 }
0x180e   :  { %2419 = vrot.lane.b32.xlu2 %v5021_v3, %s5664_s19 }
0x183d   :  { %v2194_v49 = vpop.xlane.xlu0 %2193 }
0x183e   :  { %4176 = vrcp.f32 %v2194_v49 }
0x1844   :  { %v4177_v50 = vpop.eup %4176 }
0x1845   :  { %v2196_v51 = vmul.f32 %v4177_v50, %v2194_v49  ;;  %v2340_v54 = vpop.xlane.xlu1 %2339 }
0x1846   :  { %4178 = vrcp.f32 %v2340_v54 }
0x1847   :  { %v2197_v52 = vsub.f32 2.0, %v2196_v51 }
0x1849   :  { %v2198_v53 = vmul.f32 %v4177_v50, %v2197_v52 }
0x184b   :  { %v2199_v42 = vmul.f32 %v4165_v18, %v2198_v53 }
0x184c   :  { %v4179_v57 = vpop.eup %4178 }
0x184d   :  { %3887 = vmatmul.msk.f32.vlgmr.msrb.gmra.mxu2 %vm207_vm2, %v2199_v42  ;;  %v2486_v56 = vpop.xlane.xlu1 %2485  ;;  %v2342_v58 = vmul.f32 %v4179_v57, %v2340_v54 }
0x184e   :  { %4180 = vrcp.f32 %v2486_v56 }
0x184f   :  { %v2343_v59 = vsub.f32 2.0, %v2342_v58 }
0x1850   :  { %v2493_v9 = vpop.permute.xlu0 %2492 }
0x1851   :  { %v2344_v10 = vmul.f32 %v4179_v57, %v2343_v59 }
0x1853   :  { %v2345_v1 = vmul.f32 %v5091_v23, %v2344_v10  ;;  %v2694_v10 = vld [vmem:[%s5568_s16 + $0x8] sm:$0xff] }
0x1854   :  { %v4181_v5 = vpop.eup %4180 }
0x1855   :  { %v2488_v12 = vmul.f32 %v4181_v5, %v2486_v56 }
0x1857   :  { %v2489_v2 = vsub.f32 2.0, %v2488_v12  ;;  %v2693_v12 = vld [vmem:[%s5568_s16] sm:$0xff] }
0x1858   :  { %v2566_v21 = vpop.permute.xlu0 %2565 }
0x1859   :  { %v2267_v62 = vpop.xlane.xlu2 %2266  ;;  %v2490_v41 = vmul.f32 %v4181_v5, %v2489_v2  ;;  %v2747_v2 = vld [vmem:[%s5569_s18 + $0x78] sm:$0xff] }
0x185a   :  { %4182 = vrcp.f32 %v2267_v62  ;;  %2752 = vmatpush.msrb.mxu3 %v2747_v2 }
0x185b   :  { %v2491_v16 = vmul.f32 %v5095_v24, %v2490_v41 }
0x1860   :  { %v4183_v3 = vpop.eup %4182 }
0x1861   :  { %v2269_v60 = vmul.f32 %v4183_v3, %v2267_v62  ;;  %v2413_v61 = vpop.xlane.xlu2 %2412 }
0x1862   :  { %4184 = vrcp.f32 %v2413_v61 }
0x1863   :  { %v2270_v63 = vsub.f32 2.0, %v2269_v60  ;;  %v2696_v60 = vld [vmem:[%s5568_s16 + $0x18] sm:$0xff] }
0x1865   :  { %v2271_v0 = vmul.f32 %v4183_v3, %v2270_v63  ;;  %v2347_v4 = vpop.permute.xlu1 %2346 }
0x1866   :  { %2367 = vmatpush.msra.mxu2 %v2347_v4  ;;  %v2746_v4 = vld [vmem:[%s5569_s18 + $0x70] sm:$0xff] }
0x1867   :  { %v2272_v6 = vmul.f32 %v4171_v35, %v2271_v0  ;;  %3893 = vmatmul.msk.f32.vlgmr.msra.gmra.mxu2 %vm207_vm2, %v2345_v1  ;;  %2753 = vmatpush.msrb.mxu3 %v2746_v4 }
0x1868   :  { %v4185_v8 = vpop.eup %4184  ;;  %2513 = vmatpush.msrb.mxu2 %v2493_v9 }
0x1869   :  { %v2415_v11 = vmul.f32 %v4185_v8, %v2413_v61  ;;  %3890 = vmatmul.msk.f32.vlgmr.msra.gmra.mxu0 %vm207_vm2, %v2272_v6  ;;  %v2559_v14 = vpop.xlane.xlu2 %2558  ;;  %v2695_v61 = vld [vmem:[%s5568_s16 + $0x10] sm:$0xff]  ;;  %v2745_v6 = vld [vmem:[%s5569_s18 + $0x68] sm:$0xff] }
0x186a   :  { %4186 = vrcp.f32 %v2559_v14  ;;  %2719 = vmatpush.msra.mxu2 %v2696_v60  ;;  %2754 = vmatpush.msrb.mxu3 %v2745_v6 }
0x186b   :  { %v2416_v13 = vsub.f32 2.0, %v2415_v11  ;;  %v2744_v11 = vld [vmem:[%s5569_s18 + $0x60] sm:$0xff] }
0x186c   :  { %2720 = vmatpush.msra.mxu2 %v2695_v61  ;;  %2755 = vmatpush.msrb.mxu3 %v2744_v11  ;;  %v3909_v11 = vld [vmem:[%s5644_s27 + $0x30] sm:$0xff] }
0x186d   :  { %v2417_v15 = vmul.f32 %v4185_v8, %v2416_v13  ;;  %v2743_v13 = vld [vmem:[%s5569_s18 + $0x58] sm:$0xff] }
0x186e   :  { %2721 = vmatpush.msra.mxu2 %v2694_v10  ;;  %2756 = vmatpush.msrb.mxu3 %v2743_v13 }
0x186f   :  { %3899 = vmatmul.msk.f32.vlgmr.msrb.gmra.mxu2 %vm207_vm2, %v2491_v16  ;;  %v2418_v18 = vmul.f32 %v4173_v43, %v2417_v15  ;;  %v2742_v16 = vld [vmem:[%s5569_s18 + $0x50] sm:$0xff] }
0x1870   :  { %v4187_v17 = vpop.eup %4186  ;;  %2722 = vmatpush.msra.mxu2 %v2693_v12  ;;  %2757 = vmatpush.msrb.mxu3 %v2742_v16 }
0x1871   :  { %v2561_v19 = vmul.f32 %v4187_v17, %v2559_v14  ;;  %v2420_v33 = vpop.permute.xlu2 %2419 }
0x1872   :  { %2440 = vmatpush.msrb.mxu0 %v2420_v33  ;;  %v2740_v33 = vld [vmem:[%s5569_s18 + $0x40] sm:$0xff] }
0x1873   :  { %v2562_v22 = vsub.f32 2.0, %v2561_v19  ;;  %3896 = vmatmul.msk.f32.vlgmr.msrb.gmra.mxu0 %vm207_vm2, %v2418_v18  ;;  %v2741_v18 = vld [vmem:[%s5569_s18 + $0x48] sm:$0xff] }
0x1874   :  { %2586 = vmatpush.msra.mxu0 %v2566_v21  ;;  %2758 = vmatpush.msrb.mxu3 %v2741_v18 }
0x1875   :  { %v2563_v23 = vmul.f32 %v4187_v17, %v2562_v22 }
0x1876   :  { %2759 = vmatpush.msrb.mxu3 %v2740_v33 }
0x1877   :  { %v2564_v7 = vmul.f32 %v4175_v47, %v2563_v23  ;;  %v2739_v23 = vld [vmem:[%s5569_s18 + $0x38] sm:$0xff] }
0x1878   :  { %2760 = vmatpush.msrb.mxu3 %v2739_v23 }
0x187b   :  { %3902 = vmatmul.msk.f32.vlgmr.msra.gmra.mxu0 %vm207_vm2, %v2564_v7 }
0x18d0   :  { %v2223_v36 = vpop.f32.mrf.mxu2 }
0x18d1   :  { %2227 = vrot.lane.b32.xlu1 %v2223_v36, %s5665_s25 }
0x18e6   :  { %v2296_v24 = vpop.f32.mrf.mxu0 }
0x18ea   :  { %v2369_v25 = vpop.f32.mrf.mxu2 }
0x18eb   :  { %2373 = vrot.lane.b32.xlu0 %v2369_v25, %s5656_s5  ;;  %v2738_v25 = vld [vmem:[%s5569_s18 + $0x30] sm:$0xff] }
0x18ec   :  { %2761 = vmatpush.msrb.mxu3 %v2738_v25 }
0x18ee   :  { %2762 = vmatpush.msrb.mxu3 %v2737_v30  ;;  %v4063_v30 = vld [vmem:[%s5572_s21] ss:$0 sm:$0xff] }
0x18f0   :  { %v2442_v26 = vpop.f32.mrf.mxu0  ;;  %2763 = vmatpush.msrb.mxu3 %v2736_v34 }
0x18f1   :  { %2446 = vrot.lane.b32.xlu2 %v2442_v26, %s5656_s5 }
0x18f2   :  { %v2515_v27 = vpop.f32.mrf.mxu2 }
0x18f3   :  { %2519 = vrot.lane.b32.xlu1 %v2515_v27, %s5666_s3  ;;  %2300 = vrot.lane.b32.xlu0 %v2296_v24, %s5665_s25  ;;  %v4058_v24 = vld [vmem:[%s5565_s14] ss:$0 sm:$0xff] }
0x18f8   :  { %v2588_v28 = vpop.f32.mrf.mxu0 }
0x18fb   :  { %2592 = vrot.lane.b32.xlu1 %v2588_v28, %s5666_s3 }
0x1943   :  { %v2228_v29 = vpop.permute.xlu1 %2227 }
0x1944   :  { %2230 = vst.msk [vmem:[#allocation2] sm:$0xff] %vm415_vm3, %v2228_v29  ;;  %v4059_v29 = vld [vmem:[%s5566_s15] ss:$0 sm:$0xff] }
0x194b   :  { %v2447_v40 = vpop.permute.xlu2 %2446 }
0x195d   :  { %v2374_v35 = vpop.permute.xlu0 %2373 }
0x195e   :  { %2376 = vst.msk [vmem:[#allocation2] sm:$0xff] %vm562_vm4, %v2374_v35 }
0x1965   :  { %v2520_v37 = vpop.permute.xlu1 %2519  ;;  %v2301_v38 = vpop.permute.xlu0 %2300 }
0x1966   :  { %2522 = vst.msk [vmem:[#allocation2] sm:$0xff] %vm709_vm5, %v2520_v37 }
0x1967   :  { %2303 = vst.msk [vmem:[#allocation2 + $0x8] sm:$0xff] %vm415_vm3, %v2301_v38  ;;  %v2735_v38 = vld [vmem:[%s5569_s18 + $0x18] sm:$0xff] }
0x1968   :  { %2449 = vst.msk [vmem:[#allocation2 + $0x8] sm:$0xff] %vm562_vm4, %v2447_v40  ;;  %2764 = vmatpush.msrb.mxu3 %v2735_v38 }
0x196d   :  { %v2593_v39 = vpop.permute.xlu1 %2592  ;;  %v2596_v43 = vld [vmem:[#allocation2] sm:$0xff] }
0x196e   :  { %2595 = vst.msk [vmem:[#allocation2 + $0x8] sm:$0xff] %vm709_vm5, %v2593_v39  ;;  %3903 = vmatmul.msk.f32.vlgmr.msrb.gmra.mxu1 %vm172_vm1, %v2596_v43 }
0x1975   :  { %v2597_v45 = vld [vmem:[#allocation2 + $0x8] sm:$0xff] }
0x1976   :  { %3904 = vmatmul.msk.f32.gmra.mxu1 %vm172_vm1, %v2597_v45 }
0x19eb   :  { %v2629_v47 = vpop.f32.mrf.mxu1 }
0x19ec   :  { %v2630_v44 = vadd.f32 %v4057_v46, %v2629_v47  ;;  %v2734_v47 = vld [vmem:[%s5569_s18 + $0x10] sm:$0xff] }
0x19ed   :  { %2765 = vmatpush.msrb.mxu3 %v2734_v47 }
0x19ee   :  { %v2635_v49 = vadd.f32 %v2630_v44, %v4988_v48  ;;  %v2733_v44 = vld [vmem:[%s5569_s18 + $0x8] sm:$0xff] }
0x19ef   :  { %2766 = vmatpush.msrb.mxu3 %v2733_v44 }
0x19f0   :  { %v2639_v50 = vsel %vm172_vm1, %v2635_v49, 0.0 }
0x19f1   :  { %2640 = vadd.xlane.f32.xlu0 %v2639_v50  ;;  %v4060_v50 = vld [vmem:[%s5567_s17] ss:$0 sm:$0xff] }
0x19f3   :  { %v2632_v51 = vpop.f32.mrf.mxu1 }
0x19f4   :  { %v2633_v52 = vadd.f32 %v4057_v46, %v2632_v51 }
0x19f6   :  { %v2636_v53 = vadd.f32 %v2633_v52, %v4994_v55 }
0x19f8   :  { %v2642_v42 = vsel %vm172_vm1, %v2636_v53, 0.0 }
0x19f9   :  { %2643 = vadd.xlane.f32.xlu2 %v2642_v42 }
0x1a64   :  { %v2641_v54 = vpop.xlane.xlu0 %2640 }
0x1a65   :  { %v2645_v56 = vmul.f32 %v2641_v54, %v4587_v20 }
0x1a67   :  { %v2647_v57 = vsub.f32 %v2635_v49, %v2645_v56  ;;  %v2732_v49 = vld [vmem:[%s5569_s18] sm:$0xff] }
0x1a68   :  { %2767 = vmatpush.msrb.mxu3 %v2732_v49 }
0x1a69   :  { %v2649_v62 = vmul.f32 %v2647_v57, %v2647_v57 }
0x1a6b   :  { %v2651_v58 = vsel %vm172_vm1, %v2649_v62, 0.0 }
0x1a6c   :  { %2652 = vadd.xlane.f32.xlu1 %v2651_v58  ;;  %v2644_v59 = vpop.xlane.xlu2 %2643 }
0x1a6d   :  { %v2646_v48 = vmul.f32 %v2644_v59, %v4587_v20 }
0x1a6f   :  { %v5154_v5 = vsub.f32 %v2636_v53, %v2646_v48 }
0x1a71   :  { %v2650_v3 = vmul.f32 %v5154_v5, %v5154_v5 }
0x1a73   :  { %v2654_v55 = vsel %vm172_vm1, %v2650_v3, 0.0 }
0x1a74   :  { %2655 = vadd.xlane.f32.xlu2 %v2654_v55 }
0x1adf   :  { %v2653_v63 = vpop.xlane.xlu1 %2652 }
0x1ae0   :  { %v2657_v0 = vmul.f32 %v2653_v63, %v4587_v20 }
0x1ae2   :  { %v2659_v1 = vadd.f32 1e-05, %v2657_v0 }
0x1ae4   :  { %4188 = vrsqrt.f32 %v2659_v1  ;;  %vm2667_vm12 = vweird.f32 %v2659_v1 }
0x1ae7   :  { %v2656_v8 = vpop.xlane.xlu2 %2655 }
0x1ae8   :  { %v2658_v9 = vmul.f32 %v2656_v8, %v4587_v20 }
0x1aea   :  { %v4189_v14 = vpop.eup %4188  ;;  %v2660_v41 = vadd.f32 1e-05, %v2658_v9  ;;  %v3910_v9 = vld [vmem:[%s5644_s27 + $0x38] sm:$0xff] }
0x1aeb   :  { %v2662_v15 = vmul.f32 %v4189_v14, %v2659_v1  ;;  %vm2668_vm11 = vweird.f32 %v4189_v14  ;;  %2859 = vmatpush.msrb.mxu0 %v3910_v9 }
0x1aec   :  { %4190 = vrsqrt.f32 %v2660_v41  ;;  %vm2669_vm13 = vmor %vm2667_vm12, %vm2668_vm11  ;;  %vm2677_vm15 = vweird.f32 %v2660_v41 }
0x1aed   :  { %v2663_v17 = vmul.f32 %v4189_v14, %v2662_v15  ;;  %2860 = vmatpush.msrb.mxu0 %v3909_v11 }
0x1aef   :  { %v2664_v19 = vmul.f32 0.5, %v2663_v17 }
0x1af1   :  { %v2665_v21 = vsub.f32 1.5, %v2664_v19 }
0x1af2   :  { %v4191_v22 = vpop.eup %4190 }
0x1af3   :  { %v2666_v7 = vmul.f32 %v4189_v14, %v2665_v21  ;;  %v2672_v36 = vmul.f32 %v4191_v22, %v2660_v41  ;;  %vm2678_vm14 = vweird.f32 %v4191_v22  ;;  %v3907_v41 = vld [vmem:[%s5644_s27 + $0x20] sm:$0xff] }
0x1af4   :  { %vm2679_vm6 = vmor %vm2677_vm15, %vm2678_vm14 }
0x1af5   :  { %v2670_v26 = vsel %vm2669_vm13, %v4189_v14, %v2666_v7  ;;  %v2673_v27 = vmul.f32 %v4191_v22, %v2672_v36  ;;  %v3908_v14 = vld [vmem:[%s5644_s27 + $0x28] sm:$0xff]  ;;  %s5672_s27 = sld [smem:[#allocation13_spill]] }
0x1af6   :  { %v2681_v28 = vmul.f32 %v2670_v26, %v2647_v57  ;;  %v4061_v57 = vld [vmem:[%s5667_s8] ss:$0 sm:$0xff]  ;;  %2861 = vmatpush.msrb.mxu0 %v3908_v14 }
0x1af7   :  { %v2674_v31 = vmul.f32 0.5, %v2673_v27  ;;  %v4062_v26 = vld [vmem:[%s5571_s20] ss:$0 sm:$0xff] }
0x1af8   :  { %v2686_v32 = vmul.f32 %v4058_v24, %v2681_v28  ;;  %2862 = vmatpush.msrb.mxu0 %v3907_v41 }
0x1af9   :  { %v2675_v35 = vsub.f32 1.5, %v2674_v31 }
0x1afa   :  { %v2691_v37 = vadd.f32 %v4059_v29, %v2686_v32 }
0x1afb   :  { %v2676_v40 = vmul.f32 %v4191_v22, %v2675_v35 }
0x1afc   :  { %3905 = vmatmul.msk.f32.vlgmr.msra.gmra.mxu2 %vm172_vm1, %v2691_v37 }
0x1afd   :  { %v2680_v39 = vsel %vm2679_vm6, %v4191_v22, %v2676_v40 }
0x1afe   :  { %v2682_v43 = vmul.f32 %v2680_v39, %v5154_v5 }
0x1b00   :  { %v2687_v45 = vmul.f32 %v4058_v24, %v2682_v43 }
0x1b02   :  { %v2692_v46 = vadd.f32 %v4059_v29, %v2687_v45  ;;  %v4064_v45 = vld [vmem:[%s5562_s11 + $0x1] ss:$0 sm:$0xff]  ;;  %s5668_s11 = smov 8  }
0x1b04   :  { %3906 = vmatmul.msk.f32.gmra.mxu2 %vm172_vm1, %v2692_v46 }
0x1b7f   :  { %v2724_v51 = vpop.f32.mrf.mxu2 }
0x1b80   :  { %v2725_v52 = vadd.f32 %v4060_v50, %v2724_v51 }
0x1b82   :  { %v2730_v53 = vmax.f32 %v2725_v52, 0.0 }
0x1b84   :  { %2768 = vmatmul.f32.vlgmr.msrb.gmra.mxu3 %v2730_v53 }
0x1b87   :  { %v2727_v42 = vpop.f32.mrf.mxu2 }
0x1b88   :  { %v2728_v54 = vadd.f32 %v4060_v50, %v2727_v42 }
0x1b8a   :  { %v2731_v56 = vmax.f32 %v2728_v54, 0.0 }
0x1b8c   :  { %2771 = vmatmul.f32.gmra.mxu3 %v2731_v56 }
0x1c07   :  { %v2769_v62 = vpop.f32.mrf.mxu3 }
0x1c08   :  { %v2770_v58 = vadd.f32 %v4061_v57, %v2769_v62 }
0x1c0a   :  { %v2775_v59 = vadd.f32 %v2770_v58, %v2691_v37 }
0x1c0c   :  { %v2779_v48 = vsel %vm172_vm1, %v2775_v59, 0.0 }
0x1c0d   :  { %2780 = vadd.xlane.f32.xlu0 %v2779_v48 }
0x1c0f   :  { %v2772_v5 = vpop.f32.mrf.mxu3 }
0x1c10   :  { %v2773_v3 = vadd.f32 %v4061_v57, %v2772_v5 }
0x1c12   :  { %v2776_v55 = vadd.f32 %v2773_v3, %v2692_v46 }
0x1c14   :  { %v2782_v60 = vsel %vm172_vm1, %v2776_v55, 0.0 }
0x1c15   :  { %2783 = vadd.xlane.f32.xlu1 %v2782_v60 }
0x1c80   :  { %v2781_v61 = vpop.xlane.xlu0 %2780 }
0x1c81   :  { %v2785_v10 = vmul.f32 %v2781_v61, %v4587_v20 }
0x1c83   :  { %v2787_v12 = vsub.f32 %v2775_v59, %v2785_v10 }
0x1c85   :  { %v2789_v63 = vmul.f32 %v2787_v12, %v2787_v12 }
0x1c87   :  { %v2791_v0 = vsel %vm172_vm1, %v2789_v63, 0.0 }
0x1c88   :  { %v2784_v1 = vpop.xlane.xlu1 %2783  ;;  %2792 = vadd.xlane.f32.xlu2 %v2791_v0 }
0x1c89   :  { %v2786_v2 = vmul.f32 %v2784_v1, %v4587_v20 }
0x1c8b   :  { %v2788_v4 = vsub.f32 %v2776_v55, %v2786_v2 }
0x1c8d   :  { %v2790_v6 = vmul.f32 %v2788_v4, %v2788_v4 }
0x1c8f   :  { %v2794_v8 = vsel %vm172_vm1, %v2790_v6, 0.0 }
0x1c90   :  { %2795 = vadd.xlane.f32.xlu0 %v2794_v8 }
0x1cfb   :  { %v2793_v13 = vpop.xlane.xlu2 %2792 }
0x1cfc   :  { %v2797_v15 = vmul.f32 %v2793_v13, %v4587_v20 }
0x1cfe   :  { %v2799_v16 = vadd.f32 1e-05, %v2797_v15 }
0x1d00   :  { %4192 = vrsqrt.f32 %v2799_v16  ;;  %vm2807_vm8 = vweird.f32 %v2799_v16 }
0x1d03   :  { %v2796_v17 = vpop.xlane.xlu0 %2795 }
0x1d04   :  { %v2798_v18 = vmul.f32 %v2796_v17, %v4587_v20 }
0x1d06   :  { %v4193_v19 = vpop.eup %4192  ;;  %v2800_v33 = vadd.f32 1e-05, %v2798_v18 }
0x1d07   :  { %v2802_v21 = vmul.f32 %v4193_v19, %v2799_v16  ;;  %vm2808_vm7 = vweird.f32 %v4193_v19 }
0x1d08   :  { %4194 = vrsqrt.f32 %v2800_v33  ;;  %vm2809_vm9 = vmor %vm2807_vm8, %vm2808_vm7  ;;  %vm2817_vm11 = vweird.f32 %v2800_v33 }
0x1d09   :  { %v2803_v22 = vmul.f32 %v4193_v19, %v2802_v21 }
0x1d0b   :  { %v2804_v23 = vmul.f32 0.5, %v2803_v22 }
0x1d0d   :  { %v2805_v7 = vsub.f32 1.5, %v2804_v23 }
0x1d0e   :  { %v4195_v36 = vpop.eup %4194 }
0x1d0f   :  { %v2806_v24 = vmul.f32 %v4193_v19, %v2805_v7  ;;  %v2812_v25 = vmul.f32 %v4195_v36, %v2800_v33  ;;  %vm2818_vm10 = vweird.f32 %v4195_v36 }
0x1d10   :  { %vm2819_vm12 = vmor %vm2817_vm11, %vm2818_vm10 }
0x1d11   :  { %v2810_v27 = vsel %vm2809_vm9, %v4193_v19, %v2806_v24  ;;  %v2813_v28 = vmul.f32 %v4195_v36, %v2812_v25 }
0x1d12   :  { %v2821_v29 = vmul.f32 %v2810_v27, %v2787_v12 }
0x1d13   :  { %v2814_v31 = vmul.f32 0.5, %v2813_v28 }
0x1d14   :  { %v2826_v32 = vmul.f32 %v4062_v26, %v2821_v29 }
0x1d15   :  { %v2815_v34 = vsub.f32 1.5, %v2814_v31 }
0x1d16   :  { %v5262_v35 = vadd.f32 %v4063_v30, %v2826_v32 }
0x1d17   :  { %v2816_v37 = vmul.f32 %v4195_v36, %v2815_v34 }
0x1d18   :  { %3912 = vmatmul.msk.f32.vlgmr.msrb.gmra.mxu0 %vm172_vm1, %v5262_v35 }
0x1d19   :  { %v2820_v38 = vsel %vm2819_vm12, %v4195_v36, %v2816_v37 }
0x1d1a   :  { %v2822_v40 = vmul.f32 %v2820_v38, %v2788_v4 }
0x1d1c   :  { %v2827_v39 = vmul.f32 %v4062_v26, %v2822_v40 }
0x1d1e   :  { %v5266_v43 = vadd.f32 %v4063_v30, %v2827_v39 }
0x1d20   :  { %3913 = vmatmul.msk.f32.gmra.mxu0 %vm172_vm1, %v5266_v43 }
0x1d95   :  { %v2864_v46 = vpop.f32.mrf.mxu0 }
0x1d96   :  { %v5273_v47 = vadd.f32 %v4064_v45, %v2864_v46 }
0x1d98   :  { %2873 = vrot.lane.b32.xlu1 %v5273_v47, %s5658_s0  ;;  %v5290_v51 = vmul.f32 0.35355338, %v5273_v47 }
0x1d9d   :  { %v2867_v44 = vpop.f32.mrf.mxu0 }
0x1d9e   :  { %v5277_v49 = vadd.f32 %v4064_v45, %v2867_v44 }
0x1da0   :  { %2942 = vrot.lane.b32.xlu2 %v5277_v49, %s5658_s0  ;;  %v5283_v50 = vpack.i.bf16 %v5277_v49, %v5273_v47  ;;  %v5296_v53 = vmul.f32 0.35355338, %v5277_v49  ;;  %v4019_v4 = vpack.i.bf16 %v5273_v47, %v5277_v49 }
0x1da8   :  { %4015 = vrot.lane.b32.xlu2 %v5283_v50, %s5660_s1 }
0x1db0   :  { %3085 = vrot.lane.b32.xlu2 %v5277_v49, %s5657_s24 }
0x1db8   :  { %3010 = vrot.lane.b32.xlu2 %v5290_v51, %s5659_s26 }
0x1dfa   :  { %v2943_v52 = vpop.permute.xlu2 %2942 }
0x1dfb   :  { %3917 = vmatpush.xpose.msk.msra.mxu0 %vm207_vm2, %v2943_v52 }
0x1dfe   :  { %3918 = vmatmul.msk.f32.vlgmr.msra.gmra.mxu0 %vm207_vm2, %v5296_v53 }
0x1e02   :  { %v4016_v42 = vpop.permute.xlu2 %4015 }
0x1e03   :  { %v4017_v54 = vunpack.i.l.bf16 %v4016_v42  ;;  %v4018_v56 = vunpack.i.h.bf16 %v4016_v42 }
0x1e05   :  { %2935 = vmatpush.msrb.mxu2 %v4017_v54 }
0x1e0a   :  { %v2874_v57 = vpop.permute.xlu1 %2873  ;;  %v3086_v62 = vpop.permute.xlu2 %3085 }
0x1e0b   :  { %3914 = vmatpush.xpose.msk.msra.mxu1 %vm207_vm2, %v2874_v57 }
0x1e0e   :  { %3915 = vmatmul.msk.f32.vlgmr.msra.gmra.mxu1 %vm207_vm2, %v5290_v51 }
0x1e0f   :  { %3004 = vmatpush.msrb.mxu1 %v4018_v56 }
0x1e11   :  { %3923 = vmatpush.xpose.msk.msra.mxu1 %vm207_vm2, %v3086_v62 }
0x1e12   :  { %v3011_v21 = vpop.permute.xlu2 %3010 }
0x1e7b   :  { %v2966_v48 = vpop.f32.mrf.mxu0 }
0x1e7c   :  { %v2969_v5 = vsel %vm207_vm2, %v2966_v48, -inf }
0x1e8b   :  { %v2897_v58 = vpop.f32.mrf.mxu1 }
0x1e8c   :  { %v2900_v59 = vsel %vm207_vm2, %v2897_v58, -inf }
0x1e8d   :  { %2901 = vmax.xlane.f32.xlu0 %v2900_v59 }
0x1e95   :  { %2970 = vmax.xlane.f32.xlu0 %v2969_v5 }
0x1f00   :  { %v2902_v3 = vpop.xlane.xlu0 %2901 }
0x1f01   :  { %v2903_v55 = vsub.f32 %v2897_v58, %v2902_v3 }
0x1f03   :  { %v2904_v60 = vmul.f32 1.442695, %v2903_v55 }
0x1f05   :  { %4196 = vpow2.f32 %v2904_v60 }
0x1f08   :  { %v2971_v61 = vpop.xlane.xlu0 %2970 }
0x1f09   :  { %v2972_v10 = vsub.f32 %v2966_v48, %v2971_v61 }
0x1f0b   :  { %v4197_v12 = vpop.eup %4196  ;;  %v2973_v63 = vmul.f32 1.442695, %v2972_v10 }
0x1f0c   :  { %v2906_v0 = vsel %vm207_vm2, %v4197_v12, 0.0 }
0x1f0d   :  { %4198 = vpow2.f32 %v2973_v63  ;;  %2907 = vadd.xlane.f32.xlu0 %v2906_v0 }
0x1f13   :  { %v4199_v1 = vpop.eup %4198 }
0x1f14   :  { %v2975_v2 = vsel %vm207_vm2, %v4199_v1, 0.0 }
0x1f15   :  { %2976 = vadd.xlane.f32.xlu1 %v2975_v2 }
0x1f21   :  { %3012 = vrot.lane.b32.xlu0 %v5273_v47, %s5657_s24 }
0x1f29   :  { %3083 = vrot.lane.b32.xlu0 %v5296_v53, %s5659_s26 }
0x1f2e   :  { %4020 = vrot.lane.b32.xlu1 %v4019_v4, %s5662_s2  ;;  %s5671_s2 = sld [smem:[#allocation12_spill]] }
0x1f36   :  { %3158 = vrot.lane.b32.xlu1 %v5273_v47, %s5649_s4 }
0x1f3e   :  { %3377 = vrot.lane.b32.xlu1 %v5277_v49, %s5650_s29 }
0x1f80   :  { %v2908_v6 = vpop.xlane.xlu0 %2907 }
0x1f81   :  { %4200 = vrcp.f32 %v2908_v6 }
0x1f87   :  { %v4201_v8 = vpop.eup %4200 }
0x1f88   :  { %v2910_v9 = vmul.f32 %v4201_v8, %v2908_v6  ;;  %v2977_v11 = vpop.xlane.xlu1 %2976 }
0x1f89   :  { %4202 = vrcp.f32 %v2977_v11 }
0x1f8a   :  { %v2911_v14 = vsub.f32 2.0, %v2910_v9 }
0x1f8c   :  { %v2912_v41 = vmul.f32 %v4201_v8, %v2911_v14 }
0x1f8e   :  { %v2913_v13 = vmul.f32 %v4197_v12, %v2912_v41 }
0x1f8f   :  { %v4203_v15 = vpop.eup %4202 }
0x1f90   :  { %v2979_v16 = vmul.f32 %v4203_v15, %v2977_v11  ;;  %3916 = vmatmul.msk.f32.vlgmr.msrb.gmra.mxu2 %vm207_vm2, %v2913_v13 }
0x1f92   :  { %v2980_v17 = vsub.f32 2.0, %v2979_v16 }
0x1f93   :  { %v3013_v18 = vpop.permute.xlu0 %3012 }
0x1f94   :  { %v2981_v19 = vmul.f32 %v4203_v15, %v2980_v17  ;;  %3920 = vmatpush.xpose.msk.msra.mxu2 %vm207_vm2, %v3013_v18 }
0x1f96   :  { %v2982_v33 = vmul.f32 %v4199_v1, %v2981_v19 }
0x1f98   :  { %3919 = vmatmul.msk.f32.vlgmr.msrb.gmra.mxu1 %vm207_vm2, %v2982_v33  ;;  %3921 = vmatmul.msk.f32.vlgmr.msra.gmra.mxu2 %vm207_vm2, %v3011_v21 }
0x1f9b   :  { %v3084_v22 = vpop.permute.xlu0 %3083 }
0x1fa0   :  { %v4021_v23 = vpop.permute.xlu1 %4020  ;;  %3924 = vmatmul.msk.f32.vlgmr.msra.gmra.mxu1 %vm207_vm2, %v3084_v22 }
0x1fa1   :  { %v4023_v7 = vunpack.i.h.bf16 %v4021_v23  ;;  %v4022_v36 = vunpack.i.l.bf16 %v4021_v23 }
0x1fa3   :  { %3073 = vmatpush.msrb.mxu0 %v4023_v7  ;;  %3146 = vmatpush.msrb.mxu2 %v4022_v36 }
0x1fa8   :  { %v3159_v24 = vpop.permute.xlu1 %3158 }
0x1fa9   :  { %3926 = vmatpush.xpose.msk.msra.mxu0 %vm207_vm2, %v3159_v24 }
0x2013   :  { %v2937_v25 = vpop.f32.mrf.mxu2 }
0x2014   :  { %2940 = vst.msk [vmem:[#allocation2] sm:$0xff] %vm207_vm2, %v2937_v25 }
0x2015   :  { %v3006_v26 = vpop.f32.mrf.mxu1 }
0x2016   :  { %3009 = vst.msk [vmem:[#allocation2 + $0x8] sm:$0xff] %vm207_vm2, %v3006_v26 }
0x201b   :  { %v3035_v27 = vpop.f32.mrf.mxu2 }
0x201c   :  { %v3038_v28 = vsel %vm207_vm2, %v3035_v27, -inf }
0x201d   :  { %3039 = vmax.xlane.f32.xlu0 %v3038_v28  ;;  %v3108_v29 = vpop.f32.mrf.mxu1 }
0x201e   :  { %v3111_v30 = vsel %vm207_vm2, %v3108_v29, -inf }
0x201f   :  { %3112 = vmax.xlane.f32.xlu2 %v3111_v30 }
0x2031   :  { %3229 = vrot.lane.b32.xlu0 %v5296_v53, %s5651_s10 }
0x2037   :  { %3231 = vrot.lane.b32.xlu2 %v5277_v49, %s5649_s4  ;;  %s5669_s4 = smov 16  }
0x2039   :  { %3375 = vrot.lane.b32.xlu0 %v5296_v53, %s5661_s30 }
0x203f   :  { %3156 = vrot.lane.b32.xlu2 %v5290_v51, %s5651_s10 }
0x2047   :  { %3304 = vrot.lane.b32.xlu2 %v5273_v47, %s5650_s29  ;;  %v3378_v47 = vpop.permute.xlu1 %3377 }
0x2090   :  { %v3040_v31 = vpop.xlane.xlu0 %3039 }
0x2091   :  { %v3041_v32 = vsub.f32 %v3035_v27, %v3040_v31 }
0x2092   :  { %v3113_v34 = vpop.xlane.xlu2 %3112 }
0x2093   :  { %v3042_v37 = vmul.f32 1.442695, %v3041_v32  ;;  %v3114_v38 = vsub.f32 %v3108_v29, %v3113_v34 }
0x2095   :  { %4204 = vpow2.f32 %v3042_v37  ;;  %v3115_v40 = vmul.f32 1.442695, %v3114_v38 }
0x2097   :  { %4206 = vpow2.f32 %v3115_v40 }
0x209a   :  { %v3232_v39 = vpop.permute.xlu2 %3231 }
0x209b   :  { %v4205_v45 = vpop.eup %4204  ;;  %3929 = vmatpush.xpose.msk.msra.mxu2 %vm207_vm2, %v3232_v39 }
0x209c   :  { %v3044_v46 = vsel %vm207_vm2, %v4205_v45, 0.0 }
0x209d   :  { %3045 = vadd.xlane.f32.xlu1 %v3044_v46  ;;  %v4207_v44 = vpop.eup %4206 }
0x209e   :  { %v3117_v49 = vsel %vm207_vm2, %v4207_v44, 0.0 }
0x20a2   :  { %v3157_v53 = vpop.permute.xlu2 %3156 }
0x20a3   :  { %v3230_v60 = vpop.permute.xlu0 %3229 }
0x20a5   :  { %3118 = vadd.xlane.f32.xlu1 %v3117_v49 }
0x20aa   :  { %v3305_v48 = vpop.permute.xlu2 %3304 }
0x20ab   :  { %v3376_v10 = vpop.permute.xlu0 %3375 }
0x20be   :  { %3302 = vrot.lane.b32.xlu1 %v5290_v51, %s5661_s30  ;;  %s5670_s30 = sld [smem:[#allocation10_spill]] }
0x2110   :  { %v3046_v52 = vpop.xlane.xlu1 %3045 }
0x2111   :  { %4208 = vrcp.f32 %v3046_v52 }
0x2117   :  { %v4209_v42 = vpop.eup %4208 }
0x2118   :  { %v3048_v54 = vmul.f32 %v4209_v42, %v3046_v52  ;;  %v3119_v56 = vpop.xlane.xlu1 %3118 }
0x2119   :  { %4210 = vrcp.f32 %v3119_v56 }
0x211a   :  { %v3049_v57 = vsub.f32 2.0, %v3048_v54 }
0x211c   :  { %v3050_v62 = vmul.f32 %v4209_v42, %v3049_v57 }
0x211e   :  { %v3051_v58 = vmul.f32 %v4205_v45, %v3050_v62 }
0x211f   :  { %v4211_v59 = vpop.eup %4210 }
0x2120   :  { %v3121_v5 = vmul.f32 %v4211_v59, %v3119_v56  ;;  %3922 = vmatmul.msk.f32.vlgmr.msrb.gmra.mxu0 %vm207_vm2, %v3051_v58 }
0x2121   :  { %3932 = vmatpush.xpose.msk.msrb.mxu0 %vm207_vm2, %v3305_v48 }
0x2122   :  { %v3122_v3 = vsub.f32 2.0, %v3121_v5 }
0x2124   :  { %v3123_v51 = vmul.f32 %v4211_v59, %v3122_v3 }
0x2126   :  { %v3124_v55 = vmul.f32 %v4207_v44, %v3123_v51 }
0x2128   :  { %3925 = vmatmul.msk.f32.vlgmr.msrb.gmra.mxu2 %vm207_vm2, %v3124_v55  ;;  %3927 = vmatmul.msk.f32.vlgmr.msra.gmra.mxu0 %vm207_vm2, %v3157_v53 }
0x2129   :  { %3935 = vmatpush.xpose.msk.msrb.mxu2 %vm207_vm2, %v3378_v47 }
0x2130   :  { %v3303_v61 = vpop.permute.xlu1 %3302  ;;  %3930 = vmatmul.msk.f32.vlgmr.msra.gmra.mxu2 %vm207_vm2, %v3230_v60 }
0x2131   :  { %3933 = vmatmul.msk.f32.vlgmr.msrb.gmra.mxu0 %vm207_vm2, %v3303_v61 }
0x2138   :  { %3936 = vmatmul.msk.f32.vlgmr.msrb.gmra.mxu2 %vm207_vm2, %v3376_v10 }
0x219d   :  { %v3075_v12 = vpop.f32.mrf.mxu0 }
0x21a5   :  { %v3181_v63 = vpop.f32.mrf.mxu0 }
0x21a6   :  { %v3184_v0 = vsel %vm207_vm2, %v3181_v63, -inf }
0x21a7   :  { %3185 = vmax.xlane.f32.xlu0 %v3184_v0 }
0x21ab   :  { %v5353_v1 = vpop.f32.mrf.mxu2 }
0x21ae   :  { %v3327_v2 = vpop.f32.mrf.mxu0 }
0x21af   :  { %v3330_v4 = vsel %vm207_vm2, %v3327_v2, -inf }
0x21b0   :  { %3331 = vmax.xlane.f32.xlu1 %v3330_v4  ;;  %v3941_v4 = vld [vmem:[%s5564_s12 + $0x38] sm:$0xff] }
0x21b1   :  { %3476 = vmatpush.msra.mxu0 %v3941_v4  ;;  %v3959_v4 = vld [vmem:[%s5569_s18 + $0xa8] sm:$0xff] }
0x21b3   :  { %v3254_v6 = vpop.f32.mrf.mxu2 }
0x21b4   :  { %v3257_v8 = vsel %vm207_vm2, %v3254_v6, -inf }
0x21b5   :  { %3258 = vmax.xlane.f32.xlu2 %v3257_v8  ;;  %v3939_v8 = vld [vmem:[%s5564_s12 + $0x28] sm:$0xff] }
0x21bb   :  { %v3400_v9 = vpop.f32.mrf.mxu2 }
0x21bc   :  { %v3403_v11 = vsel %vm207_vm2, %v3400_v9, -inf }
0x21bd   :  { %3404 = vmax.xlane.f32.xlu0 %v3403_v11 }
0x221a   :  { %v3186_v14 = vpop.xlane.xlu0 %3185 }
0x221b   :  { %v3187_v41 = vsub.f32 %v3181_v63, %v3186_v14 }
0x221d   :  { %v3188_v13 = vmul.f32 1.442695, %v3187_v41 }
0x221f   :  { %4212 = vpow2.f32 %v3188_v13 }
0x2223   :  { %v3332_v15 = vpop.xlane.xlu1 %3331 }
0x2224   :  { %v3333_v16 = vsub.f32 %v3327_v2, %v3332_v15 }
0x2225   :  { %v4213_v17 = vpop.eup %4212 }
0x2226   :  { %v3334_v18 = vmul.f32 1.442695, %v3333_v16  ;;  %v3190_v19 = vsel %vm207_vm2, %v4213_v17, 0.0 }
0x2227   :  { %3191 = vadd.xlane.f32.xlu2 %v3190_v19 }
0x2228   :  { %4214 = vpow2.f32 %v3334_v18  ;;  %v3259_v33 = vpop.xlane.xlu2 %3258 }
0x2229   :  { %v3260_v21 = vsub.f32 %v3254_v6, %v3259_v33  ;;  %v3940_v6 = vld [vmem:[%s5564_s12 + $0x30] sm:$0xff] }
0x222a   :  { %3477 = vmatpush.msra.mxu0 %v3940_v6 }
0x222b   :  { %v3261_v22 = vmul.f32 1.442695, %v3260_v21 }
0x222c   :  { %3478 = vmatpush.msra.mxu0 %v3939_v8 }
0x222d   :  { %4216 = vpow2.f32 %v3261_v22 }
0x222e   :  { %v4215_v23 = vpop.eup %4214 }
0x222f   :  { %v3336_v7 = vsel %vm207_vm2, %v4215_v23, 0.0 }
0x2230   :  { %3337 = vadd.xlane.f32.xlu0 %v3336_v7  ;;  %v3405_v36 = vpop.xlane.xlu0 %3404 }
0x2231   :  { %v3406_v24 = vsub.f32 %v3400_v9, %v3405_v36 }
0x2233   :  { %v4217_v25 = vpop.eup %4216  ;;  %v3407_v26 = vmul.f32 1.442695, %v3406_v24 }
0x2234   :  { %v3263_v27 = vsel %vm207_vm2, %v4217_v25, 0.0 }
0x2235   :  { %4218 = vpow2.f32 %v3407_v26  ;;  %3264 = vadd.xlane.f32.xlu1 %v3263_v27 }
0x223b   :  { %v4219_v28 = vpop.eup %4218 }
0x223c   :  { %v3409_v29 = vsel %vm207_vm2, %v4219_v28, 0.0 }
0x223d   :  { %3410 = vadd.xlane.f32.xlu2 %v3409_v29 }
0x2244   :  { %4030 = vrot.lane.b32.xlu0 %v5283_v50, %s5663_s23  ;;  %s5674_s23 = sld [smem:[#allocation14_spill]] }
0x224e   :  { %4025 = vrot.lane.b32.xlu1 %v5283_v50, %s5664_s19 }
0x2255   :  { %3079 = vrot.lane.b32.xlu2 %v3075_v12, %s5668_s11 }
0x229a   :  { %v3192_v30 = vpop.xlane.xlu2 %3191 }
0x229b   :  { %4220 = vrcp.f32 %v3192_v30 }
0x22a1   :  { %v4221_v37 = vpop.eup %4220 }
0x22a2   :  { %v3194_v40 = vmul.f32 %v4221_v37, %v3192_v30 }
0x22a3   :  { %v3338_v34 = vpop.xlane.xlu0 %3337 }
0x22a4   :  { %v3195_v44 = vsub.f32 2.0, %v3194_v40 }
0x22a6   :  { %v3196_v47 = vmul.f32 %v4221_v37, %v3195_v44  ;;  %v3948_v37 = vld [vmem:[%s5568_s16 + $0x28] sm:$0xff]  ;;  %v3968_v44 = vld [vmem:[%s5569_s18 + $0xf0] sm:$0xff] }
0x22a8   :  { %v3265_v31 = vpop.xlane.xlu1 %3264  ;;  %v3197_v58 = vmul.f32 %v4213_v17, %v3196_v47  ;;  %v4065_v17 = vld [vmem:[%s5563_s13 + $0x1] ss:$0 sm:$0xff] }
0x22a9   :  { %4222 = vrcp.f32 %v3265_v31 }
0x22aa   :  { %4224 = vrcp.f32 %v3338_v34 }
0x22af   :  { %v4223_v38 = vpop.eup %4222 }
0x22b0   :  { %v3411_v32 = vpop.xlane.xlu2 %3410  ;;  %v3267_v39 = vmul.f32 %v4223_v38, %v3265_v31  ;;  %v4225_v46 = vpop.eup %4224 }
0x22b1   :  { %4226 = vrcp.f32 %v3411_v32  ;;  %v3340_v52 = vmul.f32 %v4225_v46, %v3338_v34  ;;  %v3949_v34 = vld [vmem:[%s5568_s16 + $0x30] sm:$0xff] }
0x22b2   :  { %v3268_v50 = vsub.f32 2.0, %v3267_v39 }
0x22b3   :  { %v3341_v59 = vsub.f32 2.0, %v3340_v52  ;;  %v3966_v52 = vld [vmem:[%s5569_s18 + $0xe0] sm:$0xff] }
0x22b4   :  { %v3269_v53 = vmul.f32 %v4223_v38, %v3268_v50  ;;  %v3947_v38 = vld [vmem:[%s5568_s16 + $0x20] sm:$0xff]  ;;  %v3967_v50 = vld [vmem:[%s5569_s18 + $0xe8] sm:$0xff] }
0x22b5   :  { %v3342_v55 = vmul.f32 %v4225_v46, %v3341_v59  ;;  %v3969_v46 = vld [vmem:[%s5569_s18 + $0xf8] sm:$0xff] }
0x22b6   :  { %v4031_v54 = vpop.permute.xlu0 %4030  ;;  %v3270_v48 = vmul.f32 %v4217_v25, %v3269_v53  ;;  %3604 = vmatpush.msra.mxu2 %v3969_v46 }
0x22b7   :  { %v4227_v49 = vpop.eup %4226  ;;  %v4033_v3 = vunpack.i.h.bf16 %v4031_v54  ;;  %v4032_v51 = vunpack.i.l.bf16 %v4031_v54  ;;  %v3343_v61 = vmul.f32 %v4215_v23, %v3342_v55  ;;  %v3965_v54 = vld [vmem:[%s5569_s18 + $0xd8] sm:$0xff] }
0x22b8   :  { %v3080_v45 = vpop.permute.xlu2 %3079  ;;  %v3413_v42 = vmul.f32 %v4227_v49, %v3411_v32  ;;  %v3950_v32 = vld [vmem:[%s5568_s16 + $0x38] sm:$0xff]  ;;  %3605 = vmatpush.msra.mxu2 %v3968_v44 }
0x22b9   :  { %3082 = vst.msk [vmem:[#allocation2] sm:$0xff] %vm415_vm3, %v3080_v45 }
0x22ba   :  { %v3414_v5 = vsub.f32 2.0, %v3413_v42  ;;  %3606 = vmatpush.msra.mxu2 %v3967_v50 }
0x22bc   :  { %v3415_v60 = vmul.f32 %v4227_v49, %v3414_v5  ;;  %3607 = vmatpush.msra.mxu2 %v3966_v52  ;;  %v3687_v52 = vld [vmem:[%s5671_s2 + $0x10] sm:$0xff] }
0x22be   :  { %v3416_v10 = vmul.f32 %v4219_v28, %v3415_v60  ;;  %3608 = vmatpush.msra.mxu2 %v3965_v54 }
0x22c0   :  { %v4026_v56 = vpop.permute.xlu1 %4025 }
0x22c1   :  { %v4028_v57 = vunpack.i.h.bf16 %v4026_v56  ;;  %v4027_v62 = vunpack.i.l.bf16 %v4026_v56 }
0x22c3   :  { %3219 = vmatpush.msrb.mxu1 %v4027_v62  ;;  %3292 = vmatpush.msra.mxu3 %v4028_v57  ;;  %v3964_v57 = vld [vmem:[%s5569_s18 + $0xd0] sm:$0xff] }
0x22c4   :  { %3928 = vmatmul.msk.f32.vlgmr.msrb.gmra.mxu1 %vm207_vm2, %v3197_v58  ;;  %3931 = vmatmul.msk.f32.vlgmr.msra.gmra.mxu3 %vm207_vm2, %v3270_v48  ;;  %v3963_v58 = vld [vmem:[%s5569_s18 + $0xc8] sm:$0xff]  ;;  %v3962_v48 = vld [vmem:[%s5569_s18 + $0xc0] sm:$0xff] }
0x22c5   :  { %3365 = vmatpush.msra.mxu1 %v4032_v51  ;;  %3438 = vmatpush.msrb.mxu3 %v4033_v3  ;;  %v3961_v51 = vld [vmem:[%s5569_s18 + $0xb8] sm:$0xff] }
0x22c6   :  { %3609 = vmatpush.msra.mxu2 %v3964_v57 }
0x22c7   :  { %3571 = vmatpush.msrb.mxu1 %v3950_v32 }
0x22c8   :  { %3610 = vmatpush.msra.mxu2 %v3963_v58  ;;  %v3730_v58 = vld [vmem:[%s5672_s27 + $0x30] sm:$0xff] }
0x22c9   :  { %3572 = vmatpush.msrb.mxu1 %v3949_v34 }
0x22ca   :  { %3611 = vmatpush.msra.mxu2 %v3962_v48 }
0x22cb   :  { %3573 = vmatpush.msrb.mxu1 %v3948_v37 }
0x22cc   :  { %3934 = vmatmul.msk.f32.vlgmr.msra.gmra.mxu1 %vm207_vm2, %v3343_v61  ;;  %3937 = vmatmul.msk.f32.vlgmr.msrb.gmra.mxu3 %vm207_vm2, %v3416_v10  ;;  %v4066_v61 = vld [vmem:[%s5565_s14 + $0x1] ss:$0 sm:$0xff]  ;;  %v3960_v10 = vld [vmem:[%s5569_s18 + $0xb0] sm:$0xff] }
0x22cd   :  { %3574 = vmatpush.msrb.mxu1 %v3947_v38  ;;  %3612 = vmatpush.msra.mxu2 %v3961_v51 }
0x22cf   :  { %3613 = vmatpush.msra.mxu2 %v3960_v10 }
0x22d1   :  { %3614 = vmatpush.msra.mxu2 %v3959_v4  ;;  %v4070_v4 = vld [vmem:[%s5571_s20 + $0x1] ss:$0 sm:$0xff] }
0x2341   :  { %v3221_v12 = vpop.f32.mrf.mxu1 }
0x2342   :  { %3225 = vrot.lane.b32.xlu0 %v3221_v12, %s5669_s4 }
0x2347   :  { %v3294_v63 = vpop.f32.mrf.mxu3 }
0x2348   :  { %3298 = vrot.lane.b32.xlu2 %v3294_v63, %s5669_s4 }
0x2349   :  { %v3367_v0 = vpop.f32.mrf.mxu1 }
0x234a   :  { %3152 = vrot.lane.b32.xlu0 %v5353_v1, %s5668_s11  ;;  %3371 = vrot.lane.b32.xlu1 %v3367_v0, %s5666_s3  ;;  %v3938_v1 = vld [vmem:[%s5564_s12 + $0x20] sm:$0xff] }
0x234b   :  { %3479 = vmatpush.msra.mxu0 %v3938_v1  ;;  %v4067_v0 = vld [vmem:[%s5566_s15 + $0x1] ss:$0 sm:$0xff] }
0x234c   :  { %v3958_v1 = vld [vmem:[%s5569_s18 + $0xa0] sm:$0xff] }
0x234d   :  { %3615 = vmatpush.msra.mxu2 %v3958_v1  ;;  %v4071_v1 = vld [vmem:[%s5572_s21 + $0x1] ss:$0 sm:$0xff] }
0x234f   :  { %v3440_v2 = vpop.f32.mrf.mxu3 }
0x2352   :  { %3444 = vrot.lane.b32.xlu1 %v3440_v2, %s5666_s3  ;;  %s5675_s3 = sld [smem:[#allocation15_spill]] }
0x23a2   :  { %v3299_v41 = vpop.permute.xlu2 %3298 }
0x23b4   :  { %v3226_v9 = vpop.permute.xlu0 %3225 }
0x23b5   :  { %3228 = vst.msk [vmem:[#allocation2] sm:$0xff] %vm562_vm4, %v3226_v9 }
0x23bc   :  { %v3153_v11 = vpop.permute.xlu0 %3152  ;;  %v3372_v14 = vpop.permute.xlu1 %3371 }
0x23bd   :  { %3155 = vst.msk [vmem:[#allocation2 + $0x8] sm:$0xff] %vm415_vm3, %v3153_v11 }
0x23be   :  { %3301 = vst.msk [vmem:[#allocation2 + $0x8] sm:$0xff] %vm562_vm4, %v3299_v41 }
0x23bf   :  { %3374 = vst.msk [vmem:[#allocation2] sm:$0xff] %vm709_vm5, %v3372_v14  ;;  %v3957_v14 = vld [vmem:[%s5569_s18 + $0x98] sm:$0xff] }
0x23c0   :  { %3616 = vmatpush.msra.mxu2 %v3957_v14 }
0x23c4   :  { %v3445_v13 = vpop.permute.xlu1 %3444 }
0x23c5   :  { %3447 = vst.msk [vmem:[#allocation2 + $0x8] sm:$0xff] %vm709_vm5, %v3445_v13 }
0x23c6   :  { %v3448_v15 = vld [vmem:[#allocation2] sm:$0xff] }
0x23c7   :  { %3943 = vmatmul.msk.f32.vlgmr.msra.gmra.mxu0 %vm172_vm1, %v3448_v15 }
0x23cc   :  { %v3449_v16 = vld [vmem:[#allocation2 + $0x8] sm:$0xff] }
0x23cf   :  { %3944 = vmatmul.msk.f32.gmra.mxu0 %vm172_vm1, %v3449_v16 }
0x2444   :  { %v3481_v18 = vpop.f32.mrf.mxu0 }
0x2445   :  { %v3482_v19 = vadd.f32 %v4065_v17, %v3481_v18  ;;  %v3956_v18 = vld [vmem:[%s5569_s18 + $0x90] sm:$0xff] }
0x2446   :  { %3617 = vmatpush.msra.mxu2 %v3956_v18 }
0x2447   :  { %v3487_v33 = vadd.f32 %v3482_v19, %v5262_v35  ;;  %v3955_v19 = vld [vmem:[%s5569_s18 + $0x88] sm:$0xff] }
0x2448   :  { %3618 = vmatpush.msra.mxu2 %v3955_v19 }
0x2449   :  { %v3491_v21 = vsel %vm172_vm1, %v3487_v33, 0.0 }
0x244a   :  { %3492 = vadd.xlane.f32.xlu0 %v3491_v21  ;;  %v4068_v21 = vld [vmem:[%s5567_s17 + $0x1] ss:$0 sm:$0xff] }
0x244c   :  { %v3484_v22 = vpop.f32.mrf.mxu0 }
0x244d   :  { %v3485_v23 = vadd.f32 %v4065_v17, %v3484_v22 }
0x244f   :  { %v3488_v7 = vadd.f32 %v3485_v23, %v5266_v43 }
0x2451   :  { %v3494_v36 = vsel %vm172_vm1, %v3488_v7, 0.0 }
0x2452   :  { %3495 = vadd.xlane.f32.xlu2 %v3494_v36 }
0x24bd   :  { %v3493_v24 = vpop.xlane.xlu0 %3492 }
0x24be   :  { %v3497_v25 = vmul.f32 %v3493_v24, %v4587_v20 }
0x24c0   :  { %v3499_v26 = vsub.f32 %v3487_v33, %v3497_v25  ;;  %v3954_v33 = vld [vmem:[%s5569_s18 + $0x80] sm:$0xff]  ;;  %s5673_s18 = sld [smem:[#allocation11_spill]] }
0x24c1   :  { %3619 = vmatpush.msra.mxu2 %v3954_v33  ;;  %v3726_v33 = vld [vmem:[%s5672_s27 + $0x10] sm:$0xff] }
0x24c2   :  { %v3501_v27 = vmul.f32 %v3499_v26, %v3499_v26 }
0x24c4   :  { %v3503_v28 = vsel %vm172_vm1, %v3501_v27, 0.0 }
0x24c5   :  { %3504 = vadd.xlane.f32.xlu1 %v3503_v28  ;;  %v3496_v29 = vpop.xlane.xlu2 %3495 }
0x24c6   :  { %v3498_v35 = vmul.f32 %v3496_v29, %v4587_v20 }
0x24c8   :  { %v5407_v30 = vsub.f32 %v3488_v7, %v3498_v35 }
0x24ca   :  { %v3502_v31 = vmul.f32 %v5407_v30, %v5407_v30 }
0x24cc   :  { %v3506_v43 = vsel %vm172_vm1, %v3502_v31, 0.0 }
0x24cd   :  { %3507 = vadd.xlane.f32.xlu0 %v3506_v43 }
0x2538   :  { %v3505_v40 = vpop.xlane.xlu1 %3504 }
0x2539   :  { %v3509_v39 = vmul.f32 %v3505_v40, %v4587_v20 }
0x253b   :  { %v3511_v45 = vadd.f32 1e-05, %v3509_v39 }
0x253d   :  { %4228 = vrsqrt.f32 %v3511_v45  ;;  %vm3519_vm3 = vweird.f32 %v3511_v45 }
0x2540   :  { %v3508_v49 = vpop.xlane.xlu0 %3507 }
0x2541   :  { %v3510_v47 = vmul.f32 %v3508_v49, %v4587_v20 }
0x2543   :  { %v4229_v53 = vpop.eup %4228  ;;  %v3512_v42 = vadd.f32 1e-05, %v3510_v47  ;;  %v3688_v47 = vld [vmem:[%s5671_s2 + $0x18] sm:$0xff] }
0x2544   :  { %v3514_v56 = vmul.f32 %v4229_v53, %v3511_v45  ;;  %vm3520_vm2 = vweird.f32 %v4229_v53  ;;  %3711 = vmatpush.msra.mxu3 %v3688_v47 }
0x2545   :  { %4230 = vrsqrt.f32 %v3512_v42  ;;  %vm3521_vm4 = vmor %vm3519_vm3, %vm3520_vm2  ;;  %vm3529_vm13 = vweird.f32 %v3512_v42 }
0x2546   :  { %v3515_v62 = vmul.f32 %v4229_v53, %v3514_v56  ;;  %3712 = vmatpush.msra.mxu3 %v3687_v52 }
0x2548   :  { %v3516_v59 = vmul.f32 0.5, %v3515_v62  ;;  %v3731_v62 = vld [vmem:[%s5672_s27 + $0x38] sm:$0xff] }
0x2549   :  { %3750 = vmatpush.msrb.mxu0 %v3731_v62 }
0x254a   :  { %v3517_v5 = vsub.f32 1.5, %v3516_v59  ;;  %v3729_v59 = vld [vmem:[%s5672_s27 + $0x28] sm:$0xff] }
0x254b   :  { %v4231_v3 = vpop.eup %4230  ;;  %3751 = vmatpush.msrb.mxu0 %v3730_v58 }
0x254c   :  { %v3518_v55 = vmul.f32 %v4229_v53, %v3517_v5  ;;  %v3524_v60 = vmul.f32 %v4231_v3, %v3512_v42  ;;  %vm3530_vm5 = vweird.f32 %v4231_v3  ;;  %v3685_v42 = vld [vmem:[%s5671_s2] sm:$0xff] }
0x254d   :  { %vm3531_vm14 = vmor %vm3529_vm13, %vm3530_vm5  ;;  %3752 = vmatpush.msrb.mxu0 %v3729_v59 }
0x254e   :  { %v3522_v12 = vsel %vm3521_vm4, %v4229_v53, %v3518_v55  ;;  %v3525_v63 = vmul.f32 %v4231_v3, %v3524_v60  ;;  %v3686_v53 = vld [vmem:[%s5671_s2 + $0x8] sm:$0xff]  ;;  %v3727_v60 = vld [vmem:[%s5672_s27 + $0x18] sm:$0xff] }
0x254f   :  { %v3533_v2 = vmul.f32 %v3522_v12, %v3499_v26  ;;  %v4069_v26 = vld [vmem:[%s5670_s30 + $0x1] ss:$0 sm:$0xff]  ;;  %3713 = vmatpush.msra.mxu3 %v3686_v53 }
0x2550   :  { %v3526_v6 = vmul.f32 0.5, %v3525_v63 }
0x2551   :  { %v3538_v8 = vmul.f32 %v4066_v61, %v3533_v2  ;;  %3714 = vmatpush.msra.mxu3 %v3685_v42 }
0x2552   :  { %v3527_v9 = vsub.f32 1.5, %v3526_v6 }
0x2553   :  { %v3543_v11 = vadd.f32 %v4067_v0, %v3538_v8 }
0x2554   :  { %v3528_v41 = vmul.f32 %v4231_v3, %v3527_v9 }
0x2555   :  { %3952 = vmatmul.msk.f32.vlgmr.msrb.gmra.mxu1 %vm172_vm1, %v3543_v11 }
0x2556   :  { %v3532_v13 = vsel %vm3531_vm14, %v4231_v3, %v3528_v41  ;;  %v3728_v3 = vld [vmem:[%s5672_s27 + $0x20] sm:$0xff] }
0x2557   :  { %v3534_v15 = vmul.f32 %v3532_v13, %v5407_v30  ;;  %3753 = vmatpush.msrb.mxu0 %v3728_v3 }
0x2559   :  { %v3539_v16 = vmul.f32 %v4066_v61, %v3534_v15  ;;  %3754 = vmatpush.msrb.mxu0 %v3727_v60 }
0x255b   :  { %v3544_v17 = vadd.f32 %v4067_v0, %v3539_v16  ;;  %3755 = vmatpush.msrb.mxu0 %v3726_v33 }
0x255d   :  { %3953 = vmatmul.msk.f32.gmra.mxu1 %vm172_vm1, %v3544_v17 }
0x25d2   :  { %v3576_v22 = vpop.f32.mrf.mxu1 }
0x25d3   :  { %v3577_v23 = vadd.f32 %v4068_v21, %v3576_v22  ;;  %v3724_v22 = vld [vmem:[%s5672_s27] sm:$0xff] }
0x25d5   :  { %v3582_v7 = vmax.f32 %v3577_v23, 0.0  ;;  %v4072_v23 = vld [vmem:[%s5673_s18] ss:$0 sm:$0xff] }
0x25d7   :  { %3620 = vmatmul.f32.vlgmr.msra.gmra.mxu2 %v3582_v7 }
0x25da   :  { %v3579_v36 = vpop.f32.mrf.mxu1 }
0x25db   :  { %v3580_v24 = vadd.f32 %v4068_v21, %v3579_v36  ;;  %v3725_v21 = vld [vmem:[%s5672_s27 + $0x8] sm:$0xff] }
0x25dc   :  { %3756 = vmatpush.msrb.mxu0 %v3725_v21 }
0x25dd   :  { %v3583_v25 = vmax.f32 %v3580_v24, 0.0 }
0x25de   :  { %3757 = vmatpush.msrb.mxu0 %v3724_v22 }
0x25df   :  { %3623 = vmatmul.f32.gmra.mxu2 %v3583_v25 }
0x265a   :  { %v3621_v27 = vpop.f32.mrf.mxu2 }
0x265b   :  { %v3622_v28 = vadd.f32 %v4069_v26, %v3621_v27 }
0x265d   :  { %v3627_v29 = vadd.f32 %v3622_v28, %v3543_v11  ;;  %v4073_v28 = vld [vmem:[%s5674_s23] ss:$0 sm:$0xff] }
0x265f   :  { %v3631_v35 = vsel %vm172_vm1, %v3627_v29, 0.0 }
0x2660   :  { %3632 = vadd.xlane.f32.xlu2 %v3631_v35 }
0x2662   :  { %v3624_v30 = vpop.f32.mrf.mxu2 }
0x2663   :  { %v3625_v31 = vadd.f32 %v4069_v26, %v3624_v30 }
0x2665   :  { %v3628_v43 = vadd.f32 %v3625_v31, %v3544_v17 }
0x2667   :  { %v3634_v32 = vsel %vm172_vm1, %v3628_v43, 0.0 }
0x2668   :  { %3635 = vadd.xlane.f32.xlu1 %v3634_v32 }
0x26d3   :  { %v3633_v34 = vpop.xlane.xlu2 %3632 }
0x26d4   :  { %v3637_v37 = vmul.f32 %v3633_v34, %v4587_v20 }
0x26d6   :  { %v3639_v38 = vsub.f32 %v3627_v29, %v3637_v37 }
0x26d8   :  { %v3641_v40 = vmul.f32 %v3639_v38, %v3639_v38 }
0x26da   :  { %v3643_v39 = vsel %vm172_vm1, %v3641_v40, 0.0 }
0x26db   :  { %v3636_v45 = vpop.xlane.xlu1 %3635  ;;  %3644 = vadd.xlane.f32.xlu0 %v3643_v39 }
0x26dc   :  { %v3638_v46 = vmul.f32 %v3636_v45, %v4587_v20 }
0x26de   :  { %v3640_v44 = vsub.f32 %v3628_v43, %v3638_v46 }
0x26e0   :  { %v3642_v50 = vmul.f32 %v3640_v44, %v3640_v44 }
0x26e2   :  { %v3646_v49 = vsel %vm172_vm1, %v3642_v50, 0.0 }
0x26e3   :  { %3647 = vadd.xlane.f32.xlu2 %v3646_v49 }
0x274e   :  { %v3645_v54 = vpop.xlane.xlu0 %3644 }
0x274f   :  { %v3649_v56 = vmul.f32 %v3645_v54, %v4587_v20 }
0x2751   :  { %v3651_v57 = vadd.f32 1e-05, %v3649_v56 }
0x2753   :  { %4232 = vrsqrt.f32 %v3651_v57  ;;  %vm3659_vm6 = vweird.f32 %v3651_v57 }
0x2756   :  { %v3648_v48 = vpop.xlane.xlu2 %3647 }
0x2757   :  { %v3650_v5 = vmul.f32 %v3648_v48, %v4587_v20 }
0x2759   :  { %v4233_v51 = vpop.eup %4232  ;;  %v3652_v55 = vadd.f32 1e-05, %v3650_v5 }
0x275a   :  { %v3654_v61 = vmul.f32 %v4233_v51, %v3651_v57  ;;  %vm3660_vm15 = vweird.f32 %v4233_v51 }
0x275b   :  { %4234 = vrsqrt.f32 %v3652_v55  ;;  %vm3661_vm7 = vmor %vm3659_vm6, %vm3660_vm15  ;;  %vm3669_vm9 = vweird.f32 %v3652_v55 }
0x275c   :  { %v3655_v10 = vmul.f32 %v4233_v51, %v3654_v61 }
0x275e   :  { %v3656_v12 = vmul.f32 0.5, %v3655_v10 }
0x2760   :  { %v3657_v63 = vsub.f32 1.5, %v3656_v12 }
0x2761   :  { %v4235_v20 = vpop.eup %4234 }
0x2762   :  { %v3658_v0 = vmul.f32 %v4233_v51, %v3657_v63  ;;  %v3664_v2 = vmul.f32 %v4235_v20, %v3652_v55  ;;  %vm3670_vm8 = vweird.f32 %v4235_v20 }
0x2763   :  { %vm3671_vm10 = vmor %vm3669_vm9, %vm3670_vm8 }
0x2764   :  { %v3662_v6 = vsel %vm3661_vm7, %v4233_v51, %v3658_v0  ;;  %v3665_v8 = vmul.f32 %v4235_v20, %v3664_v2 }
0x2765   :  { %v3673_v9 = vmul.f32 %v3662_v6, %v3639_v38 }
0x2766   :  { %v3666_v11 = vmul.f32 0.5, %v3665_v8 }
0x2767   :  { %v3678_v14 = vmul.f32 %v4070_v4, %v3673_v9 }
0x2768   :  { %v3667_v41 = vsub.f32 1.5, %v3666_v11 }
0x2769   :  { %v3683_v13 = vadd.f32 %v4071_v1, %v3678_v14 }
0x276a   :  { %v3668_v15 = vmul.f32 %v4235_v20, %v3667_v41 }
0x276b   :  { %3973 = vmatmul.msk.f32.vlgmr.msra.gmra.mxu3 %vm172_vm1, %v3683_v13 }
0x276c   :  { %v3672_v16 = vsel %vm3671_vm10, %v4235_v20, %v3668_v15 }
0x276d   :  { %v3674_v17 = vmul.f32 %v3672_v16, %v3640_v44 }
0x276f   :  { %v3679_v18 = vmul.f32 %v4070_v4, %v3674_v17 }
0x2771   :  { %v3684_v19 = vadd.f32 %v4071_v1, %v3679_v18 }
0x2773   :  { %3974 = vmatmul.msk.f32.gmra.mxu3 %vm172_vm1, %v3684_v19 }
0x27ee   :  { %v3716_v7 = vpop.f32.mrf.mxu3 }
0x27ef   :  { %v3717_v36 = vadd.f32 %v4072_v23, %v3716_v7 }
0x27f1   :  { %v3722_v24 = vmax.f32 %v3717_v36, 0.0 }
0x27f3   :  { %3975 = vmatmul.msk.f32.vlgmr.msrb.gmra.mxu0 %vm85_vm0, %v3722_v24 }
0x27f6   :  { %v3719_v25 = vpop.f32.mrf.mxu3 }
0x27f7   :  { %v3720_v26 = vadd.f32 %v4072_v23, %v3719_v25 }
0x27f9   :  { %v3723_v27 = vmax.f32 %v3720_v26, 0.0 }
0x27fb   :  { %3976 = vmatmul.msk.f32.gmra.mxu0 %vm85_vm0, %v3723_v27 }
0x2870   :  { %v3759_v29 = vpop.f32.mrf.mxu0 }
0x2871   :  { %v3760_v35 = vadd.f32 %v4073_v28, %v3759_v29 }
0x2873   :  { %3977 = vst [vmem:[%s5675_s3 + $0x10] sm:$0xff] %v3760_v35 }
0x2878   :  { %v3762_v30 = vpop.f32.mrf.mxu0 }
0x2879   :  { %v3763_v31 = vadd.f32 %v4073_v28, %v3762_v30 }
0x287b   :  { %3978 = vst [vmem:[%s5675_s3 + $0x18] sm:$0xff] %v3763_v31 }

</bundles_post_ra>
